<compile_context>
chip_gen: v7x
topology: tpu7x:2x2x1
jax: 0.10.0
libtpu: 0.0.40
codegen_flags: <defaults>
</compile_context>

<pallas_src>
import functools

import jax
import jax.numpy as jnp
from jax.experimental import pallas as pl
from jax.experimental.pallas import tpu as pltpu


def _round_up(x, m):
    return (x + m - 1) // m * m


def _default_matmul_dtype():
    """bf16 on v5e (f32 MXU matmuls are multi-pass there), f32 elsewhere."""
    try:
        kind = jax.devices()[0].device_kind.lower()
    except Exception:
        return jnp.float32
    if "v5e" in kind or "v5 lite" in kind or "v5litepod" in kind:
        return jnp.bfloat16
    return jnp.float32


# ----------------------------------------------------------------------------
# Kernel: fused MLP (nlayers linears, ReLU on hidden layers) + LayerNorm
# ----------------------------------------------------------------------------
def _mlp_layernorm_kernel(nlayers, eps, *refs):
    # refs layout: x, (w0, b0), (w1, b1), ..., gamma, beta, out
    x_ref = refs[0]
    gamma_ref = refs[-3]
    beta_ref = refs[-2]
    out_ref = refs[-1]

    h = x_ref[...]                                    # f32 block straight from HBM
    idx = 1
    for layer in range(nlayers):
        w = refs[idx][...]
        b = refs[idx + 1][...].astype(jnp.float32)    # (1, out_dim), f32
        idx += 2
        # Cast to the matmul dtype in VMEM (free on VPU); f32 MXU accumulator.
        h = jnp.dot(h.astype(w.dtype), w, preferred_element_type=jnp.float32) + b
        if layer < nlayers - 1:                       # ReLU on hidden layers only
            h = jnp.maximum(h, 0.0)

    # LayerNorm over the feature dim, always f32 (torch default eps=1e-5).
    mean = jnp.mean(h, axis=-1, keepdims=True)
    centered = h - mean
    var = jnp.mean(centered * centered, axis=-1, keepdims=True)
    h = centered * jax.lax.rsqrt(var + eps)
    h = h * gamma_ref[...].astype(jnp.float32) + beta_ref[...].astype(jnp.float32)
    out_ref[...] = h.astype(out_ref.dtype)


# ----------------------------------------------------------------------------
# Wrapper: row-tiled pallas_call
# ----------------------------------------------------------------------------
def mlp_layernorm(x, weights, biases, gamma, beta, *, tile_rows=2048, eps=1e-5,
                  matmul_dtype=jnp.float32, out_dtype=None):
    """MLP (weights[i]: (d_in_i, d_out_i)) + LayerNorm, row-tiled on TPU."""
    n_rows, in_dim = x.shape
    out_dim = weights[-1].shape[1]
    nlayers = len(weights)
    out_dtype = out_dtype if out_dtype is not None else matmul_dtype

    # Guarantee >= 2 row tiles whenever possible so the 'parallel' axis can
    # shard across both v7x TensorCores; otherwise use big MXU-aligned tiles.
    two_tc_cap = max(256, _round_up(pl.cdiv(n_rows, 2), 128))
    tile_rows = max(128, min(_round_up(int(tile_rows), 128), two_tc_cap))
    n_tiles = pl.cdiv(n_rows, tile_rows)
    padded_rows = n_tiles * tile_rows
    if padded_rows != n_rows:
        # LayerNorm of an all-zero row is finite (rsqrt(eps)); rows dropped below.
        x = jnp.pad(x, ((0, padded_rows - n_rows), (0, 0)))

    args = [x]
    # x block keeps its native feature width (== full array dim, so legal).
    in_specs = [pl.BlockSpec((tile_rows, in_dim), lambda i: (i, 0))]
    for w, b in zip(weights, biases):
        if w.dtype != matmul_dtype:                   # normally a no-op: cast in init
            w = w.astype(matmul_dtype)
        b2d = b.reshape(1, -1).astype(jnp.float32)
        args += [w, b2d]
        # Constant index_map -> resident across the whole row grid (no re-DMA).
        in_specs += [
            pl.BlockSpec(w.shape, lambda i: (0, 0)),
            pl.BlockSpec(b2d.shape, lambda i: (0, 0)),
        ]
    g2d = gamma.reshape(1, -1).astype(jnp.float32)
    bt2d = beta.reshape(1, -1).astype(jnp.float32)
    args += [g2d, bt2d]
    in_specs += [
        pl.BlockSpec(g2d.shape, lambda i: (0, 0)),
        pl.BlockSpec(bt2d.shape, lambda i: (0, 0)),
    ]

    kernel = functools.partial(_mlp_layernorm_kernel, nlayers, eps)
    out = pl.pallas_call(
        kernel,
        out_shape=jax.ShapeDtypeStruct((padded_rows, out_dim), out_dtype),
        grid=(n_tiles,),
        in_specs=in_specs,
        # out_dim is the latent (128) -> lane-dense, unmasked stores.
        out_specs=pl.BlockSpec((tile_rows, out_dim), lambda i: (i, 0)),
        compiler_params=pltpu.CompilerParams(
            dimension_semantics=("parallel",),        # row tiles across TCs (v7x)
        ),
    )(*args)

    if padded_rows != n_rows:
        out = out[:n_rows]
    return out


# Node + edge MLPs under one jit: single dispatch, no wrapper-side HBM copies
# beyond the (tail-only) row pad.
@functools.partial(jax.jit,
                   static_argnames=("tile_rows", "matmul_dtype", "out_dtype"))
def encoder_forward(node_params, edge_params, x, edge_features, *,
                    tile_rows, matmul_dtype, out_dtype):
    node_latent = mlp_layernorm(x, *node_params, tile_rows=tile_rows,
                                matmul_dtype=matmul_dtype, out_dtype=out_dtype)
    edge_latent = mlp_layernorm(edge_features, *edge_params, tile_rows=tile_rows,
                                matmul_dtype=matmul_dtype, out_dtype=out_dtype)
    return node_latent, edge_latent


# ----------------------------------------------------------------------------
# Parameter construction mirroring build_mlp(...) + nn.LayerNorm
# ----------------------------------------------------------------------------
def init_mlp_layernorm_params(key, input_size, hidden_sizes, output_size,
                              matmul_dtype=jnp.float32):
    layer_sizes = [input_size] + list(hidden_sizes) + [output_size]
    weights, biases = [], []
    for i in range(len(layer_sizes) - 1):
        key, wk, bk = jax.random.split(key, 3)
        fan_in = layer_sizes[i]
        scale = 1.0 / jnp.sqrt(jnp.float32(fan_in))
        # stored as (in, out) so the kernel does x @ W (== torch x @ W.T)
        w = jax.random.uniform(
            wk, (layer_sizes[i], layer_sizes[i + 1]), jnp.float32, -scale, scale)
        b = jax.random.uniform(
            bk, (layer_sizes[i + 1],), jnp.float32, -scale, scale)
        weights.append(w.astype(matmul_dtype))        # cast once, here
        biases.append(b)                              # biases stay f32
    gamma = jnp.ones((output_size,), jnp.float32)
    beta = jnp.zeros((output_size,), jnp.float32)
    return tuple(weights), tuple(biases), gamma, beta


class EncoderPallas:
    """JAX/Pallas equivalent of gns.graph_network.Encoder."""

    def __init__(self, nnode_in, nnode_out, nedge_in, nedge_out,
                 nmlp_layers, mlp_hidden_dim, key,
                 matmul_dtype=None, out_dtype=None, tile_rows=2048):
        if matmul_dtype is None:
            matmul_dtype = _default_matmul_dtype()
        k_node, k_edge = jax.random.split(key)
        self.node_params = init_mlp_layernorm_params(
            k_node, nnode_in, [mlp_hidden_dim] * nmlp_layers, nnode_out,
            matmul_dtype=matmul_dtype)
        self.edge_params = init_mlp_layernorm_params(
            k_edge, nedge_in, [mlp_hidden_dim] * nmlp_layers, nedge_out,
            matmul_dtype=matmul_dtype)
        self.matmul_dtype = matmul_dtype
        self.out_dtype = out_dtype if out_dtype is not None else matmul_dtype
        self.tile_rows = tile_rows

    def __call__(self, x, edge_features):
        return encoder_forward(
            self.node_params, self.edge_params, x, edge_features,
            tile_rows=self.tile_rows, matmul_dtype=self.matmul_dtype,
            out_dtype=self.out_dtype)


# ----------------------------------------------------------------------------
# Reference (plain JAX), mirroring the kernel's numeric path
# ----------------------------------------------------------------------------
def _ref_mlp_ln(x, weights, biases, gamma, beta, eps=1e-5):
    h = x.astype(jnp.float32)
    for i, (w, b) in enumerate(zip(weights, biases)):
        h = jnp.dot(h.astype(w.dtype), w,
                    preferred_element_type=jnp.float32) + b.astype(jnp.float32)
        if i < len(weights) - 1:
            h = jnp.maximum(h, 0.0)
    mean = jnp.mean(h, axis=-1, keepdims=True)
    var = jnp.mean(jnp.square(h - mean), axis=-1, keepdims=True)
    return (h - mean) * jax.lax.rsqrt(var + eps) * gamma + beta


if __name__ == "__main__":
    key = jax.random.PRNGKey(0)
    k_params, k_x, k_e = jax.random.split(key, 3)

    # Real Encoder feature dims: latent/hidden = 128 (lane-dense output),
    # 2 hidden MLP layers.  Row counts deliberately not tile-multiples.
    nparticles = 300
    nedges = 777
    nnode_in = 30            # 10 pos + 4 boundary dists + 16 type embedding
    nedge_in = 3             # relative (dx, dy) + distance
    latent = 128
    nmlp_layers = 2

    x = jax.random.normal(k_x, (nparticles, nnode_in), jnp.float32)
    edge_features = jax.random.normal(k_e, (nedges, nedge_in), jnp.float32)

    # --- f32 path -------------------------------------------------------------
    enc = EncoderPallas(nnode_in, latent, nedge_in, latent,
                        nmlp_layers, latent, k_params,
                        matmul_dtype=jnp.float32)
    node_out, edge_out = enc(x, edge_features)
    node_out = jax.block_until_ready(node_out)
    edge_out = jax.block_until_ready(edge_out)

    node_ref = _ref_mlp_ln(x, *enc.node_params)
    edge_ref = _ref_mlp_ln(edge_features, *enc.edge_params)
    assert node_out.shape == (nparticles, latent)
    assert edge_out.shape == (nedges, latent)
    assert node_out.dtype == jnp.float32
    assert jnp.allclose(node_out, node_ref, atol=2e-3, rtol=2e-3)
    assert jnp.allclose(edge_out, edge_ref, atol=2e-3, rtol=2e-3)

    # --- bf16 matmul/output path (halves HBM traffic; LN/accumulator stay f32) -
    enc_bf16 = EncoderPallas(nnode_in, latent, nedge_in, latent,
                             nmlp_layers, latent, k_params,
                             matmul_dtype=jnp.bfloat16)
    node_bf, edge_bf = enc_bf16(x, edge_features)
    node_bf = jax.block_until_ready(node_bf)
    edge_bf = jax.block_until_ready(edge_bf)
    assert node_bf.dtype == jnp.bfloat16
    node_ref_bf = _ref_mlp_ln(x, *enc_bf16.node_params)
    edge_ref_bf = _ref_mlp_ln(edge_features, *enc_bf16.edge_params)
    assert jnp.allclose(node_bf.astype(jnp.float32), node_ref_bf,
                        atol=3e-2, rtol=3e-2)
    assert jnp.allclose(edge_bf.astype(jnp.float32), edge_ref_bf,
                        atol=3e-2, rtol=3e-2)

    print("KERNEL_OK")
</pallas_src>

<mosaic_0001>
module attributes {stable_mosaic.version = 11 : i64} {
  func.func @_mlp_layernorm_kernel(%arg0: i32, %arg1: memref<512x3xf32, #tpu.memory_space<vmem>>, %arg2: memref<3x128xf32, #tpu.memory_space<vmem>>, %arg3: memref<1x128xf32, #tpu.memory_space<vmem>>, %arg4: memref<128x128xf32, #tpu.memory_space<vmem>>, %arg5: memref<1x128xf32, #tpu.memory_space<vmem>>, %arg6: memref<128x128xf32, #tpu.memory_space<vmem>>, %arg7: memref<1x128xf32, #tpu.memory_space<vmem>>, %arg8: memref<1x128xf32, #tpu.memory_space<vmem>>, %arg9: memref<1x128xf32, #tpu.memory_space<vmem>>, %arg10: memref<512x128xf32, #tpu.memory_space<vmem>>) attributes {dimension_semantics = [#tpu.dimension_semantics<parallel>], iteration_bounds = array<i64: 2>, scalar_prefetch = 0 : i64, scratch_operands = 0 : i64, tpu.core_type = #tpu.core_type<tc>, window_params = [{transform_indices = @transform_0, window_bounds = array<i64: 512, 3>}, {pipeline_mode = #tpu.pipeline_mode<synchronous>, transform_indices = @transform_1, window_bounds = array<i64: 3, 128>}, {pipeline_mode = #tpu.pipeline_mode<synchronous>, transform_indices = @transform_2, window_bounds = array<i64: 1, 128>}, {pipeline_mode = #tpu.pipeline_mode<synchronous>, transform_indices = @transform_3, window_bounds = array<i64: 128, 128>}, {pipeline_mode = #tpu.pipeline_mode<synchronous>, transform_indices = @transform_4, window_bounds = array<i64: 1, 128>}, {pipeline_mode = #tpu.pipeline_mode<synchronous>, transform_indices = @transform_5, window_bounds = array<i64: 128, 128>}, {pipeline_mode = #tpu.pipeline_mode<synchronous>, transform_indices = @transform_6, window_bounds = array<i64: 1, 128>}, {pipeline_mode = #tpu.pipeline_mode<synchronous>, transform_indices = @transform_7, window_bounds = array<i64: 1, 128>}, {pipeline_mode = #tpu.pipeline_mode<synchronous>, transform_indices = @transform_8, window_bounds = array<i64: 1, 128>}, {transform_indices = @transform_9, window_bounds = array<i64: 512, 128>}]} {
    %c0 = arith.constant 0 : index
    %c0_0 = arith.constant 0 : index
    %0 = vector.load %arg1[%c0, %c0_0] : memref<512x3xf32, #tpu.memory_space<vmem>>, vector<512x3xf32>
    %c0_1 = arith.constant 0 : index
    %c0_2 = arith.constant 0 : index
    %1 = vector.load %arg2[%c0_1, %c0_2] : memref<3x128xf32, #tpu.memory_space<vmem>>, vector<3x128xf32>
    %c0_3 = arith.constant 0 : index
    %c0_4 = arith.constant 0 : index
    %2 = vector.load %arg3[%c0_3, %c0_4] : memref<1x128xf32, #tpu.memory_space<vmem>>, vector<1x128xf32>
    %cst = arith.constant dense<0.000000e+00> : vector<512x128xf32>
    %3 = tpu.matmul %0, %1, %cst {dimension_numbers = #tpu.dot_dimension_numbers<[1], [0], [0], [1], [0, 0, 1, 1], [], []>} : vector<512x3xf32>, vector<3x128xf32>, vector<512x128xf32> -> vector<512x128xf32>
    %4 = vector.broadcast %2 : vector<1x128xf32> to vector<512x128xf32>
    %5 = arith.addf %3, %4 : vector<512x128xf32>
    %cst_5 = arith.constant 0.000000e+00 : f32
    %6 = vector.broadcast %cst_5 : f32 to vector<512x128xf32>
    %7 = arith.maximumf %5, %6 : vector<512x128xf32>
    %c0_6 = arith.constant 0 : index
    %c0_7 = arith.constant 0 : index
    %8 = vector.load %arg4[%c0_6, %c0_7] : memref<128x128xf32, #tpu.memory_space<vmem>>, vector<128x128xf32>
    %c0_8 = arith.constant 0 : index
    %c0_9 = arith.constant 0 : index
    %9 = vector.load %arg5[%c0_8, %c0_9] : memref<1x128xf32, #tpu.memory_space<vmem>>, vector<1x128xf32>
    %cst_10 = arith.constant dense<0.000000e+00> : vector<512x128xf32>
    %10 = tpu.matmul %7, %8, %cst_10 {dimension_numbers = #tpu.dot_dimension_numbers<[1], [0], [0], [1], [0, 0, 1, 1], [], []>} : vector<512x128xf32>, vector<128x128xf32>, vector<512x128xf32> -> vector<512x128xf32>
    %11 = vector.broadcast %9 : vector<1x128xf32> to vector<512x128xf32>
    %12 = arith.addf %10, %11 : vector<512x128xf32>
    %cst_11 = arith.constant 0.000000e+00 : f32
    %13 = vector.broadcast %cst_11 : f32 to vector<512x128xf32>
    %14 = arith.maximumf %12, %13 : vector<512x128xf32>
    %c0_12 = arith.constant 0 : index
    %c0_13 = arith.constant 0 : index
    %15 = vector.load %arg6[%c0_12, %c0_13] : memref<128x128xf32, #tpu.memory_space<vmem>>, vector<128x128xf32>
    %c0_14 = arith.constant 0 : index
    %c0_15 = arith.constant 0 : index
    %16 = vector.load %arg7[%c0_14, %c0_15] : memref<1x128xf32, #tpu.memory_space<vmem>>, vector<1x128xf32>
    %cst_16 = arith.constant dense<0.000000e+00> : vector<512x128xf32>
    %17 = tpu.matmul %14, %15, %cst_16 {dimension_numbers = #tpu.dot_dimension_numbers<[1], [0], [0], [1], [0, 0, 1, 1], [], []>} : vector<512x128xf32>, vector<128x128xf32>, vector<512x128xf32> -> vector<512x128xf32>
    %18 = vector.broadcast %16 : vector<1x128xf32> to vector<512x128xf32>
    %19 = arith.addf %17, %18 : vector<512x128xf32>
    %cst_17 = arith.constant dense<0.000000e+00> : vector<512xf32>
    %20 = vector.multi_reduction <add>, %19, %cst_17 [1] : vector<512x128xf32> to vector<512xf32>
    %21 = vector.shape_cast %20 : vector<512xf32> to vector<512x1xf32>
    %cst_18 = arith.constant 1.280000e+02 : f32
    %22 = vector.broadcast %cst_18 : f32 to vector<512x1xf32>
    %23 = arith.divf %21, %22 : vector<512x1xf32>
    %24 = vector.broadcast %23 : vector<512x1xf32> to vector<512x128xf32>
    %25 = arith.subf %19, %24 : vector<512x128xf32>
    %26 = arith.mulf %25, %25 : vector<512x128xf32>
    %cst_19 = arith.constant dense<0.000000e+00> : vector<512xf32>
    %27 = vector.multi_reduction <add>, %26, %cst_19 [1] : vector<512x128xf32> to vector<512xf32>
    %28 = vector.shape_cast %27 : vector<512xf32> to vector<512x1xf32>
    %cst_20 = arith.constant 1.280000e+02 : f32
    %29 = vector.broadcast %cst_20 : f32 to vector<512x1xf32>
    %30 = arith.divf %28, %29 : vector<512x1xf32>
    %cst_21 = arith.constant 9.99999974E-6 : f32
    %31 = vector.broadcast %cst_21 : f32 to vector<512x1xf32>
    %32 = arith.addf %30, %31 : vector<512x1xf32>
    %33 = math.rsqrt %32 : vector<512x1xf32>
    %34 = vector.broadcast %33 : vector<512x1xf32> to vector<512x128xf32>
    %35 = arith.mulf %25, %34 : vector<512x128xf32>
    %c0_22 = arith.constant 0 : index
    %c0_23 = arith.constant 0 : index
    %36 = vector.load %arg8[%c0_22, %c0_23] : memref<1x128xf32, #tpu.memory_space<vmem>>, vector<1x128xf32>
    %37 = vector.broadcast %36 : vector<1x128xf32> to vector<512x128xf32>
    %38 = arith.mulf %35, %37 : vector<512x128xf32>
    %c0_24 = arith.constant 0 : index
    %c0_25 = arith.constant 0 : index
    %39 = vector.load %arg9[%c0_24, %c0_25] : memref<1x128xf32, #tpu.memory_space<vmem>>, vector<1x128xf32>
    %40 = vector.broadcast %39 : vector<1x128xf32> to vector<512x128xf32>
    %41 = arith.addf %38, %40 : vector<512x128xf32>
    %c0_26 = arith.constant 0 : index
    %c0_27 = arith.constant 0 : index
    %42 = vector.load %arg10[%c0_26, %c0_27] : memref<512x128xf32, #tpu.memory_space<vmem>>, vector<512x128xf32>
    tpu.vector_store %arg10[%c0_26, %c0_27], %41 {strides = array<i32>} : memref<512x128xf32, #tpu.memory_space<vmem>>, vector<512x128xf32>,
    return
  }
  func.func @transform_0(%arg0: i32) -> (i32, i32) {
    %c0_i32 = arith.constant 0 : i32
    %c0_i32_0 = arith.constant 0 : i32
    return %arg0, %c0_i32 : i32, i32
  }
  func.func @transform_1(%arg0: i32) -> (i32, i32) {
    %c0_i32 = arith.constant 0 : i32
    %c0_i32_0 = arith.constant 0 : i32
    %c0_i32_1 = arith.constant 0 : i32
    return %c0_i32, %c0_i32_0 : i32, i32
  }
  func.func @transform_2(%arg0: i32) -> (i32, i32) {
    %c0_i32 = arith.constant 0 : i32
    %c0_i32_0 = arith.constant 0 : i32
    %c0_i32_1 = arith.constant 0 : i32
    return %c0_i32, %c0_i32_0 : i32, i32
  }
  func.func @transform_3(%arg0: i32) -> (i32, i32) {
    %c0_i32 = arith.constant 0 : i32
    %c0_i32_0 = arith.constant 0 : i32
    %c0_i32_1 = arith.constant 0 : i32
    return %c0_i32, %c0_i32_0 : i32, i32
  }
  func.func @transform_4(%arg0: i32) -> (i32, i32) {
    %c0_i32 = arith.constant 0 : i32
    %c0_i32_0 = arith.constant 0 : i32
    %c0_i32_1 = arith.constant 0 : i32
    return %c0_i32, %c0_i32_0 : i32, i32
  }
  func.func @transform_5(%arg0: i32) -> (i32, i32) {
    %c0_i32 = arith.constant 0 : i32
    %c0_i32_0 = arith.constant 0 : i32
    %c0_i32_1 = arith.constant 0 : i32
    return %c0_i32, %c0_i32_0 : i32, i32
  }
  func.func @transform_6(%arg0: i32) -> (i32, i32) {
    %c0_i32 = arith.constant 0 : i32
    %c0_i32_0 = arith.constant 0 : i32
    %c0_i32_1 = arith.constant 0 : i32
    return %c0_i32, %c0_i32_0 : i32, i32
  }
  func.func @transform_7(%arg0: i32) -> (i32, i32) {
    %c0_i32 = arith.constant 0 : i32
    %c0_i32_0 = arith.constant 0 : i32
    %c0_i32_1 = arith.constant 0 : i32
    return %c0_i32, %c0_i32_0 : i32, i32
  }
  func.func @transform_8(%arg0: i32) -> (i32, i32) {
    %c0_i32 = arith.constant 0 : i32
    %c0_i32_0 = arith.constant 0 : i32
    %c0_i32_1 = arith.constant 0 : i32
    return %c0_i32, %c0_i32_0 : i32, i32
  }
  func.func @transform_9(%arg0: i32) -> (i32, i32) {
    %c0_i32 = arith.constant 0 : i32
    %c0_i32_0 = arith.constant 0 : i32
    return %arg0, %c0_i32 : i32, i32
  }
}

module attributes {stable_mosaic.version = 11 : i64} {
  func.func @_mlp_layernorm_kernel(%arg0: i32, %arg1: memref<256x30xf32, #tpu.memory_space<vmem>>, %arg2: memref<30x128xf32, #tpu.memory_space<vmem>>, %arg3: memref<1x128xf32, #tpu.memory_space<vmem>>, %arg4: memref<128x128xf32, #tpu.memory_space<vmem>>, %arg5: memref<1x128xf32, #tpu.memory_space<vmem>>, %arg6: memref<128x128xf32, #tpu.memory_space<vmem>>, %arg7: memref<1x128xf32, #tpu.memory_space<vmem>>, %arg8: memref<1x128xf32, #tpu.memory_space<vmem>>, %arg9: memref<1x128xf32, #tpu.memory_space<vmem>>, %arg10: memref<256x128xf32, #tpu.memory_space<vmem>>) attributes {dimension_semantics = [#tpu.dimension_semantics<parallel>], iteration_bounds = array<i64: 2>, scalar_prefetch = 0 : i64, scratch_operands = 0 : i64, tpu.core_type = #tpu.core_type<tc>, window_params = [{transform_indices = @transform_0, window_bounds = array<i64: 256, 30>}, {pipeline_mode = #tpu.pipeline_mode<synchronous>, transform_indices = @transform_1, window_bounds = array<i64: 30, 128>}, {pipeline_mode = #tpu.pipeline_mode<synchronous>, transform_indices = @transform_2, window_bounds = array<i64: 1, 128>}, {pipeline_mode = #tpu.pipeline_mode<synchronous>, transform_indices = @transform_3, window_bounds = array<i64: 128, 128>}, {pipeline_mode = #tpu.pipeline_mode<synchronous>, transform_indices = @transform_4, window_bounds = array<i64: 1, 128>}, {pipeline_mode = #tpu.pipeline_mode<synchronous>, transform_indices = @transform_5, window_bounds = array<i64: 128, 128>}, {pipeline_mode = #tpu.pipeline_mode<synchronous>, transform_indices = @transform_6, window_bounds = array<i64: 1, 128>}, {pipeline_mode = #tpu.pipeline_mode<synchronous>, transform_indices = @transform_7, window_bounds = array<i64: 1, 128>}, {pipeline_mode = #tpu.pipeline_mode<synchronous>, transform_indices = @transform_8, window_bounds = array<i64: 1, 128>}, {transform_indices = @transform_9, window_bounds = array<i64: 256, 128>}]} {
    %c0 = arith.constant 0 : index
    %c0_0 = arith.constant 0 : index
    %0 = vector.load %arg1[%c0, %c0_0] : memref<256x30xf32, #tpu.memory_space<vmem>>, vector<256x30xf32>
    %c0_1 = arith.constant 0 : index
    %c0_2 = arith.constant 0 : index
    %1 = vector.load %arg2[%c0_1, %c0_2] : memref<30x128xf32, #tpu.memory_space<vmem>>, vector<30x128xf32>
    %c0_3 = arith.constant 0 : index
    %c0_4 = arith.constant 0 : index
    %2 = vector.load %arg3[%c0_3, %c0_4] : memref<1x128xf32, #tpu.memory_space<vmem>>, vector<1x128xf32>
    %cst = arith.constant dense<0.000000e+00> : vector<256x128xf32>
    %3 = tpu.matmul %0, %1, %cst {dimension_numbers = #tpu.dot_dimension_numbers<[1], [0], [0], [1], [0, 0, 1, 1], [], []>} : vector<256x30xf32>, vector<30x128xf32>, vector<256x128xf32> -> vector<256x128xf32>
    %4 = vector.broadcast %2 : vector<1x128xf32> to vector<256x128xf32>
    %5 = arith.addf %3, %4 : vector<256x128xf32>
    %cst_5 = arith.constant 0.000000e+00 : f32
    %6 = vector.broadcast %cst_5 : f32 to vector<256x128xf32>
    %7 = arith.maximumf %5, %6 : vector<256x128xf32>
    %c0_6 = arith.constant 0 : index
    %c0_7 = arith.constant 0 : index
    %8 = vector.load %arg4[%c0_6, %c0_7] : memref<128x128xf32, #tpu.memory_space<vmem>>, vector<128x128xf32>
    %c0_8 = arith.constant 0 : index
    %c0_9 = arith.constant 0 : index
    %9 = vector.load %arg5[%c0_8, %c0_9] : memref<1x128xf32, #tpu.memory_space<vmem>>, vector<1x128xf32>
    %cst_10 = arith.constant dense<0.000000e+00> : vector<256x128xf32>
    %10 = tpu.matmul %7, %8, %cst_10 {dimension_numbers = #tpu.dot_dimension_numbers<[1], [0], [0], [1], [0, 0, 1, 1], [], []>} : vector<256x128xf32>, vector<128x128xf32>, vector<256x128xf32> -> vector<256x128xf32>
    %11 = vector.broadcast %9 : vector<1x128xf32> to vector<256x128xf32>
    %12 = arith.addf %10, %11 : vector<256x128xf32>
    %cst_11 = arith.constant 0.000000e+00 : f32
    %13 = vector.broadcast %cst_11 : f32 to vector<256x128xf32>
    %14 = arith.maximumf %12, %13 : vector<256x128xf32>
    %c0_12 = arith.constant 0 : index
    %c0_13 = arith.constant 0 : index
    %15 = vector.load %arg6[%c0_12, %c0_13] : memref<128x128xf32, #tpu.memory_space<vmem>>, vector<128x128xf32>
    %c0_14 = arith.constant 0 : index
    %c0_15 = arith.constant 0 : index
    %16 = vector.load %arg7[%c0_14, %c0_15] : memref<1x128xf32, #tpu.memory_space<vmem>>, vector<1x128xf32>
    %cst_16 = arith.constant dense<0.000000e+00> : vector<256x128xf32>
    %17 = tpu.matmul %14, %15, %cst_16 {dimension_numbers = #tpu.dot_dimension_numbers<[1], [0], [0], [1], [0, 0, 1, 1], [], []>} : vector<256x128xf32>, vector<128x128xf32>, vector<256x128xf32> -> vector<256x128xf32>
    %18 = vector.broadcast %16 : vector<1x128xf32> to vector<256x128xf32>
    %19 = arith.addf %17, %18 : vector<256x128xf32>
    %cst_17 = arith.constant dense<0.000000e+00> : vector<256xf32>
    %20 = vector.multi_reduction <add>, %19, %cst_17 [1] : vector<256x128xf32> to vector<256xf32>
    %21 = vector.shape_cast %20 : vector<256xf32> to vector<256x1xf32>
    %cst_18 = arith.constant 1.280000e+02 : f32
    %22 = vector.broadcast %cst_18 : f32 to vector<256x1xf32>
    %23 = arith.divf %21, %22 : vector<256x1xf32>
    %24 = vector.broadcast %23 : vector<256x1xf32> to vector<256x128xf32>
    %25 = arith.subf %19, %24 : vector<256x128xf32>
    %26 = arith.mulf %25, %25 : vector<256x128xf32>
    %cst_19 = arith.constant dense<0.000000e+00> : vector<256xf32>
    %27 = vector.multi_reduction <add>, %26, %cst_19 [1] : vector<256x128xf32> to vector<256xf32>
    %28 = vector.shape_cast %27 : vector<256xf32> to vector<256x1xf32>
    %cst_20 = arith.constant 1.280000e+02 : f32
    %29 = vector.broadcast %cst_20 : f32 to vector<256x1xf32>
    %30 = arith.divf %28, %29 : vector<256x1xf32>
    %cst_21 = arith.constant 9.99999974E-6 : f32
    %31 = vector.broadcast %cst_21 : f32 to vector<256x1xf32>
    %32 = arith.addf %30, %31 : vector<256x1xf32>
    %33 = math.rsqrt %32 : vector<256x1xf32>
    %34 = vector.broadcast %33 : vector<256x1xf32> to vector<256x128xf32>
    %35 = arith.mulf %25, %34 : vector<256x128xf32>
    %c0_22 = arith.constant 0 : index
    %c0_23 = arith.constant 0 : index
    %36 = vector.load %arg8[%c0_22, %c0_23] : memref<1x128xf32, #tpu.memory_space<vmem>>, vector<1x128xf32>
    %37 = vector.broadcast %36 : vector<1x128xf32> to vector<256x128xf32>
    %38 = arith.mulf %35, %37 : vector<256x128xf32>
    %c0_24 = arith.constant 0 : index
    %c0_25 = arith.constant 0 : index
    %39 = vector.load %arg9[%c0_24, %c0_25] : memref<1x128xf32, #tpu.memory_space<vmem>>, vector<1x128xf32>
    %40 = vector.broadcast %39 : vector<1x128xf32> to vector<256x128xf32>
    %41 = arith.addf %38, %40 : vector<256x128xf32>
    %c0_26 = arith.constant 0 : index
    %c0_27 = arith.constant 0 : index
    %42 = vector.load %arg10[%c0_26, %c0_27] : memref<256x128xf32, #tpu.memory_space<vmem>>, vector<256x128xf32>
    tpu.vector_store %arg10[%c0_26, %c0_27], %41 {strides = array<i32>} : memref<256x128xf32, #tpu.memory_space<vmem>>, vector<256x128xf32>,
    return
  }
  func.func @transform_0(%arg0: i32) -> (i32, i32) {
    %c0_i32 = arith.constant 0 : i32
    %c0_i32_0 = arith.constant 0 : i32
    return %arg0, %c0_i32 : i32, i32
  }
  func.func @transform_1(%arg0: i32) -> (i32, i32) {
    %c0_i32 = arith.constant 0 : i32
    %c0_i32_0 = arith.constant 0 : i32
    %c0_i32_1 = arith.constant 0 : i32
    return %c0_i32, %c0_i32_0 : i32, i32
  }
  func.func @transform_2(%arg0: i32) -> (i32, i32) {
    %c0_i32 = arith.constant 0 : i32
    %c0_i32_0 = arith.constant 0 : i32
    %c0_i32_1 = arith.constant 0 : i32
    return %c0_i32, %c0_i32_0 : i32, i32
  }
  func.func @transform_3(%arg0: i32) -> (i32, i32) {
    %c0_i32 = arith.constant 0 : i32
    %c0_i32_0 = arith.constant 0 : i32
    %c0_i32_1 = arith.constant 0 : i32
    return %c0_i32, %c0_i32_0 : i32, i32
  }
  func.func @transform_4(%arg0: i32) -> (i32, i32) {
    %c0_i32 = arith.constant 0 : i32
    %c0_i32_0 = arith.constant 0 : i32
    %c0_i32_1 = arith.constant 0 : i32
    return %c0_i32, %c0_i32_0 : i32, i32
  }
  func.func @transform_5(%arg0: i32) -> (i32, i32) {
    %c0_i32 = arith.constant 0 : i32
    %c0_i32_0 = arith.constant 0 : i32
    %c0_i32_1 = arith.constant 0 : i32
    return %c0_i32, %c0_i32_0 : i32, i32
  }
  func.func @transform_6(%arg0: i32) -> (i32, i32) {
    %c0_i32 = arith.constant 0 : i32
    %c0_i32_0 = arith.constant 0 : i32
    %c0_i32_1 = arith.constant 0 : i32
    return %c0_i32, %c0_i32_0 : i32, i32
  }
  func.func @transform_7(%arg0: i32) -> (i32, i32) {
    %c0_i32 = arith.constant 0 : i32
    %c0_i32_0 = arith.constant 0 : i32
    %c0_i32_1 = arith.constant 0 : i32
    return %c0_i32, %c0_i32_0 : i32, i32
  }
  func.func @transform_8(%arg0: i32) -> (i32, i32) {
    %c0_i32 = arith.constant 0 : i32
    %c0_i32_0 = arith.constant 0 : i32
    %c0_i32_1 = arith.constant 0 : i32
    return %c0_i32, %c0_i32_0 : i32, i32
  }
  func.func @transform_9(%arg0: i32) -> (i32, i32) {
    %c0_i32 = arith.constant 0 : i32
    %c0_i32_0 = arith.constant 0 : i32
    return %arg0, %c0_i32 : i32, i32
  }
}

</mosaic_0001>

<bundles_post_ra>
// kernel: encoder_forward.2
= control target key start
LH: loop header
LB: loop body
LE: loop exit
PB: predicated region body
PF: predicated region fallthrough
CT: control target
= control target key end

     0   :  { %s2391_s30 = smov 0   ;;  %s3120_s0 = inlined_call_operand.vmem [shape: f32[512,30], index: 0, kind: input, shape index: {}]   ;;  %s3121_s1 = inlined_call_operand.vmem [shape: f32[30,128], index: 1, kind: input, shape index: {}]   ;;  %s3122_s2 = inlined_call_operand.vmem [shape: f32[1,128], index: 2, kind: input, shape index: {}]   ;;  %s3123_s3 = inlined_call_operand.vmem [shape: f32[128,128], index: 3, kind: input, shape index: {}]   ;;  %s3124_s4 = inlined_call_operand.vmem [shape: f32[1,128], index: 4, kind: input, shape index: {}]   ;;  %s3125_s5 = inlined_call_operand.vmem [shape: f32[128,128], index: 5, kind: input, shape index: {}]   ;;  %s3126_s6 = inlined_call_operand.vmem [shape: f32[1,128], index: 6, kind: input, shape index: {}]   ;;  %s3127_s7 = inlined_call_operand.vmem [shape: f32[1,128], index: 7, kind: input, shape index: {}]   ;;  %s3128_s8 = inlined_call_operand.vmem [shape: f32[1,128], index: 8, kind: input, shape index: {}]   ;;  %s3129_s9 = inlined_call_operand.vmem [shape: f32[512,128], index: 9, kind: output, shape index: {}]  }
   0x1 LB: > { %s1784_s10 = sadd.s32 4294967295, %s2338_s30   ;;  %p1788_p0 = scmp.ge.s32.totalorder %s2338_s30, 1  ;;  %s2338_s30 = sphi %s2391_s30, %s19_s30  }
   0x2   : > { %p288_p1 = scmp.lt.s32.totalorder %s2338_s30, 3 }
   0x4   : > { %p289_p2 = pnand %p1788_p0, %p288_p1 }
   0x5   : > { %v368_v0 = vld [vmem:[%s3121_s1] sm:$0xff] (!%p289_p2)  ;;  %v369_v1 = vld [vmem:[%s3121_s1 + $0x8] sm:$0xff] (!%p289_p2)  ;;  %v370_v2 = vld [vmem:[%s3121_s1 + $0x10] sm:$0xff] (!%p289_p2)  ;;  %vm476_vm0 = vcmask (!%p289_p2), 1045504   ;;  %s1789_s17 = sshll.u32 (!%p289_p2), %s1784_s10, 5  ;;  %vm2340_vm1 = vmmov (!%p289_p2), 1  }
   0x6   : > { %292 = sbr.rel (%p289_p2) target bundleno = 1045 (0x415), region = 56  ;;  %v2181_v3 = vpack.c.bf16 (!%p289_p2), %v369_v1, %v368_v0  ;;  %v371_v4 = vld [vmem:[%s3121_s1 + $0x18] sm:$0x3f] (!%p289_p2)  ;;  %p325_p3 = scmp.lt.s32.totalorder (!%p289_p2), %s1789_s17, 63  ;;  %vm2411_vm2 = vmpackc.low (!%p289_p2), %vm476_vm0, %vm2340_vm1  ;;  %v737_v7 = vld [vmem:[%s3123_s3] sm:$0xff] (!%p289_p2)  ;;  %vm379_vm3 = vcmask (!%p289_p2), 244736  }
   0x7   : > { %v2185_v5 = vpack.c.bf16 (!%p289_p2), %v371_v4, %v370_v2  ;;  %v738_v8 = vld [vmem:[%s3123_s3 + $0x8] sm:$0xff] (!%p289_p2)  ;;  %v739_v13 = vld [vmem:[%s3123_s3 + $0x10] sm:$0xff] (!%p289_p2)  ;;  %v740_v14 = vld [vmem:[%s3123_s3 + $0x18] sm:$0xff] (!%p289_p2) }
   0x8   : > { %2182 = vmatprep.subr.bf16.mxu0 (!%p289_p2), %v2181_v3  ;;  %2255 = vmatprep.subr.bf16.mxu1 (!%p289_p2), %v2181_v3  ;;  %v2191_v9 = vpack.c.bf16 (!%p289_p2), %v738_v8, %v737_v7  ;;  %v2195_v20 = vpack.c.bf16 (!%p289_p2), %v740_v14, %v739_v13  ;;  %v741_v21 = vld [vmem:[%s3123_s3 + $0x20] sm:$0xff] (!%p289_p2)  ;;  %v742_v22 = vld [vmem:[%s3123_s3 + $0x28] sm:$0xff] (!%p289_p2)  ;;  %v743_v28 = vld [vmem:[%s3123_s3 + $0x30] sm:$0xff] (!%p289_p2) }
   0x9   : > { %2184 = vmatpush3.bf16.msra.mxu0 (!%p289_p2), %v2181_v3  ;;  %2257 = vmatpush3.bf16.msra.mxu1 (!%p289_p2), %v2181_v3  ;;  %v2199_v27 = vpack.c.bf16 (!%p289_p2), %v742_v22, %v741_v21  ;;  %v744_v29 = vld [vmem:[%s3123_s3 + $0x38] sm:$0xff] (!%p289_p2)  ;;  %v745_v35 = vld [vmem:[%s3123_s3 + $0x40] sm:$0xff] (!%p289_p2)  ;;  %v746_v36 = vld [vmem:[%s3123_s3 + $0x48] sm:$0xff] (!%p289_p2) }
   0xa   : > { %2187 = vmatprep.subr.msk.bf16.mxu0 (!%p289_p2), %vm2411_vm2, %v2185_v5  ;;  %2256 = vmatprep.subr.msk.bf16.mxu1 (!%p289_p2), %vm2411_vm2, %v2185_v5  ;;  %v2203_v34 = vpack.c.bf16 (!%p289_p2), %v744_v29, %v743_v28  ;;  %v2207_v41 = vpack.c.bf16 (!%p289_p2), %v746_v36, %v745_v35  ;;  %v747_v42 = vld [vmem:[%s3123_s3 + $0x50] sm:$0xff] (!%p289_p2)  ;;  %v748_v43 = vld [vmem:[%s3123_s3 + $0x58] sm:$0xff] (!%p289_p2)  ;;  %v749_v49 = vld [vmem:[%s3123_s3 + $0x60] sm:$0xff] (!%p289_p2) }
   0xb   : > { %v2211_v48 = vpack.c.bf16 (!%p289_p2), %v748_v43, %v747_v42  ;;  %v750_v50 = vld [vmem:[%s3123_s3 + $0x68] sm:$0xff] (!%p289_p2)  ;;  %v751_v60 = vld [vmem:[%s3123_s3 + $0x70] sm:$0xff] (!%p289_p2)  ;;  %v752_v61 = vld [vmem:[%s3123_s3 + $0x78] sm:$0xff] (!%p289_p2) }
   0xc   : > { %v2215_v55 = vpack.c.bf16 (!%p289_p2), %v750_v50, %v749_v49  ;;  %v2219_v62 = vpack.c.bf16 (!%p289_p2), %v752_v61, %v751_v60  ;;  %v1017_v63 = vld [vmem:[%s3125_s5] sm:$0xff] (!%p289_p2)  ;;  %v1018_v0 = vld [vmem:[%s3125_s5 + $0x8] sm:$0xff] (!%p289_p2)  ;;  %v1019_v1 = vld [vmem:[%s3125_s5 + $0x10] sm:$0xff] (!%p289_p2) }
   0xd   : > { %s3133_s17 = smov (!%p325_p3, %s1789_s17), 63  ;;  %2190 = vmatpush3.bf16.msk.msra.mxu0 %vm2411_vm2, %v2185_v5  ;;  %2258 = vmatpush3.bf16.msk.msra.mxu1 %vm2411_vm2, %v2185_v5  ;;  %v2223_v2 = vpack.c.bf16 %v1018_v0, %v1017_v63  ;;  %v1020_v3 = vld [vmem:[%s3125_s5 + $0x18] sm:$0xff]  ;;  %v1021_v5 = vld [vmem:[%s3125_s5 + $0x20] sm:$0xff]  ;;  %v1022_v6 = vld [vmem:[%s3125_s5 + $0x28] sm:$0xff] }
   0xe   : > { %s1790_s24 = sshll.u32 %s3133_s17, 3  ;;  %2192 = vmatprep.subr.bf16.mxu1 %v2191_v9  ;;  %v2227_v4 = vpack.c.bf16 %v1020_v3, %v1019_v1  ;;  %v2231_v7 = vpack.c.bf16 %v1022_v6, %v1021_v5  ;;  %v1023_v8 = vld [vmem:[%s3125_s5 + $0x30] sm:$0xff] }
   0xf   : > { %s2433_s27 = scalar_lea.vmem %s3120_s0, %s1790_s24  ;;  %2224 = vmatprep.subr.bf16.mxu0 %v2223_v2  ;;  %v1027_v14 = vld [vmem:[%s3125_s5 + $0x50] sm:$0xff]  ;;  %s2989_s29 = scalar_lea.vmem %s3129_s9, %s1790_s24 }
  0x10   : > { %v336_v10 = vld [vmem:[%s2433_s27] sm:$0xff]  ;;  %v337_v11 = vld [vmem:[%s2433_s27 + $0x8] sm:$0xff]  ;;  %v338_v12 = vld [vmem:[%s2433_s27 + $0x10] sm:$0xff] }
  0x11   : > { %1973 = vmatprep.mubr.msk.f32.mxu0 %vm379_vm3, %v336_v10  ;;  %v339_v15 = vld [vmem:[%s2433_s27 + $0x18] sm:$0xff]  ;;  %v352_v16 = vld [vmem:[%s2433_s27 + $0x80] sm:$0xff]  ;;  %v353_v17 = vld [vmem:[%s2433_s27 + $0x88] sm:$0xff] }
  0x12   : > { %1974 = vmatmul.mubr.msk.f32.vlgmr.msra.gmra.mrb[0].mxu0 %vm379_vm3, %v337_v11  ;;  %v340_v18 = vld [vmem:[%s2433_s27 + $0x20] sm:$0xff]  ;;  %1997 = vmatprep.mubr.msk.f32.mxu1 %vm379_vm3, %v352_v16  ;;  %v354_v19 = vld [vmem:[%s2433_s27 + $0x90] sm:$0xff]  ;;  %v355_v23 = vld [vmem:[%s2433_s27 + $0x98] sm:$0xff] }
  0x13   : > { %1976 = vmatprep.mubr.msk.f32.mxu0 %vm379_vm3, %v338_v12  ;;  %1998 = vmatmul.mubr.msk.f32.vlgmr.msra.gmra.mrb[0].mxu1 %vm379_vm3, %v353_v17  ;;  %v341_v24 = vld [vmem:[%s2433_s27 + $0x28] sm:$0xff]  ;;  %v356_v25 = vld [vmem:[%s2433_s27 + $0xa0] sm:$0xff]  ;;  %v342_v26 = vld [vmem:[%s2433_s27 + $0x30] sm:$0xff] }
  0x14   : > { %2000 = vmatprep.mubr.msk.f32.mxu1 %vm379_vm3, %v354_v19  ;;  %2194 = vmatpush3.bf16.msra.mxu1 %v2191_v9  ;;  %v357_v30 = vld [vmem:[%s2433_s27 + $0xa8] sm:$0xff]  ;;  %v343_v31 = vld [vmem:[%s2433_s27 + $0x38] sm:$0xff]  ;;  %v358_v32 = vld [vmem:[%s2433_s27 + $0xb0] sm:$0xff] }
  0x15   : > { %2196 = vmatprep.subr.bf16.mxu1 %v2195_v20  ;;  %v344_v33 = vld [vmem:[%s2433_s27 + $0x40] sm:$0xff]  ;;  %v359_v37 = vld [vmem:[%s2433_s27 + $0xb8] sm:$0xff]  ;;  %v345_v38 = vld [vmem:[%s2433_s27 + $0x48] sm:$0xff]  ;;  %2226 = vmatpush3.bf16.msra.mxu0 %v2223_v2 }
  0x16   : > { %1977 = vmatmul.mubr.msk.f32.gmra.mrb[2].mxu0 %vm379_vm3, %v339_v15  ;;  %v360_v39 = vld [vmem:[%s2433_s27 + $0xc0] sm:$0xff]  ;;  %v346_v40 = vld [vmem:[%s2433_s27 + $0x50] sm:$0xff]  ;;  %v361_v44 = vld [vmem:[%s2433_s27 + $0xc8] sm:$0xff]  ;;  %2228 = vmatprep.subr.bf16.mxu0 %v2227_v4 }
  0x17   : > { %1979 = vmatprep.mubr.msk.f32.mxu0 %vm379_vm3, %v340_v18  ;;  %2001 = vmatmul.mubr.msk.f32.gmra.mrb[2].mxu1 %vm379_vm3, %v355_v23  ;;  %v347_v45 = vld [vmem:[%s2433_s27 + $0x58] sm:$0xff]  ;;  %v362_v46 = vld [vmem:[%s2433_s27 + $0xd0] sm:$0xff]  ;;  %v348_v47 = vld [vmem:[%s2433_s27 + $0x60] sm:$0xff] }
  0x18   : > { %2003 = vmatprep.mubr.msk.f32.mxu1 %vm379_vm3, %v356_v25  ;;  %2198 = vmatpush3.bf16.msra.mxu1 %v2195_v20  ;;  %v363_v51 = vld [vmem:[%s2433_s27 + $0xd8] sm:$0xff]  ;;  %v349_v52 = vld [vmem:[%s2433_s27 + $0x68] sm:$0xff]  ;;  %v364_v53 = vld [vmem:[%s2433_s27 + $0xe0] sm:$0xff] }
  0x19   : > { %2200 = vmatprep.subr.bf16.mxu1 %v2199_v27  ;;  %v350_v54 = vld [vmem:[%s2433_s27 + $0x70] sm:$0xff]  ;;  %v365_v56 = vld [vmem:[%s2433_s27 + $0xe8] sm:$0xff]  ;;  %v351_v57 = vld [vmem:[%s2433_s27 + $0x78] sm:$0xff]  ;;  %2230 = vmatpush3.bf16.msra.mxu0 %v2227_v4 }
  0x1a   : > { %1980 = vmatmul.mubr.msk.f32.gmra.mrb[4].mxu0 %vm379_vm3, %v341_v24  ;;  %v366_v58 = vld [vmem:[%s2433_s27 + $0xf0] sm:$0xff]  ;;  %v367_v59 = vld [vmem:[%s2433_s27 + $0xf8] sm:$0xff]  ;;  %2232 = vmatprep.subr.bf16.mxu0 %v2231_v7  ;;  %v1025_v11 = vld [vmem:[%s3125_s5 + $0x40] sm:$0xff] }
  0x1b   : > { %1982 = vmatprep.mubr.msk.f32.mxu0 %vm379_vm3, %v342_v26  ;;  %2004 = vmatmul.mubr.msk.f32.gmra.mrb[4].mxu1 %vm379_vm3, %v357_v30  ;;  %v1024_v9 = vld [vmem:[%s3125_s5 + $0x38] sm:$0xff]  ;;  %v1026_v12 = vld [vmem:[%s3125_s5 + $0x48] sm:$0xff]  ;;  %v1029_v17 = vld [vmem:[%s3125_s5 + $0x60] sm:$0xff] }
  0x1c   : > { %2006 = vmatprep.mubr.msk.f32.mxu1 %vm379_vm3, %v358_v32  ;;  %2202 = vmatpush3.bf16.msra.mxu1 %v2199_v27  ;;  %v2235_v10 = vpack.c.bf16 %v1024_v9, %v1023_v8  ;;  %v2239_v13 = vpack.c.bf16 %v1026_v12, %v1025_v11  ;;  %v1028_v15 = vld [vmem:[%s3125_s5 + $0x58] sm:$0xff]  ;;  %v1030_v18 = vld [vmem:[%s3125_s5 + $0x68] sm:$0xff]  ;;  %v2590_v20 = vld [vmem:[%s3122_s2] ss:$0 sm:$0xff] }
  0x1d   : > { %2204 = vmatprep.subr.bf16.mxu1 %v2203_v34  ;;  %2234 = vmatpush3.bf16.msra.mxu0 %v2231_v7  ;;  %v2243_v16 = vpack.c.bf16 %v1028_v15, %v1027_v14  ;;  %v2247_v19 = vpack.c.bf16 %v1030_v18, %v1029_v17 }
  0x1e   : > { %1983 = vmatmul.mubr.msk.f32.gmra.mrb[6].mxu0 %vm379_vm3, %v343_v31  ;;  %2236 = vmatprep.subr.bf16.mxu0 %v2235_v10 }
  0x1f   : > { %1985 = vmatprep.mubr.msk.f32.mxu0 %vm379_vm3, %v344_v33  ;;  %2007 = vmatmul.mubr.msk.f32.gmra.mrb[6].mxu1 %vm379_vm3, %v359_v37 }
  0x20   : > { %2009 = vmatprep.mubr.msk.f32.mxu1 %vm379_vm3, %v360_v39  ;;  %2206 = vmatpush3.bf16.msra.mxu1 %v2203_v34 }
  0x21   : > { %2208 = vmatprep.subr.bf16.mxu1 %v2207_v41  ;;  %2238 = vmatpush3.bf16.msra.mxu0 %v2235_v10 }
  0x22   : > { %1986 = vmatmul.mubr.msk.f32.gmra.mrb[8].mxu0 %vm379_vm3, %v345_v38  ;;  %2240 = vmatprep.subr.bf16.mxu0 %v2239_v13 }
  0x23   : > { %1988 = vmatprep.mubr.msk.f32.mxu0 %vm379_vm3, %v346_v40  ;;  %2010 = vmatmul.mubr.msk.f32.gmra.mrb[8].mxu1 %vm379_vm3, %v361_v44 }
  0x24   : > { %2012 = vmatprep.mubr.msk.f32.mxu1 %vm379_vm3, %v362_v46  ;;  %2210 = vmatpush3.bf16.msra.mxu1 %v2207_v41 }
  0x25   : > { %2212 = vmatprep.subr.bf16.mxu1 %v2211_v48  ;;  %2242 = vmatpush3.bf16.msra.mxu0 %v2239_v13 }
  0x26   : > { %1989 = vmatmul.mubr.msk.f32.gmra.mrb[10].mxu0 %vm379_vm3, %v347_v45  ;;  %2244 = vmatprep.subr.bf16.mxu0 %v2243_v16 }
  0x27   : > { %1991 = vmatprep.mubr.msk.f32.mxu0 %vm379_vm3, %v348_v47  ;;  %2013 = vmatmul.mubr.msk.f32.gmra.mrb[10].mxu1 %vm379_vm3, %v363_v51 }
  0x28   : > { %2015 = vmatprep.mubr.msk.f32.mxu1 %vm379_vm3, %v364_v53  ;;  %2214 = vmatpush3.bf16.msra.mxu1 %v2211_v48 }
  0x29   : > { %2216 = vmatprep.subr.bf16.mxu1 %v2215_v55  ;;  %2246 = vmatpush3.bf16.msra.mxu0 %v2243_v16 }
  0x2a   : > { %1992 = vmatmul.mubr.msk.f32.gmra.mrb[12].mxu0 %vm379_vm3, %v349_v52  ;;  %2248 = vmatprep.subr.bf16.mxu0 %v2247_v19 }
  0x2b   : > { %1994 = vmatprep.mubr.msk.f32.mxu0 %vm379_vm3, %v350_v54  ;;  %2016 = vmatmul.mubr.msk.f32.gmra.mrb[12].mxu1 %vm379_vm3, %v365_v56 }
  0x2c   : > { %2018 = vmatprep.mubr.msk.f32.mxu1 %vm379_vm3, %v366_v58  ;;  %2218 = vmatpush3.bf16.msra.mxu1 %v2215_v55 }
  0x2d   : > { %2220 = vmatprep.subr.bf16.mxu1 %v2219_v62  ;;  %2250 = vmatpush3.bf16.msra.mxu0 %v2247_v19 }
  0x2e   : > { %1995 = vmatmul.mubr.msk.f32.gmra.mrb[14].mxu0 %vm379_vm3, %v351_v57 }
  0x2f   : > { %2019 = vmatmul.mubr.msk.f32.gmra.mrb[14].mxu1 %vm379_vm3, %v367_v59 }
  0x30   : > { %2222 = vmatpush3.bf16.msra.mxu1 %v2219_v62 }
  0xe5   : > { %v1975_v21 = vpop.f32.mrb[0].mxu0 }
  0xe6   : > { %v552_v22 = vadd.f32 %v1975_v21, %v2590_v20  ;;  %v546_v23 = vpop.f32.mrb[1].mxu0  ;;  %v2594_v25 = vpop.f32.mrb[0].mxu1 }
  0xe7   : > { %v547_v24 = vadd.f32 %v2590_v20, %v546_v23  ;;  %v626_v28 = vpop.f32.mrb[1].mxu1  ;;  %v632_v19 = vadd.f32 %v2594_v25, %v2590_v20 }
  0xe8   : > { %v706_v29 = vmax.f32 %v552_v22, 0.0  ;;  %v627_v13 = vadd.f32 %v2590_v20, %v626_v28 }
  0xe9   : > { %v705_v26 = vmax.f32 %v547_v24, 0.0  ;;  %v1978_v27 = vpop.f32.mrb[2].mxu0 }
  0xea   : > { %v562_v30 = vadd.f32 %v1978_v27, %v2590_v20  ;;  %v556_v31 = vpop.f32.mrb[3].mxu0  ;;  %v2598_v33 = vpop.f32.mrb[2].mxu1  ;;  %v721_v23 = vmax.f32 %v627_v13, 0.0  ;;  %v722_v27 = vmax.f32 %v632_v19, 0.0 }
  0xeb   : > { %v557_v32 = vadd.f32 %v2590_v20, %v556_v31  ;;  %2053 = vmatprep.mubr.f32.mxu1 %v705_v26  ;;  %v2600_v36 = vpop.f32.mrb[3].mxu1  ;;  %v642_v28 = vadd.f32 %v2598_v33, %v2590_v20 }
  0xec   : > { %2054 = vmatmul.mubr.f32.vlgmr.msra.gmra.mrb[16].mxu1 %v706_v29  ;;  %v708_v37 = vmax.f32 %v562_v30, 0.0  ;;  %v637_v24 = vadd.f32 %v2590_v20, %v2600_v36 }
  0xed   : > { %v707_v34 = vmax.f32 %v557_v32, 0.0  ;;  %v1981_v35 = vpop.f32.mrb[4].mxu0  ;;  %v724_v31 = vmax.f32 %v642_v28, 0.0 }
  0xee   : > { %v572_v38 = vadd.f32 %v1981_v35, %v2590_v20  ;;  %v566_v39 = vpop.f32.mrb[5].mxu0  ;;  %v2604_v42 = vpop.f32.mrb[4].mxu1  ;;  %v723_v29 = vmax.f32 %v637_v24, 0.0 }
  0xef   : > { %v567_v40 = vadd.f32 %v2590_v20, %v566_v39  ;;  %2056 = vmatprep.mubr.f32.mxu1 %v707_v34  ;;  %v646_v45 = vpop.f32.mrb[5].mxu1  ;;  %v652_v25 = vadd.f32 %v2604_v42, %v2590_v20 }
  0xf0   : > { %v710_v41 = vmax.f32 %v572_v38, 0.0  ;;  %2057 = vmatmul.mubr.f32.gmra.mrb[18].mxu1 %v708_v37  ;;  %v647_v30 = vadd.f32 %v2590_v20, %v646_v45 }
  0xf1   : > { %v709_v43 = vmax.f32 %v567_v40, 0.0  ;;  %v1984_v44 = vpop.f32.mrb[6].mxu0  ;;  %v726_v35 = vmax.f32 %v652_v25, 0.0 }
  0xf2   : > { %v582_v46 = vadd.f32 %v1984_v44, %v2590_v20  ;;  %v576_v47 = vpop.f32.mrb[7].mxu0  ;;  %v2008_v50 = vpop.f32.mrb[6].mxu1  ;;  %v725_v32 = vmax.f32 %v647_v30, 0.0 }
  0xf3   : > { %v577_v48 = vadd.f32 %v2590_v20, %v576_v47  ;;  %2059 = vmatprep.mubr.f32.mxu1 %v709_v43  ;;  %v656_v53 = vpop.f32.mrb[7].mxu1  ;;  %v662_v36 = vadd.f32 %v2008_v50, %v2590_v20 }
  0xf4   : > { %v712_v49 = vmax.f32 %v582_v46, 0.0  ;;  %2060 = vmatmul.mubr.f32.gmra.mrb[20].mxu1 %v710_v41  ;;  %v657_v34 = vadd.f32 %v2590_v20, %v656_v53 }
  0xf5   : > { %v711_v51 = vmax.f32 %v577_v48, 0.0  ;;  %v1987_v52 = vpop.f32.mrb[8].mxu0  ;;  %v728_v38 = vmax.f32 %v662_v36, 0.0 }
  0xf6   : > { %v592_v54 = vadd.f32 %v1987_v52, %v2590_v20  ;;  %v586_v55 = vpop.f32.mrb[9].mxu0  ;;  %v2011_v58 = vpop.f32.mrb[8].mxu1  ;;  %v727_v37 = vmax.f32 %v657_v34, 0.0 }
  0xf7   : > { %v587_v56 = vadd.f32 %v2590_v20, %v586_v55  ;;  %2062 = vmatprep.mubr.f32.mxu1 %v711_v51  ;;  %v666_v61 = vpop.f32.mrb[9].mxu1  ;;  %v672_v39 = vadd.f32 %v2011_v58, %v2590_v20  ;;  %v1032_v55 = vld [vmem:[%s3125_s5 + $0x78] sm:$0xff] }
  0xf8   : > { %v714_v57 = vmax.f32 %v592_v54, 0.0  ;;  %2063 = vmatmul.mubr.f32.gmra.mrb[22].mxu1 %v712_v49  ;;  %v667_v33 = vadd.f32 %v2590_v20, %v666_v61  ;;  %v1031_v54 = vld [vmem:[%s3125_s5 + $0x70] sm:$0xff] }
  0xf9   : > { %v713_v59 = vmax.f32 %v587_v56, 0.0  ;;  %v1990_v60 = vpop.f32.mrb[10].mxu0  ;;  %v730_v42 = vmax.f32 %v672_v39, 0.0  ;;  %v2251_v56 = vpack.c.bf16 %v1032_v55, %v1031_v54 }
  0xfa   : > { %v602_v62 = vadd.f32 %v1990_v60, %v2590_v20  ;;  %v596_v63 = vpop.f32.mrb[11].mxu0  ;;  %v2014_v2 = vpop.f32.mrb[10].mxu1  ;;  %v729_v40 = vmax.f32 %v667_v33, 0.0 }
  0xfb   : > { %v597_v0 = vadd.f32 %v2590_v20, %v596_v63  ;;  %2065 = vmatprep.mubr.f32.mxu1 %v713_v59  ;;  %v676_v5 = vpop.f32.mrb[11].mxu1  ;;  %v682_v43 = vadd.f32 %v2014_v2, %v2590_v20  ;;  %2252 = vmatprep.subr.bf16.mxu0 %v2251_v56 }
  0xfc   : > { %v716_v1 = vmax.f32 %v602_v62, 0.0  ;;  %2066 = vmatmul.mubr.f32.gmra.mrb[24].mxu1 %v714_v57  ;;  %v677_v41 = vadd.f32 %v2590_v20, %v676_v5  ;;  %2254 = vmatpush3.bf16.msra.mxu0 %v2251_v56 }
  0xfd   : > { %v715_v3 = vmax.f32 %v597_v0, 0.0  ;;  %v1993_v4 = vpop.f32.mrb[12].mxu0  ;;  %v732_v46 = vmax.f32 %v682_v43, 0.0 }
  0xfe   : > { %v612_v6 = vadd.f32 %v1993_v4, %v2590_v20  ;;  %v606_v7 = vpop.f32.mrb[13].mxu0  ;;  %v2017_v10 = vpop.f32.mrb[12].mxu1  ;;  %v731_v44 = vmax.f32 %v677_v41, 0.0 }
  0xff   : > { %v607_v8 = vadd.f32 %v2590_v20, %v606_v7  ;;  %2068 = vmatprep.mubr.f32.mxu1 %v715_v3  ;;  %v686_v14 = vpop.f32.mrb[13].mxu1  ;;  %v692_v47 = vadd.f32 %v2017_v10, %v2590_v20 }
 0x100   : > { %v718_v9 = vmax.f32 %v612_v6, 0.0  ;;  %2069 = vmatmul.mubr.f32.gmra.mrb[26].mxu1 %v716_v1  ;;  %v687_v45 = vadd.f32 %v2590_v20, %v686_v14 }
 0x101   : > { %v717_v11 = vmax.f32 %v607_v8, 0.0  ;;  %v1996_v12 = vpop.f32.mrb[14].mxu0  ;;  %v734_v50 = vmax.f32 %v692_v47, 0.0 }
 0x102   : > { %v622_v15 = vadd.f32 %v1996_v12, %v2590_v20  ;;  %v616_v16 = vpop.f32.mrb[15].mxu0  ;;  %v2020_v21 = vpop.f32.mrb[14].mxu1  ;;  %v733_v48 = vmax.f32 %v687_v45, 0.0 }
 0x103   : > { %v617_v17 = vadd.f32 %v2590_v20, %v616_v16  ;;  %2071 = vmatprep.mubr.f32.mxu1 %v717_v11  ;;  %v696_v26 = vpop.f32.mrb[15].mxu1  ;;  %v702_v51 = vadd.f32 %v2020_v21, %v2590_v20 }
 0x104   : > { %v720_v18 = vmax.f32 %v622_v15, 0.0  ;;  %2072 = vmatmul.mubr.f32.gmra.mrb[28].mxu1 %v718_v9  ;;  %v697_v49 = vadd.f32 %v2590_v20, %v696_v26  ;;  %v2645_v20 = vld [vmem:[%s3124_s4] ss:$0 sm:$0xff] }
 0x105   : > { %v719_v22 = vmax.f32 %v617_v17, 0.0  ;;  %v736_v53 = vmax.f32 %v702_v51, 0.0 }
 0x106   : > { %v735_v52 = vmax.f32 %v697_v49, 0.0 }
 0x107   : > { %2074 = vmatprep.mubr.f32.mxu1 %v719_v22 }
 0x108   : > { %2075 = vmatmul.mubr.f32.gmra.mrb[30].mxu1 %v720_v18 }
 0x109   : > { %2077 = vmatprep.mubr.f32.mxu1 %v721_v23 }
 0x10c   : > { %2078 = vmatmul.mubr.f32.gmra.mrb[32].mxu1 %v722_v27 }
 0x10d   : > { %2080 = vmatprep.mubr.f32.mxu1 %v723_v29 }
 0x110   : > { %2081 = vmatmul.mubr.f32.gmra.mrb[34].mxu1 %v724_v31 }
 0x111   : > { %2083 = vmatprep.mubr.f32.mxu1 %v725_v32 }
 0x114   : > { %2084 = vmatmul.mubr.f32.gmra.mrb[36].mxu1 %v726_v35 }
 0x115   : > { %2086 = vmatprep.mubr.f32.mxu1 %v727_v37 }
 0x118   : > { %2087 = vmatmul.mubr.f32.gmra.mrb[38].mxu1 %v728_v38 }
 0x119   : > { %2089 = vmatprep.mubr.f32.mxu1 %v729_v40 }
 0x11c   : > { %2090 = vmatmul.mubr.f32.gmra.mrb[40].mxu1 %v730_v42 }
 0x11d   : > { %2092 = vmatprep.mubr.f32.mxu1 %v731_v44 }
 0x120   : > { %2093 = vmatmul.mubr.f32.gmra.mrb[42].mxu1 %v732_v46 }
 0x121   : > { %2095 = vmatprep.mubr.f32.mxu1 %v733_v48 }
 0x124   : > { %2096 = vmatmul.mubr.f32.gmra.mrb[44].mxu1 %v734_v50 }
 0x125   : > { %2098 = vmatprep.mubr.f32.mxu1 %v735_v52 }
 0x128   : > { %2099 = vmatmul.mubr.f32.gmra.mrb[46].mxu1 %v736_v53 }
 0x1bf   : > { %v2055_v57 = vpop.f32.mrb[16].mxu1 }
 0x1c0   : > { %v832_v58 = vadd.f32 %v2055_v57, %v2645_v20  ;;  %v826_v59 = vpop.f32.mrb[17].mxu1 }
 0x1c1   : > { %v827_v60 = vadd.f32 %v2645_v20, %v826_v59 }
 0x1c2   : > { %v986_v63 = vmax.f32 %v832_v58, 0.0 }
 0x1c3   : > { %v985_v61 = vmax.f32 %v827_v60, 0.0  ;;  %v2058_v62 = vpop.f32.mrb[18].mxu1 }
 0x1c4   : > { %v842_v0 = vadd.f32 %v2058_v62, %v2645_v20  ;;  %v836_v1 = vpop.f32.mrb[19].mxu1 }
 0x1c5   : > { %v837_v2 = vadd.f32 %v2645_v20, %v836_v1  ;;  %2133 = vmatprep.mubr.f32.mxu0 %v985_v61 }
 0x1c6   : > { %2134 = vmatmul.mubr.f32.vlgmr.msra.gmra.mrb[16].mxu0 %v986_v63  ;;  %v988_v5 = vmax.f32 %v842_v0, 0.0 }
 0x1c7   : > { %v987_v3 = vmax.f32 %v837_v2, 0.0  ;;  %v2061_v4 = vpop.f32.mrb[20].mxu1 }
 0x1c8   : > { %v852_v6 = vadd.f32 %v2061_v4, %v2645_v20  ;;  %v846_v7 = vpop.f32.mrb[21].mxu1 }
 0x1c9   : > { %v847_v8 = vadd.f32 %v2645_v20, %v846_v7  ;;  %2136 = vmatprep.mubr.f32.mxu0 %v987_v3 }
 0x1ca   : > { %v990_v9 = vmax.f32 %v852_v6, 0.0  ;;  %2137 = vmatmul.mubr.f32.gmra.mrb[18].mxu0 %v988_v5 }
 0x1cb   : > { %v989_v10 = vmax.f32 %v847_v8, 0.0  ;;  %v2064_v11 = vpop.f32.mrb[22].mxu1 }
 0x1cc   : > { %v862_v12 = vadd.f32 %v2064_v11, %v2645_v20  ;;  %v856_v13 = vpop.f32.mrb[23].mxu1 }
 0x1cd   : > { %v857_v14 = vadd.f32 %v2645_v20, %v856_v13  ;;  %2139 = vmatprep.mubr.f32.mxu0 %v989_v10 }
 0x1ce   : > { %v992_v15 = vmax.f32 %v862_v12, 0.0  ;;  %2140 = vmatmul.mubr.f32.gmra.mrb[20].mxu0 %v990_v9 }
 0x1cf   : > { %v991_v16 = vmax.f32 %v857_v14, 0.0  ;;  %v2067_v17 = vpop.f32.mrb[24].mxu1 }
 0x1d0   : > { %v872_v18 = vadd.f32 %v2067_v17, %v2645_v20  ;;  %v866_v19 = vpop.f32.mrb[25].mxu1 }
 0x1d1   : > { %v867_v21 = vadd.f32 %v2645_v20, %v866_v19  ;;  %2142 = vmatprep.mubr.f32.mxu0 %v991_v16 }
 0x1d2   : > { %v994_v22 = vmax.f32 %v872_v18, 0.0  ;;  %2143 = vmatmul.mubr.f32.gmra.mrb[22].mxu0 %v992_v15 }
 0x1d3   : > { %v993_v23 = vmax.f32 %v867_v21, 0.0  ;;  %v2070_v24 = vpop.f32.mrb[26].mxu1 }
 0x1d4   : > { %v882_v26 = vadd.f32 %v2070_v24, %v2645_v20  ;;  %v876_v27 = vpop.f32.mrb[27].mxu1 }
 0x1d5   : > { %v877_v28 = vadd.f32 %v2645_v20, %v876_v27  ;;  %2145 = vmatprep.mubr.f32.mxu0 %v993_v23 }
 0x1d6   : > { %v996_v29 = vmax.f32 %v882_v26, 0.0  ;;  %2146 = vmatmul.mubr.f32.gmra.mrb[24].mxu0 %v994_v22 }
 0x1d7   : > { %v995_v30 = vmax.f32 %v877_v28, 0.0  ;;  %v2073_v31 = vpop.f32.mrb[28].mxu1  ;;  %v2682_v28 = vld [vmem:[%s3126_s6] ss:$0 sm:$0xff] }
 0x1d8   : > { %v892_v25 = vadd.f32 %v2073_v31, %v2645_v20  ;;  %v886_v32 = vpop.f32.mrb[29].mxu1 }
 0x1d9   : > { %v887_v34 = vadd.f32 %v2645_v20, %v886_v32  ;;  %2148 = vmatprep.mubr.f32.mxu0 %v995_v30 }
 0x1da   : > { %v998_v35 = vmax.f32 %v892_v25, 0.0  ;;  %2149 = vmatmul.mubr.f32.gmra.mrb[26].mxu0 %v996_v29 }
 0x1db   : > { %v997_v36 = vmax.f32 %v887_v34, 0.0  ;;  %v2076_v37 = vpop.f32.mrb[30].mxu1 }
 0x1dc   : > { %v902_v33 = vadd.f32 %v2076_v37, %v2645_v20  ;;  %v896_v38 = vpop.f32.mrb[31].mxu1 }
 0x1dd   : > { %v897_v39 = vadd.f32 %v2645_v20, %v896_v38  ;;  %2151 = vmatprep.mubr.f32.mxu0 %v997_v36 }
 0x1de   : > { %v1000_v40 = vmax.f32 %v902_v33, 0.0  ;;  %2152 = vmatmul.mubr.f32.gmra.mrb[28].mxu0 %v998_v35 }
 0x1df   : > { %v999_v41 = vmax.f32 %v897_v39, 0.0  ;;  %v2079_v42 = vpop.f32.mrb[32].mxu1 }
 0x1e0   : > { %v912_v43 = vadd.f32 %v2079_v42, %v2645_v20  ;;  %v906_v44 = vpop.f32.mrb[33].mxu1 }
 0x1e1   : > { %v907_v45 = vadd.f32 %v2645_v20, %v906_v44  ;;  %2154 = vmatprep.mubr.f32.mxu0 %v999_v41 }
 0x1e2   : > { %v1002_v46 = vmax.f32 %v912_v43, 0.0  ;;  %2155 = vmatmul.mubr.f32.gmra.mrb[30].mxu0 %v1000_v40 }
 0x1e3   : > { %v1001_v47 = vmax.f32 %v907_v45, 0.0  ;;  %v2082_v48 = vpop.f32.mrb[34].mxu1 }
 0x1e4   : > { %v922_v49 = vadd.f32 %v2082_v48, %v2645_v20  ;;  %v916_v50 = vpop.f32.mrb[35].mxu1 }
 0x1e5   : > { %v917_v51 = vadd.f32 %v2645_v20, %v916_v50  ;;  %2157 = vmatprep.mubr.f32.mxu0 %v1001_v47 }
 0x1e6   : > { %v1004_v52 = vmax.f32 %v922_v49, 0.0  ;;  %2158 = vmatmul.mubr.f32.gmra.mrb[32].mxu0 %v1002_v46 }
 0x1e7   : > { %v1003_v53 = vmax.f32 %v917_v51, 0.0  ;;  %v2085_v54 = vpop.f32.mrb[36].mxu1 }
 0x1e8   : > { %v932_v55 = vadd.f32 %v2085_v54, %v2645_v20  ;;  %v926_v56 = vpop.f32.mrb[37].mxu1 }
 0x1e9   : > { %v927_v57 = vadd.f32 %v2645_v20, %v926_v56  ;;  %2160 = vmatprep.mubr.f32.mxu0 %v1003_v53 }
 0x1ea   : > { %v1006_v58 = vmax.f32 %v932_v55, 0.0  ;;  %2161 = vmatmul.mubr.f32.gmra.mrb[34].mxu0 %v1004_v52 }
 0x1eb   : > { %v1005_v59 = vmax.f32 %v927_v57, 0.0  ;;  %v2088_v60 = vpop.f32.mrb[38].mxu1 }
 0x1ec   : > { %v942_v61 = vadd.f32 %v2088_v60, %v2645_v20  ;;  %v936_v62 = vpop.f32.mrb[39].mxu1 }
 0x1ed   : > { %v937_v63 = vadd.f32 %v2645_v20, %v936_v62  ;;  %2163 = vmatprep.mubr.f32.mxu0 %v1005_v59 }
 0x1ee   : > { %v1008_v0 = vmax.f32 %v942_v61, 0.0  ;;  %2164 = vmatmul.mubr.f32.gmra.mrb[36].mxu0 %v1006_v58 }
 0x1ef   : > { %v1007_v1 = vmax.f32 %v937_v63, 0.0  ;;  %v2091_v2 = vpop.f32.mrb[40].mxu1 }
 0x1f0   : > { %v952_v3 = vadd.f32 %v2091_v2, %v2645_v20  ;;  %v946_v4 = vpop.f32.mrb[41].mxu1 }
 0x1f1   : > { %v947_v5 = vadd.f32 %v2645_v20, %v946_v4  ;;  %2166 = vmatprep.mubr.f32.mxu0 %v1007_v1 }
 0x1f2   : > { %v1010_v6 = vmax.f32 %v952_v3, 0.0  ;;  %2167 = vmatmul.mubr.f32.gmra.mrb[38].mxu0 %v1008_v0 }
 0x1f3   : > { %v1009_v7 = vmax.f32 %v947_v5, 0.0  ;;  %v2094_v8 = vpop.f32.mrb[42].mxu1 }
 0x1f4   : > { %v962_v9 = vadd.f32 %v2094_v8, %v2645_v20  ;;  %v956_v10 = vpop.f32.mrb[43].mxu1 }
 0x1f5   : > { %v957_v11 = vadd.f32 %v2645_v20, %v956_v10  ;;  %2169 = vmatprep.mubr.f32.mxu0 %v1009_v7 }
 0x1f6   : > { %v1012_v12 = vmax.f32 %v962_v9, 0.0  ;;  %2170 = vmatmul.mubr.f32.gmra.mrb[40].mxu0 %v1010_v6 }
 0x1f7   : > { %v1011_v13 = vmax.f32 %v957_v11, 0.0  ;;  %v2097_v14 = vpop.f32.mrb[44].mxu1 }
 0x1f8   : > { %v972_v15 = vadd.f32 %v2097_v14, %v2645_v20  ;;  %v966_v16 = vpop.f32.mrb[45].mxu1 }
 0x1f9   : > { %v967_v17 = vadd.f32 %v2645_v20, %v966_v16  ;;  %2172 = vmatprep.mubr.f32.mxu0 %v1011_v13 }
 0x1fa   : > { %v1014_v18 = vmax.f32 %v972_v15, 0.0  ;;  %2173 = vmatmul.mubr.f32.gmra.mrb[42].mxu0 %v1012_v12 }
 0x1fb   : > { %v1013_v19 = vmax.f32 %v967_v17, 0.0  ;;  %v2100_v21 = vpop.f32.mrb[46].mxu1 }
 0x1fc   : > { %v982_v22 = vadd.f32 %v2100_v21, %v2645_v20  ;;  %v976_v23 = vpop.f32.mrb[47].mxu1 }
 0x1fd   : > { %v977_v24 = vadd.f32 %v2645_v20, %v976_v23  ;;  %2175 = vmatprep.mubr.f32.mxu0 %v1013_v19 }
 0x1fe   : > { %v1016_v26 = vmax.f32 %v982_v22, 0.0  ;;  %2176 = vmatmul.mubr.f32.gmra.mrb[44].mxu0 %v1014_v18 }
 0x1ff   : > { %v1015_v27 = vmax.f32 %v977_v24, 0.0 }
 0x201   : > { %2178 = vmatprep.mubr.f32.mxu0 %v1015_v27 }
 0x202   : > { %2179 = vmatmul.mubr.f32.gmra.mrb[46].mxu0 %v1016_v26 }
 0x299   : > { %v2135_v29 = vpop.f32.mrb[16].mxu0 }
 0x29a   : > { %v2685_v30 = vadd.f32 %v2135_v29, %v2682_v28  ;;  %v1106_v31 = vpop.f32.mrb[17].mxu0 }
 0x29b   : > { %v2689_v20 = vadd.f32 %v2682_v28, %v1106_v31 }
 0x29c   : > { %1267 = vadd.xlane.f32.xlu0 %v2685_v30 }
 0x29d   : > { %v2138_v25 = vpop.f32.mrb[18].mxu0 }
 0x29e   : > { %v2692_v32 = vadd.f32 %v2138_v25, %v2682_v28  ;;  %v1116_v34 = vpop.f32.mrb[19].mxu0 }
 0x29f   : > { %v2697_v36 = vadd.f32 %v2682_v28, %v1116_v34 }
 0x2a0   : > { %1271 = vadd.xlane.f32.xlu1 %v2692_v32  ;;  %1265 = vadd.xlane.f32.xlu0 %v2689_v20 }
 0x2a1   : > { %v2141_v35 = vpop.f32.mrb[20].mxu0 }
 0x2a2   : > { %v1126_v37 = vpop.f32.mrb[21].mxu0  ;;  %v2705_v39 = vadd.f32 %v2141_v35, %v2682_v28 }
 0x2a3   : > { %v2700_v33 = vadd.f32 %v2682_v28, %v1126_v37 }
 0x2a4   : > { %1269 = vadd.xlane.f32.xlu1 %v2697_v36 }
 0x2a5   : > { %v2144_v38 = vpop.f32.mrb[22].mxu0  ;;  %1273 = vadd.xlane.f32.xlu0 %v2700_v33 }
 0x2a6   : > { %v1136_v40 = vpop.f32.mrb[23].mxu0  ;;  %v2713_v43 = vadd.f32 %v2144_v38, %v2682_v28 }
 0x2a7   : > { %v2708_v41 = vadd.f32 %v2682_v28, %v1136_v40 }
 0x2a8   : > { %1275 = vadd.xlane.f32.xlu1 %v2705_v39 }
 0x2a9   : > { %v2147_v42 = vpop.f32.mrb[24].mxu0  ;;  %1277 = vadd.xlane.f32.xlu0 %v2708_v41 }
 0x2aa   : > { %v1146_v44 = vpop.f32.mrb[25].mxu0  ;;  %v2721_v47 = vadd.f32 %v2147_v42, %v2682_v28 }
 0x2ab   : > { %v2716_v45 = vadd.f32 %v2682_v28, %v1146_v44 }
 0x2ac   : > { %1279 = vadd.xlane.f32.xlu1 %v2713_v43 }
 0x2ad   : > { %v2150_v46 = vpop.f32.mrb[26].mxu0  ;;  %1281 = vadd.xlane.f32.xlu0 %v2716_v45 }
 0x2ae   : > { %v1156_v48 = vpop.f32.mrb[27].mxu0  ;;  %v2729_v51 = vadd.f32 %v2150_v46, %v2682_v28 }
 0x2af   : > { %v2724_v49 = vadd.f32 %v2682_v28, %v1156_v48 }
 0x2b0   : > { %1283 = vadd.xlane.f32.xlu1 %v2721_v47 }
 0x2b1   : > { %v2153_v50 = vpop.f32.mrb[28].mxu0  ;;  %1285 = vadd.xlane.f32.xlu0 %v2724_v49 }
 0x2b2   : > { %v1166_v52 = vpop.f32.mrb[29].mxu0  ;;  %v2737_v55 = vadd.f32 %v2153_v50, %v2682_v28 }
 0x2b3   : > { %v2732_v53 = vadd.f32 %v2682_v28, %v1166_v52 }
 0x2b4   : > { %1287 = vadd.xlane.f32.xlu1 %v2729_v51 }
 0x2b5   : > { %v2156_v54 = vpop.f32.mrb[30].mxu0  ;;  %1289 = vadd.xlane.f32.xlu0 %v2732_v53 }
 0x2b6   : > { %v1176_v56 = vpop.f32.mrb[31].mxu0  ;;  %v2745_v59 = vadd.f32 %v2156_v54, %v2682_v28 }
 0x2b7   : > { %v2740_v57 = vadd.f32 %v2682_v28, %v1176_v56 }
 0x2b8   : > { %1291 = vadd.xlane.f32.xlu1 %v2737_v55 }
 0x2b9   : > { %v2159_v58 = vpop.f32.mrb[32].mxu0  ;;  %1293 = vadd.xlane.f32.xlu0 %v2740_v57 }
 0x2ba   : > { %v1186_v60 = vpop.f32.mrb[33].mxu0  ;;  %v2753_v63 = vadd.f32 %v2159_v58, %v2682_v28 }
 0x2bb   : > { %v2748_v61 = vadd.f32 %v2682_v28, %v1186_v60 }
 0x2bc   : > { %1295 = vadd.xlane.f32.xlu1 %v2745_v59 }
 0x2bd   : > { %v2162_v62 = vpop.f32.mrb[34].mxu0  ;;  %1297 = vadd.xlane.f32.xlu0 %v2748_v61 }
 0x2be   : > { %v1196_v0 = vpop.f32.mrb[35].mxu0  ;;  %v2761_v3 = vadd.f32 %v2162_v62, %v2682_v28 }
 0x2bf   : > { %v2756_v1 = vadd.f32 %v2682_v28, %v1196_v0 }
 0x2c0   : > { %1299 = vadd.xlane.f32.xlu1 %v2753_v63 }
 0x2c1   : > { %v2165_v2 = vpop.f32.mrb[36].mxu0  ;;  %1301 = vadd.xlane.f32.xlu0 %v2756_v1 }
 0x2c2   : > { %v1206_v4 = vpop.f32.mrb[37].mxu0  ;;  %v2769_v7 = vadd.f32 %v2165_v2, %v2682_v28 }
 0x2c3   : > { %v2764_v5 = vadd.f32 %v2682_v28, %v1206_v4 }
 0x2c4   : > { %1303 = vadd.xlane.f32.xlu1 %v2761_v3 }
 0x2c5   : > { %v2168_v6 = vpop.f32.mrb[38].mxu0  ;;  %1305 = vadd.xlane.f32.xlu0 %v2764_v5 }
 0x2c6   : > { %v1216_v8 = vpop.f32.mrb[39].mxu0  ;;  %v2777_v11 = vadd.f32 %v2168_v6, %v2682_v28 }
 0x2c7   : > { %v2772_v9 = vadd.f32 %v2682_v28, %v1216_v8 }
 0x2c8   : > { %1307 = vadd.xlane.f32.xlu1 %v2769_v7 }
 0x2c9   : > { %v2171_v10 = vpop.f32.mrb[40].mxu0  ;;  %1309 = vadd.xlane.f32.xlu0 %v2772_v9 }
 0x2ca   : > { %v1226_v12 = vpop.f32.mrb[41].mxu0  ;;  %v2785_v15 = vadd.f32 %v2171_v10, %v2682_v28 }
 0x2cb   : > { %v2780_v13 = vadd.f32 %v2682_v28, %v1226_v12 }
 0x2cc   : > { %1311 = vadd.xlane.f32.xlu1 %v2777_v11 }
 0x2cd   : > { %v2174_v14 = vpop.f32.mrb[42].mxu0  ;;  %1313 = vadd.xlane.f32.xlu0 %v2780_v13 }
 0x2ce   : > { %v1236_v16 = vpop.f32.mrb[43].mxu0  ;;  %v2793_v19 = vadd.f32 %v2174_v14, %v2682_v28 }
 0x2cf   : > { %v2788_v17 = vadd.f32 %v2682_v28, %v1236_v16 }
 0x2d0   : > { %1315 = vadd.xlane.f32.xlu1 %v2785_v15 }
 0x2d1   : > { %v2177_v18 = vpop.f32.mrb[44].mxu0  ;;  %1317 = vadd.xlane.f32.xlu0 %v2788_v17 }
 0x2d2   : > { %v1246_v21 = vpop.f32.mrb[45].mxu0  ;;  %v2801_v24 = vadd.f32 %v2177_v18, %v2682_v28 }
 0x2d3   : > { %v2796_v22 = vadd.f32 %v2682_v28, %v1246_v21 }
 0x2d4   : > { %1319 = vadd.xlane.f32.xlu1 %v2793_v19 }
 0x2d5   : > { %v2180_v23 = vpop.f32.mrb[46].mxu0  ;;  %1321 = vadd.xlane.f32.xlu0 %v2796_v22 }
 0x2d6   : > { %v2804_v26 = vadd.f32 %v2180_v23, %v2682_v28  ;;  %v1256_v27 = vpop.f32.mrb[47].mxu0 }
 0x2d7   : > { %v2807_v29 = vadd.f32 %v2682_v28, %v1256_v27 }
 0x2d8   : > { %1323 = vadd.xlane.f32.xlu1 %v2801_v24 }
 0x2d9   : > { %1325 = vadd.xlane.f32.xlu0 %v2807_v29 }
 0x2dc   : > { %1327 = vadd.xlane.f32.xlu1 %v2804_v26 }
 0x329   : > { %v1268_v31 = vpop.xlane.xlu0 %1267 }
 0x32a   : > { %v1331_v25 = vmul.f32 0.0078125, %v1268_v31 }
 0x32c   : > { %v2813_v34 = vsub.f32 %v2685_v30, %v1331_v25 }
 0x32d   : > { %v1272_v35 = vpop.xlane.xlu1 %1271  ;;  %v1266_v37 = vpop.xlane.xlu0 %1265 }
 0x32e   : > { %v1333_v38 = vmul.f32 0.0078125, %v1272_v35  ;;  %v1330_v40 = vmul.f32 0.0078125, %v1266_v37  ;;  %v1395_v42 = vmul.f32 %v2813_v34, %v2813_v34 }
 0x330   : > { %v2818_v28 = vsub.f32 %v2692_v32, %v1333_v38  ;;  %v2821_v44 = vsub.f32 %v2689_v20, %v1330_v40  ;;  %1428 = vadd.xlane.f32.xlu1 %v1395_v42 }
 0x331   : > { %v1270_v46 = vpop.xlane.xlu1 %1269 }
 0x332   : > { %v1332_v48 = vmul.f32 0.0078125, %v1270_v46  ;;  %v1274_v50 = vpop.xlane.xlu0 %1273  ;;  %v1397_v30 = vmul.f32 %v2818_v28, %v2818_v28  ;;  %v1394_v52 = vmul.f32 %v2821_v44, %v2821_v44 }
 0x333   : > { %v1334_v54 = vmul.f32 0.0078125, %v1274_v50 }
 0x334   : > { %v2828_v56 = vsub.f32 %v2697_v36, %v1332_v48  ;;  %1432 = vadd.xlane.f32.xlu1 %v1397_v30  ;;  %1426 = vadd.xlane.f32.xlu0 %v1394_v52 }
 0x335   : > { %v1276_v32 = vpop.xlane.xlu1 %1275  ;;  %v2831_v20 = vsub.f32 %v2700_v33, %v1334_v54 }
 0x336   : > { %v1335_v58 = vmul.f32 0.0078125, %v1276_v32  ;;  %v1278_v60 = vpop.xlane.xlu0 %1277  ;;  %v1396_v62 = vmul.f32 %v2828_v56, %v2828_v56 }
 0x337   : > { %v1336_v0 = vmul.f32 0.0078125, %v1278_v60  ;;  %v1398_v10 = vmul.f32 %v2831_v20, %v2831_v20 }
 0x338   : > { %v2836_v2 = vsub.f32 %v2705_v39, %v1335_v58  ;;  %1430 = vadd.xlane.f32.xlu0 %v1396_v62 }
 0x339   : > { %v1280_v4 = vpop.xlane.xlu1 %1279  ;;  %v2839_v36 = vsub.f32 %v2708_v41, %v1336_v0 }
 0x33a   : > { %v1337_v6 = vmul.f32 0.0078125, %v1280_v4  ;;  %v1282_v8 = vpop.xlane.xlu0 %1281  ;;  %v1399_v33 = vmul.f32 %v2836_v2, %v2836_v2 }
 0x33b   : > { %v1338_v12 = vmul.f32 0.0078125, %v1282_v8  ;;  %v1400_v23 = vmul.f32 %v2839_v36, %v2839_v36 }
 0x33c   : > { %v2846_v14 = vsub.f32 %v2713_v43, %v1337_v6  ;;  %1436 = vadd.xlane.f32.xlu1 %v1399_v33  ;;  %1434 = vadd.xlane.f32.xlu0 %v1398_v10 }
 0x33d   : > { %v1284_v39 = vpop.xlane.xlu1 %1283  ;;  %v2849_v16 = vsub.f32 %v2716_v45, %v1338_v12 }
 0x33e   : > { %v1339_v41 = vmul.f32 0.0078125, %v1284_v39  ;;  %v1286_v18 = vpop.xlane.xlu0 %1285  ;;  %v1401_v21 = vmul.f32 %v2846_v14, %v2846_v14 }
 0x33f   : > { %v1340_v27 = vmul.f32 0.0078125, %v1286_v18  ;;  %v1402_v38 = vmul.f32 %v2849_v16, %v2849_v16 }
 0x340   : > { %v2856_v31 = vsub.f32 %v2721_v47, %v1339_v41  ;;  %1440 = vadd.xlane.f32.xlu1 %v1401_v21  ;;  %1438 = vadd.xlane.f32.xlu0 %v1400_v23 }
 0x341   : > { %v1288_v43 = vpop.xlane.xlu1 %1287  ;;  %v2859_v25 = vsub.f32 %v2724_v49, %v1340_v27 }
 0x342   : > { %v1341_v45 = vmul.f32 0.0078125, %v1288_v43  ;;  %v1290_v35 = vpop.xlane.xlu0 %1289  ;;  %v1403_v37 = vmul.f32 %v2856_v31, %v2856_v31 }
 0x343   : > { %v1342_v40 = vmul.f32 0.0078125, %v1290_v35  ;;  %v1404_v30 = vmul.f32 %v2859_v25, %v2859_v25 }
 0x344   : > { %v2866_v42 = vsub.f32 %v2729_v51, %v1341_v45  ;;  %1444 = vadd.xlane.f32.xlu1 %v1403_v37  ;;  %1442 = vadd.xlane.f32.xlu0 %v1402_v38 }
 0x345   : > { %v1292_v47 = vpop.xlane.xlu1 %1291  ;;  %v2869_v46 = vsub.f32 %v2732_v53, %v1342_v40 }
 0x346   : > { %v1343_v49 = vmul.f32 0.0078125, %v1292_v47  ;;  %v1294_v48 = vpop.xlane.xlu0 %1293  ;;  %v1405_v50 = vmul.f32 %v2866_v42, %v2866_v42 }
 0x347   : > { %v1344_v52 = vmul.f32 0.0078125, %v1294_v48  ;;  %v1406_v62 = vmul.f32 %v2869_v46, %v2869_v46 }
 0x348   : > { %v2876_v54 = vsub.f32 %v2737_v55, %v1343_v49  ;;  %1448 = vadd.xlane.f32.xlu1 %v1405_v50  ;;  %1446 = vadd.xlane.f32.xlu0 %v1404_v30 }
 0x349   : > { %v1296_v51 = vpop.xlane.xlu1 %1295  ;;  %v2879_v32 = vsub.f32 %v2740_v57, %v1344_v52 }
 0x34a   : > { %v1345_v53 = vmul.f32 0.0078125, %v1296_v51  ;;  %v1298_v58 = vpop.xlane.xlu0 %1297  ;;  %v1407_v60 = vmul.f32 %v2876_v54, %v2876_v54 }
 0x34b   : > { %v1346_v0 = vmul.f32 0.0078125, %v1298_v58  ;;  %v1408_v10 = vmul.f32 %v2879_v32, %v2879_v32 }
 0x34c   : > { %v2886_v4 = vsub.f32 %v2745_v59, %v1345_v53  ;;  %1452 = vadd.xlane.f32.xlu1 %v1407_v60  ;;  %1450 = vadd.xlane.f32.xlu0 %v1406_v62 }
 0x34d   : > { %v1300_v55 = vpop.xlane.xlu1 %1299  ;;  %v2889_v6 = vsub.f32 %v2748_v61, %v1346_v0 }
 0x34e   : > { %v1347_v57 = vmul.f32 0.0078125, %v1300_v55  ;;  %v1302_v8 = vpop.xlane.xlu0 %1301  ;;  %v1409_v33 = vmul.f32 %v2886_v4, %v2886_v4 }
 0x34f   : > { %v1348_v12 = vmul.f32 0.0078125, %v1302_v8  ;;  %v1410_v23 = vmul.f32 %v2889_v6, %v2889_v6 }
 0x350   : > { %v2896_v39 = vsub.f32 %v2753_v63, %v1347_v57  ;;  %1456 = vadd.xlane.f32.xlu1 %v1409_v33  ;;  %1454 = vadd.xlane.f32.xlu0 %v1408_v10 }
 0x351   : > { %v1304_v59 = vpop.xlane.xlu1 %1303  ;;  %v2899_v41 = vsub.f32 %v2756_v1, %v1348_v12 }
 0x352   : > { %v1349_v61 = vmul.f32 0.0078125, %v1304_v59  ;;  %v1306_v18 = vpop.xlane.xlu0 %1305  ;;  %v1411_v21 = vmul.f32 %v2896_v39, %v2896_v39 }
 0x353   : > { %v1350_v27 = vmul.f32 0.0078125, %v1306_v18  ;;  %v1412_v38 = vmul.f32 %v2899_v41, %v2899_v41 }
 0x354   : > { %v2906_v43 = vsub.f32 %v2761_v3, %v1349_v61  ;;  %1460 = vadd.xlane.f32.xlu1 %v1411_v21  ;;  %1458 = vadd.xlane.f32.xlu0 %v1410_v23 }
 0x355   : > { %v1308_v63 = vpop.xlane.xlu1 %1307  ;;  %v2909_v45 = vsub.f32 %v2764_v5, %v1350_v27 }
 0x356   : > { %v1351_v1 = vmul.f32 0.0078125, %v1308_v63  ;;  %v1310_v35 = vpop.xlane.xlu0 %1309  ;;  %v1413_v37 = vmul.f32 %v2906_v43, %v2906_v43 }
 0x357   : > { %v1352_v40 = vmul.f32 0.0078125, %v1310_v35  ;;  %v1414_v30 = vmul.f32 %v2909_v45, %v2909_v45 }
 0x358   : > { %v2916_v47 = vsub.f32 %v2769_v7, %v1351_v1  ;;  %1464 = vadd.xlane.f32.xlu1 %v1413_v37  ;;  %1462 = vadd.xlane.f32.xlu0 %v1412_v38 }
 0x359   : > { %v1312_v3 = vpop.xlane.xlu1 %1311  ;;  %v2919_v49 = vsub.f32 %v2772_v9, %v1352_v40 }
 0x35a   : > { %v1353_v5 = vmul.f32 0.0078125, %v1312_v3  ;;  %v1314_v48 = vpop.xlane.xlu0 %1313  ;;  %v1415_v50 = vmul.f32 %v2916_v47, %v2916_v47 }
 0x35b   : > { %v1354_v52 = vmul.f32 0.0078125, %v1314_v48  ;;  %v1416_v62 = vmul.f32 %v2919_v49, %v2919_v49 }
 0x35c   : > { %v2926_v51 = vsub.f32 %v2777_v11, %v1353_v5  ;;  %1468 = vadd.xlane.f32.xlu1 %v1415_v50  ;;  %1466 = vadd.xlane.f32.xlu0 %v1414_v30 }
 0x35d   : > { %v1316_v7 = vpop.xlane.xlu1 %1315  ;;  %v2929_v53 = vsub.f32 %v2780_v13, %v1354_v52 }
 0x35e   : > { %v1355_v9 = vmul.f32 0.0078125, %v1316_v7  ;;  %v1318_v58 = vpop.xlane.xlu0 %1317  ;;  %v1417_v60 = vmul.f32 %v2926_v51, %v2926_v51 }
 0x35f   : > { %v1356_v0 = vmul.f32 0.0078125, %v1318_v58  ;;  %v1418_v10 = vmul.f32 %v2929_v53, %v2929_v53 }
 0x360   : > { %v2936_v55 = vsub.f32 %v2785_v15, %v1355_v9  ;;  %1472 = vadd.xlane.f32.xlu1 %v1417_v60  ;;  %1470 = vadd.xlane.f32.xlu0 %v1416_v62 }
 0x361   : > { %v1320_v11 = vpop.xlane.xlu1 %1319  ;;  %v2939_v57 = vsub.f32 %v2788_v17, %v1356_v0 }
 0x362   : > { %v1357_v13 = vmul.f32 0.0078125, %v1320_v11  ;;  %v1322_v8 = vpop.xlane.xlu0 %1321  ;;  %v1419_v33 = vmul.f32 %v2936_v55, %v2936_v55 }
 0x363   : > { %v1358_v12 = vmul.f32 0.0078125, %v1322_v8  ;;  %v1420_v23 = vmul.f32 %v2939_v57, %v2939_v57 }
 0x364   : > { %v2946_v59 = vsub.f32 %v2793_v19, %v1357_v13  ;;  %1476 = vadd.xlane.f32.xlu1 %v1419_v33  ;;  %1474 = vadd.xlane.f32.xlu0 %v1418_v10  ;;  %v2975_v33 = vld [vmem:[%s3127_s7] ss:$0 sm:$0xff] }
 0x365   : > { %v1324_v15 = vpop.xlane.xlu1 %1323  ;;  %v2949_v61 = vsub.f32 %v2796_v22, %v1358_v12 }
 0x366   : > { %v1359_v17 = vmul.f32 0.0078125, %v1324_v15  ;;  %v1326_v18 = vpop.xlane.xlu0 %1325  ;;  %v1421_v21 = vmul.f32 %v2946_v59, %v2946_v59 }
 0x367   : > { %v1360_v27 = vmul.f32 0.0078125, %v1326_v18  ;;  %v1422_v37 = vmul.f32 %v2949_v61, %v2949_v61 }
 0x368   : > { %v2956_v63 = vsub.f32 %v2801_v24, %v1359_v17  ;;  %1480 = vadd.xlane.f32.xlu1 %v1421_v21  ;;  %1478 = vadd.xlane.f32.xlu0 %v1420_v23  ;;  %v2981_v21 = vld [vmem:[%s3128_s8] ss:$0 sm:$0xff] }
 0x369   : > { %v1328_v19 = vpop.xlane.xlu1 %1327  ;;  %v2959_v1 = vsub.f32 %v2807_v29, %v1360_v27 }
 0x36a   : > { %v1361_v22 = vmul.f32 0.0078125, %v1328_v19  ;;  %v1423_v35 = vmul.f32 %v2956_v63, %v2956_v63 }
 0x36b   : > { %v1424_v40 = vmul.f32 %v2959_v1, %v2959_v1 }
 0x36c   : > { %v2966_v38 = vsub.f32 %v2804_v26, %v1361_v22  ;;  %1484 = vadd.xlane.f32.xlu1 %v1423_v35  ;;  %1482 = vadd.xlane.f32.xlu0 %v1422_v37 }
 0x36e   : > { %v1425_v24 = vmul.f32 %v2966_v38, %v2966_v38 }
 0x370   : > { %1488 = vadd.xlane.f32.xlu1 %v1425_v24  ;;  %1486 = vadd.xlane.f32.xlu0 %v1424_v40 }
 0x3bd   : > { %v1429_v29 = vpop.xlane.xlu1 %1428 }
 0x3be   : > { %v1491_v3 = vmul.f32 0.0078125, %v1429_v29 }
 0x3c0   : > { %v1523_v5 = vadd.f32 1e-05, %v1491_v3 }
 0x3c1   : > { %v1433_v48 = vpop.xlane.xlu1 %1432  ;;  %v1427_v50 = vpop.xlane.xlu0 %1426 }
 0x3c2   : > { %2268 = vrsqrt.f32 %v1523_v5  ;;  %v1493_v30 = vmul.f32 0.0078125, %v1433_v48  ;;  %v1490_v52 = vmul.f32 0.0078125, %v1427_v50 }
 0x3c4   : > { %v1525_v26 = vadd.f32 1e-05, %v1493_v30  ;;  %v1522_v7 = vadd.f32 1e-05, %v1490_v52 }
 0x3c5   : > { %v1431_v9 = vpop.xlane.xlu0 %1430 }
 0x3c6   : > { %2270 = vrsqrt.f32 %v1525_v26  ;;  %v1492_v58 = vmul.f32 0.0078125, %v1431_v9 }
 0x3c7   : > { %2272 = vrsqrt.f32 %v1522_v7 }
 0x3c8   : > { %v1524_v60 = vadd.f32 1e-05, %v1492_v58 }
 0x3c9   : > { %v1437_v62 = vpop.xlane.xlu1 %1436  ;;  %v1435_v0 = vpop.xlane.xlu0 %1434 }
 0x3ca   : > { %2274 = vrsqrt.f32 %v1524_v60  ;;  %v1495_v11 = vmul.f32 0.0078125, %v1437_v62  ;;  %v1494_v13 = vmul.f32 0.0078125, %v1435_v0 }
 0x3cc   : > { %v2269_v8 = vpop.eup %2268  ;;  %v1527_v10 = vadd.f32 1e-05, %v1495_v11  ;;  %v1526_v12 = vadd.f32 1e-05, %v1494_v13 }
 0x3cd   : > { %v1587_v15 = vmul.f32 %v2269_v8, %v2813_v34  ;;  %v1441_v17 = vpop.xlane.xlu1 %1440  ;;  %v1439_v18 = vpop.xlane.xlu0 %1438 }
 0x3ce   : > { %2276 = vrsqrt.f32 %v1527_v10  ;;  %v1497_v23 = vmul.f32 0.0078125, %v1441_v17  ;;  %v1496_v27 = vmul.f32 0.0078125, %v1439_v18 }
 0x3cf   : > { %v1626_v19 = vmul.f32 %v2975_v33, %v1587_v15  ;;  %2278 = vrsqrt.f32 %v1526_v12 }
 0x3d0   : > { %v2271_v22 = vpop.eup %2270  ;;  %v1529_v34 = vadd.f32 1e-05, %v1497_v23  ;;  %v1528_v35 = vadd.f32 1e-05, %v1496_v27 }
 0x3d1   : > { %v2273_v37 = vpop.eup %2272  ;;  %v1665_v24 = vadd.f32 %v2981_v21, %v1626_v19  ;;  %v1589_v40 = vmul.f32 %v2271_v22, %v2818_v28  ;;  %v1445_v29 = vpop.xlane.xlu1 %1444 }
 0x3d2   : > { %v1443_v3 = vpop.xlane.xlu0 %1442  ;;  %v1586_v5 = vmul.f32 %v2273_v37, %v2821_v44  ;;  %2280 = vrsqrt.f32 %v1529_v34  ;;  %v1499_v48 = vmul.f32 0.0078125, %v1445_v29 }
 0x3d3   : > { %v1498_v50 = vmul.f32 0.0078125, %v1443_v3  ;;  %1697 = vst [vmem:[%s2989_s29 + $0x8] sm:$0xff] %v1665_v24  ;;  %v1628_v30 = vmul.f32 %v2975_v33, %v1589_v40  ;;  %2282 = vrsqrt.f32 %v1528_v35 }
 0x3d4   : > { %v2275_v52 = vpop.eup %2274  ;;  %v1625_v26 = vmul.f32 %v2975_v33, %v1586_v5  ;;  %v1531_v7 = vadd.f32 1e-05, %v1499_v48 }
 0x3d5   : > { %v1530_v9 = vadd.f32 1e-05, %v1498_v50  ;;  %v1667_v28 = vadd.f32 %v2981_v21, %v1628_v30  ;;  %v1588_v58 = vmul.f32 %v2275_v52, %v2828_v56  ;;  %v1449_v60 = vpop.xlane.xlu1 %1448 }
 0x3d6   : > { %v1447_v44 = vpop.xlane.xlu0 %1446  ;;  %v1664_v62 = vadd.f32 %v2981_v21, %v1625_v26  ;;  %2284 = vrsqrt.f32 %v1531_v7  ;;  %v1501_v0 = vmul.f32 0.0078125, %v1449_v60 }
 0x3d7   : > { %v1500_v11 = vmul.f32 0.0078125, %v1447_v44  ;;  %1699 = vst [vmem:[%s2989_s29 + $0x18] sm:$0xff] %v1667_v28  ;;  %v1627_v13 = vmul.f32 %v2975_v33, %v1588_v58  ;;  %2286 = vrsqrt.f32 %v1530_v9 }
 0x3d8   : > { %v2277_v8 = vpop.eup %2276  ;;  %1696 = vst [vmem:[%s2989_s29] sm:$0xff] %v1664_v62  ;;  %v1533_v10 = vadd.f32 1e-05, %v1501_v0 }
 0x3d9   : > { %v1532_v12 = vadd.f32 1e-05, %v1500_v11  ;;  %v2279_v15 = vpop.eup %2278  ;;  %v1666_v17 = vadd.f32 %v2981_v21, %v1627_v13  ;;  %v1591_v56 = vmul.f32 %v2277_v8, %v2836_v2  ;;  %v1453_v18 = vpop.xlane.xlu1 %1452 }
 0x3da   : > { %v1451_v23 = vpop.xlane.xlu0 %1450  ;;  %v1590_v27 = vmul.f32 %v2279_v15, %v2831_v20  ;;  %2288 = vrsqrt.f32 %v1533_v10  ;;  %v1503_v19 = vmul.f32 0.0078125, %v1453_v18 }
 0x3db   : > { %v1502_v22 = vmul.f32 0.0078125, %v1451_v23  ;;  %1698 = vst [vmem:[%s2989_s29 + $0x10] sm:$0xff] %v1666_v17  ;;  %v1630_v34 = vmul.f32 %v2975_v33, %v1591_v56  ;;  %2290 = vrsqrt.f32 %v1532_v12 }
 0x3dc   : > { %v2281_v35 = vpop.eup %2280  ;;  %v1629_v37 = vmul.f32 %v2975_v33, %v1590_v27  ;;  %v1535_v24 = vadd.f32 1e-05, %v1503_v19 }
 0x3dd   : > { %v1534_v40 = vadd.f32 1e-05, %v1502_v22  ;;  %v2283_v29 = vpop.eup %2282  ;;  %v1669_v2 = vadd.f32 %v2981_v21, %v1630_v34  ;;  %v1593_v3 = vmul.f32 %v2281_v35, %v2846_v14  ;;  %v1457_v20 = vpop.xlane.xlu1 %1456 }
 0x3de   : > { %v1455_v5 = vpop.xlane.xlu0 %1454  ;;  %v1668_v48 = vadd.f32 %v2981_v21, %v1629_v37  ;;  %v1592_v50 = vmul.f32 %v2283_v29, %v2839_v36  ;;  %2292 = vrsqrt.f32 %v1535_v24  ;;  %v1505_v30 = vmul.f32 0.0078125, %v1457_v20 }
 0x3df   : > { %1701 = vst [vmem:[%s2989_s29 + $0x28] sm:$0xff] %v1669_v2  ;;  %v1632_v52 = vmul.f32 %v2975_v33, %v1593_v3  ;;  %2294 = vrsqrt.f32 %v1534_v40  ;;  %v1504_v26 = vmul.f32 0.0078125, %v1455_v5 }
 0x3e0   : > { %v2285_v7 = vpop.eup %2284  ;;  %1700 = vst [vmem:[%s2989_s29 + $0x20] sm:$0xff] %v1668_v48  ;;  %v1631_v9 = vmul.f32 %v2975_v33, %v1592_v50  ;;  %v1537_v28 = vadd.f32 1e-05, %v1505_v30 }
 0x3e1   : > { %v2287_v14 = vpop.eup %2286  ;;  %v1671_v58 = vadd.f32 %v2981_v21, %v1632_v52  ;;  %v1595_v60 = vmul.f32 %v2285_v7, %v2856_v31  ;;  %v1536_v36 = vadd.f32 1e-05, %v1504_v26  ;;  %v1461_v44 = vpop.xlane.xlu1 %1460 }
 0x3e2   : > { %v1459_v62 = vpop.xlane.xlu0 %1458  ;;  %v1670_v0 = vadd.f32 %v2981_v21, %v1631_v9  ;;  %v1594_v11 = vmul.f32 %v2287_v14, %v2849_v16  ;;  %2296 = vrsqrt.f32 %v1537_v28  ;;  %v1507_v13 = vmul.f32 0.0078125, %v1461_v44 }
 0x3e3   : > { %1703 = vst [vmem:[%s2989_s29 + $0x38] sm:$0xff] %v1671_v58  ;;  %v1634_v8 = vmul.f32 %v2975_v33, %v1595_v60  ;;  %2298 = vrsqrt.f32 %v1536_v36  ;;  %v1506_v10 = vmul.f32 0.0078125, %v1459_v62 }
 0x3e4   : > { %v2289_v12 = vpop.eup %2288  ;;  %1702 = vst [vmem:[%s2989_s29 + $0x30] sm:$0xff] %v1670_v0  ;;  %v1633_v15 = vmul.f32 %v2975_v33, %v1594_v11  ;;  %v1539_v31 = vadd.f32 1e-05, %v1507_v13 }
 0x3e5   : > { %v2291_v17 = vpop.eup %2290  ;;  %v1673_v56 = vadd.f32 %v2981_v21, %v1634_v8  ;;  %v1597_v18 = vmul.f32 %v2289_v12, %v2866_v42  ;;  %v1538_v16 = vadd.f32 1e-05, %v1506_v10  ;;  %v1465_v23 = vpop.xlane.xlu1 %1464 }
 0x3e6   : > { %v1463_v27 = vpop.xlane.xlu0 %1462  ;;  %v1672_v19 = vadd.f32 %v2981_v21, %v1633_v15  ;;  %v1596_v22 = vmul.f32 %v2291_v17, %v2859_v25  ;;  %2300 = vrsqrt.f32 %v1539_v31  ;;  %v1509_v34 = vmul.f32 0.0078125, %v1465_v23 }
 0x3e7   : > { %1705 = vst [vmem:[%s2989_s29 + $0x48] sm:$0xff] %v1673_v56  ;;  %v1636_v35 = vmul.f32 %v2975_v33, %v1597_v18  ;;  %2302 = vrsqrt.f32 %v1538_v16  ;;  %v1508_v37 = vmul.f32 0.0078125, %v1463_v27 }
 0x3e8   : > { %v2293_v24 = vpop.eup %2292  ;;  %1704 = vst [vmem:[%s2989_s29 + $0x40] sm:$0xff] %v1672_v19  ;;  %v1635_v40 = vmul.f32 %v2975_v33, %v1596_v22  ;;  %v1541_v42 = vadd.f32 1e-05, %v1509_v34 }
 0x3e9   : > { %v2295_v29 = vpop.eup %2294  ;;  %v1675_v2 = vadd.f32 %v2981_v21, %v1636_v35  ;;  %v1599_v3 = vmul.f32 %v2293_v24, %v2876_v54  ;;  %v1540_v25 = vadd.f32 1e-05, %v1508_v37  ;;  %v1469_v20 = vpop.xlane.xlu1 %1468 }
 0x3ea   : > { %v1467_v5 = vpop.xlane.xlu0 %1466  ;;  %v1674_v48 = vadd.f32 %v2981_v21, %v1635_v40  ;;  %v1598_v50 = vmul.f32 %v2295_v29, %v2869_v46  ;;  %2304 = vrsqrt.f32 %v1541_v42  ;;  %v1511_v30 = vmul.f32 0.0078125, %v1469_v20 }
 0x3eb   : > { %1707 = vst [vmem:[%s2989_s29 + $0x58] sm:$0xff] %v1675_v2  ;;  %v1638_v52 = vmul.f32 %v2975_v33, %v1599_v3  ;;  %2306 = vrsqrt.f32 %v1540_v25  ;;  %v1510_v26 = vmul.f32 0.0078125, %v1467_v5 }
 0x3ec   : > { %v2297_v7 = vpop.eup %2296  ;;  %1706 = vst [vmem:[%s2989_s29 + $0x50] sm:$0xff] %v1674_v48  ;;  %v1637_v9 = vmul.f32 %v2975_v33, %v1598_v50  ;;  %v1543_v54 = vadd.f32 1e-05, %v1511_v30 }
 0x3ed   : > { %v2299_v28 = vpop.eup %2298  ;;  %v1677_v14 = vadd.f32 %v2981_v21, %v1638_v52  ;;  %v1601_v58 = vmul.f32 %v2297_v7, %v2886_v4  ;;  %v1542_v46 = vadd.f32 1e-05, %v1510_v26  ;;  %v1473_v60 = vpop.xlane.xlu1 %1472 }
 0x3ee   : > { %v1471_v36 = vpop.xlane.xlu0 %1470  ;;  %v1676_v44 = vadd.f32 %v2981_v21, %v1637_v9  ;;  %v1600_v62 = vmul.f32 %v2299_v28, %v2879_v32  ;;  %2308 = vrsqrt.f32 %v1543_v54  ;;  %v1513_v0 = vmul.f32 0.0078125, %v1473_v60 }
 0x3ef   : > { %1709 = vst [vmem:[%s2989_s29 + $0x68] sm:$0xff] %v1677_v14  ;;  %v1640_v11 = vmul.f32 %v2975_v33, %v1601_v58  ;;  %2310 = vrsqrt.f32 %v1542_v46  ;;  %v1512_v13 = vmul.f32 0.0078125, %v1471_v36 }
 0x3f0   : > { %v2301_v8 = vpop.eup %2300  ;;  %1708 = vst [vmem:[%s2989_s29 + $0x60] sm:$0xff] %v1676_v44  ;;  %v1639_v10 = vmul.f32 %v2975_v33, %v1600_v62  ;;  %v1545_v4 = vadd.f32 1e-05, %v1513_v0 }
 0x3f1   : > { %v2303_v12 = vpop.eup %2302  ;;  %v1679_v15 = vadd.f32 %v2981_v21, %v1640_v11  ;;  %v1603_v31 = vmul.f32 %v2301_v8, %v2896_v39  ;;  %v1544_v32 = vadd.f32 1e-05, %v1512_v13  ;;  %v1477_v17 = vpop.xlane.xlu1 %1476 }
 0x3f2   : > { %v1475_v56 = vpop.xlane.xlu0 %1474  ;;  %v1678_v18 = vadd.f32 %v2981_v21, %v1639_v10  ;;  %v1602_v16 = vmul.f32 %v2303_v12, %v2889_v6  ;;  %2312 = vrsqrt.f32 %v1545_v4  ;;  %v1515_v23 = vmul.f32 0.0078125, %v1477_v17 }
 0x3f3   : > { %1711 = vst [vmem:[%s2989_s29 + $0x78] sm:$0xff] %v1679_v15  ;;  %v1642_v27 = vmul.f32 %v2975_v33, %v1603_v31  ;;  %2314 = vrsqrt.f32 %v1544_v32  ;;  %v1514_v19 = vmul.f32 0.0078125, %v1475_v56 }
 0x3f4   : > { %v2305_v22 = vpop.eup %2304  ;;  %1710 = vst [vmem:[%s2989_s29 + $0x70] sm:$0xff] %v1678_v18  ;;  %v1641_v34 = vmul.f32 %v2975_v33, %v1602_v16  ;;  %v1547_v39 = vadd.f32 1e-05, %v1515_v23 }
 0x3f5   : > { %v2307_v35 = vpop.eup %2306  ;;  %v1681_v37 = vadd.f32 %v2981_v21, %v1642_v27  ;;  %v1605_v24 = vmul.f32 %v2305_v22, %v2906_v43  ;;  %v1546_v6 = vadd.f32 1e-05, %v1514_v19  ;;  %v1481_v40 = vpop.xlane.xlu1 %1480 }
 0x3f6   : > { %v1479_v42 = vpop.xlane.xlu0 %1478  ;;  %v1680_v29 = vadd.f32 %v2981_v21, %v1641_v34  ;;  %v1604_v2 = vmul.f32 %v2307_v35, %v2899_v41  ;;  %2316 = vrsqrt.f32 %v1547_v39  ;;  %v1517_v3 = vmul.f32 0.0078125, %v1481_v40 }
 0x3f7   : > { %1713 = vst [vmem:[%s2989_s29 + $0x88] sm:$0xff] %v1681_v37  ;;  %v1644_v25 = vmul.f32 %v2975_v33, %v1605_v24  ;;  %2318 = vrsqrt.f32 %v1546_v6  ;;  %v1516_v20 = vmul.f32 0.0078125, %v1479_v42 }
 0x3f8   : > { %v2309_v5 = vpop.eup %2308  ;;  %1712 = vst [vmem:[%s2989_s29 + $0x80] sm:$0xff] %v1680_v29  ;;  %v1643_v48 = vmul.f32 %v2975_v33, %v1604_v2  ;;  %v1549_v43 = vadd.f32 1e-05, %v1517_v3 }
 0x3f9   : > { %v2311_v50 = vpop.eup %2310  ;;  %v1683_v30 = vadd.f32 %v2981_v21, %v1644_v25  ;;  %v1607_v52 = vmul.f32 %v2309_v5, %v2916_v47  ;;  %v1548_v41 = vadd.f32 1e-05, %v1516_v20  ;;  %v1485_v26 = vpop.xlane.xlu1 %1484 }
 0x3fa   : > { %v1483_v7 = vpop.xlane.xlu0 %1482  ;;  %v1682_v9 = vadd.f32 %v2981_v21, %v1643_v48  ;;  %v1606_v54 = vmul.f32 %v2311_v50, %v2909_v45  ;;  %2320 = vrsqrt.f32 %v1549_v43  ;;  %v1519_v28 = vmul.f32 0.0078125, %v1485_v26 }
 0x3fb   : > { %1715 = vst [vmem:[%s2989_s29 + $0x98] sm:$0xff] %v1683_v30  ;;  %v1646_v14 = vmul.f32 %v2975_v33, %v1607_v52  ;;  %2322 = vrsqrt.f32 %v1548_v41  ;;  %v1518_v58 = vmul.f32 0.0078125, %v1483_v7 }
 0x3fc   : > { %v2313_v46 = vpop.eup %2312  ;;  %1714 = vst [vmem:[%s2989_s29 + $0x90] sm:$0xff] %v1682_v9  ;;  %v1645_v60 = vmul.f32 %v2975_v33, %v1606_v54  ;;  %v1551_v47 = vadd.f32 1e-05, %v1519_v28 }
 0x3fd   : > { %v2315_v36 = vpop.eup %2314  ;;  %v1685_v44 = vadd.f32 %v2981_v21, %v1646_v14  ;;  %v1609_v62 = vmul.f32 %v2313_v46, %v2926_v51  ;;  %v1550_v45 = vadd.f32 1e-05, %v1518_v58  ;;  %v1489_v0 = vpop.xlane.xlu1 %1488 }
 0x3fe   : > { %v1487_v11 = vpop.xlane.xlu0 %1486  ;;  %v1684_v13 = vadd.f32 %v2981_v21, %v1645_v60  ;;  %v1608_v8 = vmul.f32 %v2315_v36, %v2919_v49  ;;  %2324 = vrsqrt.f32 %v1551_v47  ;;  %v1521_v10 = vmul.f32 0.0078125, %v1489_v0 }
 0x3ff   : > { %1717 = vst [vmem:[%s2989_s29 + $0xa8] sm:$0xff] %v1685_v44  ;;  %v1648_v4 = vmul.f32 %v2975_v33, %v1609_v62  ;;  %2326 = vrsqrt.f32 %v1550_v45  ;;  %v1520_v12 = vmul.f32 0.0078125, %v1487_v11 }
 0x400   : > { %v2317_v15 = vpop.eup %2316  ;;  %1716 = vst [vmem:[%s2989_s29 + $0xa0] sm:$0xff] %v1684_v13  ;;  %v1647_v51 = vmul.f32 %v2975_v33, %v1608_v8  ;;  %v1553_v31 = vadd.f32 1e-05, %v1521_v10 }
 0x401   : > { %v2319_v32 = vpop.eup %2318  ;;  %v1687_v17 = vadd.f32 %v2981_v21, %v1648_v4  ;;  %v1611_v56 = vmul.f32 %v2317_v15, %v2936_v55  ;;  %v1552_v49 = vadd.f32 1e-05, %v1520_v12 }
 0x402   : > { %v1686_v18 = vadd.f32 %v2981_v21, %v1647_v51  ;;  %v1610_v16 = vmul.f32 %v2319_v32, %v2929_v53  ;;  %2328 = vrsqrt.f32 %v1553_v31 }
 0x403   : > { %1719 = vst [vmem:[%s2989_s29 + $0xb8] sm:$0xff] %v1687_v17  ;;  %v1650_v23 = vmul.f32 %v2975_v33, %v1611_v56  ;;  %2330 = vrsqrt.f32 %v1552_v49 }
 0x404   : > { %v2321_v27 = vpop.eup %2320  ;;  %1718 = vst [vmem:[%s2989_s29 + $0xb0] sm:$0xff] %v1686_v18  ;;  %v1649_v19 = vmul.f32 %v2975_v33, %v1610_v16 }
 0x405   : > { %v2323_v22 = vpop.eup %2322  ;;  %v1689_v55 = vadd.f32 %v2981_v21, %v1650_v23  ;;  %v1613_v34 = vmul.f32 %v2321_v27, %v2946_v59 }
 0x406   : > { %v1688_v39 = vadd.f32 %v2981_v21, %v1649_v19  ;;  %v1612_v53 = vmul.f32 %v2323_v22, %v2939_v57 }
 0x407   : > { %1721 = vst [vmem:[%s2989_s29 + $0xc8] sm:$0xff] %v1689_v55  ;;  %v1652_v35 = vmul.f32 %v2975_v33, %v1613_v34 }
 0x408   : > { %v2325_v37 = vpop.eup %2324  ;;  %1720 = vst [vmem:[%s2989_s29 + $0xc0] sm:$0xff] %v1688_v39  ;;  %v1651_v24 = vmul.f32 %v2975_v33, %v1612_v53 }
 0x409   : > { %v2327_v6 = vpop.eup %2326  ;;  %v1691_v40 = vadd.f32 %v2981_v21, %v1652_v35  ;;  %v1615_v42 = vmul.f32 %v2325_v37, %v2956_v63 }
 0x40a   : > { %v1690_v59 = vadd.f32 %v2981_v21, %v1651_v24  ;;  %v1614_v29 = vmul.f32 %v2327_v6, %v2949_v61 }
 0x40b   : > { %1723 = vst [vmem:[%s2989_s29 + $0xd8] sm:$0xff] %v1691_v40  ;;  %v1654_v57 = vmul.f32 %v2975_v33, %v1615_v42 }
 0x40c   : > { %v2329_v2 = vpop.eup %2328  ;;  %1722 = vst [vmem:[%s2989_s29 + $0xd0] sm:$0xff] %v1690_v59  ;;  %v1653_v3 = vmul.f32 %v2975_v33, %v1614_v29 }
 0x40d   : > { %v2331_v25 = vpop.eup %2330  ;;  %v1693_v20 = vadd.f32 %v2981_v21, %v1654_v57  ;;  %v1617_v5 = vmul.f32 %v2329_v2, %v2966_v38 }
 0x40e   : > { %v1692_v63 = vadd.f32 %v2981_v21, %v1653_v3  ;;  %v1616_v48 = vmul.f32 %v2331_v25, %v2959_v1 }
 0x40f   : > { %1725 = vst [vmem:[%s2989_s29 + $0xe8] sm:$0xff] %v1693_v20  ;;  %v1656_v61 = vmul.f32 %v2975_v33, %v1617_v5 }
 0x410   : > { %1724 = vst [vmem:[%s2989_s29 + $0xe0] sm:$0xff] %v1692_v63  ;;  %v1655_v43 = vmul.f32 %v2975_v33, %v1616_v48 }
 0x411   : > { %v1695_v50 = vadd.f32 %v2981_v21, %v1656_v61 }
 0x412   : > { %v1694_v30 = vadd.f32 %v2981_v21, %v1655_v43 }
 0x413   : > { %1727 = vst [vmem:[%s2989_s29 + $0xf8] sm:$0xff] %v1695_v50 }
 0x414   : > { %1726 = vst [vmem:[%s2989_s29 + $0xf0] sm:$0xff] %v1694_v30 }
 0x415 PF: > { %s19_s30 = sadd.s32 1, %s2338_s30  }
 0x416   : > { %p16_p4 = scmp.ge.s32.totalorder %s19_s30, 4  }
 0x418   :  { %18 = sbr.rel (!%p16_p4) target bundleno = 1 (0x1), region = 86 }

// kernel: encoder_forward.3
= control target key start
LH: loop header
LB: loop body
LE: loop exit
PB: predicated region body
PF: predicated region fallthrough
CT: control target
= control target key end

     0   :  { %s3823_s30 = smov 0   ;;  %s5149_s0 = inlined_call_operand.vmem [shape: f32[1024,3], index: 0, kind: input, shape index: {}]   ;;  %s5150_s1 = inlined_call_operand.vmem [shape: f32[3,128], index: 1, kind: input, shape index: {}]   ;;  %s5151_s2 = inlined_call_operand.vmem [shape: f32[1,128], index: 2, kind: input, shape index: {}]   ;;  %s5152_s3 = inlined_call_operand.vmem [shape: f32[128,128], index: 3, kind: input, shape index: {}]   ;;  %s5153_s4 = inlined_call_operand.vmem [shape: f32[1,128], index: 4, kind: input, shape index: {}]   ;;  %s5154_s5 = inlined_call_operand.vmem [shape: f32[128,128], index: 5, kind: input, shape index: {}]   ;;  %s5155_s6 = inlined_call_operand.vmem [shape: f32[1,128], index: 6, kind: input, shape index: {}]   ;;  %s5156_s7 = inlined_call_operand.vmem [shape: f32[1,128], index: 7, kind: input, shape index: {}]   ;;  %s5157_s8 = inlined_call_operand.vmem [shape: f32[1,128], index: 8, kind: input, shape index: {}]   ;;  %s5158_s9 = inlined_call_operand.vmem [shape: f32[1024,128], index: 9, kind: output, shape index: {}]  }
   0x1 LB: > { %s2901_s10 = sadd.s32 4294967295, %s3771_s30   ;;  %p2905_p0 = scmp.ge.s32.totalorder %s3771_s30, 1  ;;  %s3771_s30 = sphi %s3823_s30, %s19_s30  }
   0x2   : > { %p288_p1 = scmp.lt.s32.totalorder %s3771_s30, 3 }
   0x4   : > { %p289_p2 = pnand %p2905_p0, %p288_p1 }
   0x6   : > { %292 = sbr.rel (%p289_p2) target bundleno = 1112 (0x458), region = 56 }
   0xd   : > { %v400_v0 = vld [vmem:[%s5150_s1] sm:$0x7]  ;;  %vm601_vm0 = vcmask 1042432   ;;  %s2906_s13 = sshll.u32 %s2901_s10, 6  ;;  %v1055_v2 = vld [vmem:[%s5152_s3 + $0x8] sm:$0xff]  ;;  %vm408_vm1 = vcmask 23552  }
   0xe   : > { %v1054_v1 = vld [vmem:[%s5152_s3] sm:$0xff]  ;;  %3207 = vmatprep.subr.msk.mxu0 %vm601_vm0, %v400_v0  ;;  %p325_p3 = scmp.lt.s32.totalorder %s2906_s13, 127  ;;  %3625 = vmatprep.subr.msk.mxu1 %vm601_vm0, %v400_v0  ;;  %v1056_v10 = vld [vmem:[%s5152_s3 + $0x10] sm:$0xff]  ;;  %v1057_v11 = vld [vmem:[%s5152_s3 + $0x18] sm:$0xff] }
   0xf   : > { %3208 = vmatpush3.msk.msra.mxu0 %vm601_vm0, %v400_v0  ;;  %3626 = vmatpush3.msk.msra.mxu1 %vm601_vm0, %v400_v0  ;;  %v3561_v3 = vpack.c.bf16 %v1055_v2, %v1054_v1  ;;  %v3565_v14 = vpack.c.bf16 %v1057_v11, %v1056_v10  ;;  %v1058_v15 = vld [vmem:[%s5152_s3 + $0x20] sm:$0xff]  ;;  %v1059_v16 = vld [vmem:[%s5152_s3 + $0x28] sm:$0xff]  ;;  %v1060_v25 = vld [vmem:[%s5152_s3 + $0x30] sm:$0xff] }
  0x10   : > { %s5256_s13 = smov (!%p325_p3, %s2906_s13), 127  ;;  %v3569_v23 = vpack.c.bf16 %v1059_v16, %v1058_v15  ;;  %v1061_v26 = vld [vmem:[%s5152_s3 + $0x38] sm:$0xff]  ;;  %v1062_v32 = vld [vmem:[%s5152_s3 + $0x40] sm:$0xff]  ;;  %v1063_v33 = vld [vmem:[%s5152_s3 + $0x48] sm:$0xff] }
  0x11   : > { %3562 = vmatprep.subr.bf16.mxu1 %v3561_v3  ;;  %s2907_s18 = sshll.u32 %s5256_s13, 3  ;;  %v3573_v30 = vpack.c.bf16 %v1061_v26, %v1060_v25  ;;  %v3577_v37 = vpack.c.bf16 %v1063_v33, %v1062_v32  ;;  %v1064_v39 = vld [vmem:[%s5152_s3 + $0x50] sm:$0xff]  ;;  %v1065_v40 = vld [vmem:[%s5152_s3 + $0x58] sm:$0xff]  ;;  %v1066_v46 = vld [vmem:[%s5152_s3 + $0x60] sm:$0xff] }
  0x12   : > { %s3848_s21 = scalar_lea.vmem %s5149_s0, %s2907_s18  ;;  %v3581_v44 = vpack.c.bf16 %v1065_v40, %v1064_v39  ;;  %v1067_v47 = vld [vmem:[%s5152_s3 + $0x68] sm:$0xff]  ;;  %v1068_v53 = vld [vmem:[%s5152_s3 + $0x70] sm:$0xff]  ;;  %v1069_v54 = vld [vmem:[%s5152_s3 + $0x78] sm:$0xff]  ;;  %s4900_s23 = scalar_lea.vmem %s5158_s9, %s2907_s18 }
  0x13   : > { %v336_v4 = vld [vmem:[%s3848_s21] sm:$0xff]  ;;  %v337_v5 = vld [vmem:[%s3848_s21 + $0x8] sm:$0xff]  ;;  %v338_v6 = vld [vmem:[%s3848_s21 + $0x10] sm:$0xff]  ;;  %v3585_v51 = vpack.c.bf16 %v1067_v47, %v1066_v46  ;;  %v3589_v58 = vpack.c.bf16 %v1069_v54, %v1068_v53 }
  0x14   : > { %3209 = vmatprep.mubr.msk.f32.mxu0 %vm408_vm1, %v336_v4  ;;  %v339_v7 = vld [vmem:[%s3848_s21 + $0x18] sm:$0xff]  ;;  %v340_v8 = vld [vmem:[%s3848_s21 + $0x20] sm:$0xff]  ;;  %v341_v9 = vld [vmem:[%s3848_s21 + $0x28] sm:$0xff] }
  0x15   : > { %3210 = vmatmul.mubr.msk.f32.vlgmr.msra.gmra.mrb[0].mxu0 %vm408_vm1, %v337_v5  ;;  %v342_v12 = vld [vmem:[%s3848_s21 + $0x30] sm:$0xff]  ;;  %v368_v13 = vld [vmem:[%s3848_s21 + $0x100] sm:$0xff]  ;;  %v343_v17 = vld [vmem:[%s3848_s21 + $0x38] sm:$0xff] }
  0x16   : > { %3212 = vmatprep.mubr.msk.f32.mxu0 %vm408_vm1, %v338_v6  ;;  %3257 = vmatprep.mubr.msk.f32.mxu1 %vm408_vm1, %v368_v13  ;;  %v369_v18 = vld [vmem:[%s3848_s21 + $0x108] sm:$0xff]  ;;  %v370_v19 = vld [vmem:[%s3848_s21 + $0x110] sm:$0xff]  ;;  %v344_v20 = vld [vmem:[%s3848_s21 + $0x40] sm:$0xff] }
  0x17   : > { %3258 = vmatmul.mubr.msk.f32.vlgmr.msra.gmra.mrb[0].mxu1 %vm408_vm1, %v369_v18  ;;  %v371_v21 = vld [vmem:[%s3848_s21 + $0x118] sm:$0xff]  ;;  %v372_v22 = vld [vmem:[%s3848_s21 + $0x120] sm:$0xff]  ;;  %v345_v24 = vld [vmem:[%s3848_s21 + $0x48] sm:$0xff] }
  0x18   : > { %3260 = vmatprep.mubr.msk.f32.mxu1 %vm408_vm1, %v370_v19  ;;  %3564 = vmatpush3.bf16.msra.mxu1 %v3561_v3  ;;  %v346_v27 = vld [vmem:[%s3848_s21 + $0x50] sm:$0xff]  ;;  %v373_v28 = vld [vmem:[%s3848_s21 + $0x128] sm:$0xff]  ;;  %v347_v31 = vld [vmem:[%s3848_s21 + $0x58] sm:$0xff] }
  0x19   : > { %3213 = vmatmul.mubr.msk.f32.gmra.mrb[2].mxu0 %vm408_vm1, %v339_v7  ;;  %3566 = vmatprep.subr.bf16.mxu1 %v3565_v14  ;;  %v374_v29 = vld [vmem:[%s3848_s21 + $0x130] sm:$0xff]  ;;  %v348_v34 = vld [vmem:[%s3848_s21 + $0x60] sm:$0xff]  ;;  %v375_v35 = vld [vmem:[%s3848_s21 + $0x138] sm:$0xff] }
  0x1a   : > { %3215 = vmatprep.mubr.msk.f32.mxu0 %vm408_vm1, %v340_v8  ;;  %v376_v36 = vld [vmem:[%s3848_s21 + $0x140] sm:$0xff]  ;;  %v349_v38 = vld [vmem:[%s3848_s21 + $0x68] sm:$0xff]  ;;  %v350_v41 = vld [vmem:[%s3848_s21 + $0x70] sm:$0xff] }
  0x1b   : > { %3261 = vmatmul.mubr.msk.f32.gmra.mrb[2].mxu1 %vm408_vm1, %v371_v21  ;;  %v377_v42 = vld [vmem:[%s3848_s21 + $0x148] sm:$0xff]  ;;  %v378_v43 = vld [vmem:[%s3848_s21 + $0x150] sm:$0xff]  ;;  %v351_v45 = vld [vmem:[%s3848_s21 + $0x78] sm:$0xff] }
  0x1c   : > { %3263 = vmatprep.mubr.msk.f32.mxu1 %vm408_vm1, %v372_v22  ;;  %3568 = vmatpush3.bf16.msra.mxu1 %v3565_v14  ;;  %v352_v48 = vld [vmem:[%s3848_s21 + $0x80] sm:$0xff]  ;;  %v379_v49 = vld [vmem:[%s3848_s21 + $0x158] sm:$0xff]  ;;  %v353_v52 = vld [vmem:[%s3848_s21 + $0x88] sm:$0xff] }
  0x1d   : > { %3216 = vmatmul.mubr.msk.f32.gmra.mrb[4].mxu0 %vm408_vm1, %v341_v9  ;;  %3570 = vmatprep.subr.bf16.mxu1 %v3569_v23  ;;  %v380_v50 = vld [vmem:[%s3848_s21 + $0x160] sm:$0xff]  ;;  %v354_v55 = vld [vmem:[%s3848_s21 + $0x90] sm:$0xff]  ;;  %v381_v56 = vld [vmem:[%s3848_s21 + $0x168] sm:$0xff] }
  0x1e   : > { %3218 = vmatprep.mubr.msk.f32.mxu0 %vm408_vm1, %v342_v12  ;;  %v382_v57 = vld [vmem:[%s3848_s21 + $0x170] sm:$0xff]  ;;  %v355_v59 = vld [vmem:[%s3848_s21 + $0x98] sm:$0xff]  ;;  %v356_v60 = vld [vmem:[%s3848_s21 + $0xa0] sm:$0xff] }
  0x1f   : > { %3264 = vmatmul.mubr.msk.f32.gmra.mrb[4].mxu1 %vm408_vm1, %v373_v28  ;;  %v383_v61 = vld [vmem:[%s3848_s21 + $0x178] sm:$0xff]  ;;  %v384_v62 = vld [vmem:[%s3848_s21 + $0x180] sm:$0xff]  ;;  %v357_v63 = vld [vmem:[%s3848_s21 + $0xa8] sm:$0xff] }
  0x20   : > { %3266 = vmatprep.mubr.msk.f32.mxu1 %vm408_vm1, %v374_v29  ;;  %3572 = vmatpush3.bf16.msra.mxu1 %v3569_v23  ;;  %v358_v0 = vld [vmem:[%s3848_s21 + $0xb0] sm:$0xff]  ;;  %v385_v1 = vld [vmem:[%s3848_s21 + $0x188] sm:$0xff]  ;;  %v359_v3 = vld [vmem:[%s3848_s21 + $0xb8] sm:$0xff] }
  0x21   : > { %3219 = vmatmul.mubr.msk.f32.gmra.mrb[6].mxu0 %vm408_vm1, %v343_v17  ;;  %3574 = vmatprep.subr.bf16.mxu1 %v3573_v30  ;;  %v386_v2 = vld [vmem:[%s3848_s21 + $0x190] sm:$0xff]  ;;  %v360_v4 = vld [vmem:[%s3848_s21 + $0xc0] sm:$0xff]  ;;  %v387_v5 = vld [vmem:[%s3848_s21 + $0x198] sm:$0xff] }
  0x22   : > { %3221 = vmatprep.mubr.msk.f32.mxu0 %vm408_vm1, %v344_v20  ;;  %v388_v6 = vld [vmem:[%s3848_s21 + $0x1a0] sm:$0xff]  ;;  %v361_v7 = vld [vmem:[%s3848_s21 + $0xc8] sm:$0xff]  ;;  %v362_v8 = vld [vmem:[%s3848_s21 + $0xd0] sm:$0xff] }
  0x23   : > { %3267 = vmatmul.mubr.msk.f32.gmra.mrb[6].mxu1 %vm408_vm1, %v375_v35  ;;  %v389_v9 = vld [vmem:[%s3848_s21 + $0x1a8] sm:$0xff]  ;;  %v390_v10 = vld [vmem:[%s3848_s21 + $0x1b0] sm:$0xff]  ;;  %v363_v11 = vld [vmem:[%s3848_s21 + $0xd8] sm:$0xff] }
  0x24   : > { %3269 = vmatprep.mubr.msk.f32.mxu1 %vm408_vm1, %v376_v36  ;;  %3576 = vmatpush3.bf16.msra.mxu1 %v3573_v30  ;;  %v364_v12 = vld [vmem:[%s3848_s21 + $0xe0] sm:$0xff]  ;;  %v391_v13 = vld [vmem:[%s3848_s21 + $0x1b8] sm:$0xff]  ;;  %v365_v15 = vld [vmem:[%s3848_s21 + $0xe8] sm:$0xff] }
  0x25   : > { %3222 = vmatmul.mubr.msk.f32.gmra.mrb[8].mxu0 %vm408_vm1, %v345_v24  ;;  %3578 = vmatprep.subr.bf16.mxu1 %v3577_v37  ;;  %v392_v14 = vld [vmem:[%s3848_s21 + $0x1c0] sm:$0xff]  ;;  %v366_v16 = vld [vmem:[%s3848_s21 + $0xf0] sm:$0xff]  ;;  %v393_v17 = vld [vmem:[%s3848_s21 + $0x1c8] sm:$0xff] }
  0x26   : > { %3224 = vmatprep.mubr.msk.f32.mxu0 %vm408_vm1, %v346_v27  ;;  %v394_v18 = vld [vmem:[%s3848_s21 + $0x1d0] sm:$0xff]  ;;  %v367_v19 = vld [vmem:[%s3848_s21 + $0xf8] sm:$0xff]  ;;  %v396_v21 = vld [vmem:[%s3848_s21 + $0x1e0] sm:$0xff] }
  0x27   : > { %3270 = vmatmul.mubr.msk.f32.gmra.mrb[8].mxu1 %vm408_vm1, %v377_v42  ;;  %v395_v20 = vld [vmem:[%s3848_s21 + $0x1d8] sm:$0xff]  ;;  %v397_v22 = vld [vmem:[%s3848_s21 + $0x1e8] sm:$0xff]  ;;  %v398_v23 = vld [vmem:[%s3848_s21 + $0x1f0] sm:$0xff] }
  0x28   : > { %3272 = vmatprep.mubr.msk.f32.mxu1 %vm408_vm1, %v378_v43  ;;  %3580 = vmatpush3.bf16.msra.mxu1 %v3577_v37  ;;  %v399_v24 = vld [vmem:[%s3848_s21 + $0x1f8] sm:$0xff]  ;;  %v4023_v25 = vld [vmem:[%s5151_s2] ss:$0 sm:$0xff]  ;;  %v1528_v32 = vld [vmem:[%s5154_s5 + $0x10] sm:$0xff] }
  0x29   : > { %3225 = vmatmul.mubr.msk.f32.gmra.mrb[10].mxu0 %vm408_vm1, %v347_v31  ;;  %3582 = vmatprep.subr.bf16.mxu1 %v3581_v44  ;;  %v1526_v30 = vld [vmem:[%s5154_s5] sm:$0xff]  ;;  %v1527_v31 = vld [vmem:[%s5154_s5 + $0x8] sm:$0xff]  ;;  %v1529_v36 = vld [vmem:[%s5154_s5 + $0x18] sm:$0xff] }
  0x2a   : > { %3227 = vmatprep.mubr.msk.f32.mxu0 %vm408_vm1, %v348_v34  ;;  %v3593_v35 = vpack.c.bf16 %v1527_v31, %v1526_v30  ;;  %v3597_v40 = vpack.c.bf16 %v1529_v36, %v1528_v32  ;;  %v1531_v42 = vld [vmem:[%s5154_s5 + $0x28] sm:$0xff]  ;;  %v1540_v31 = vld [vmem:[%s5154_s5 + $0x70] sm:$0xff]  ;;  %v1541_v32 = vld [vmem:[%s5154_s5 + $0x78] sm:$0xff] }
  0x2b   : > { %3273 = vmatmul.mubr.msk.f32.gmra.mrb[10].mxu1 %vm408_vm1, %v379_v49 }
  0x2c   : > { %3275 = vmatprep.mubr.msk.f32.mxu1 %vm408_vm1, %v380_v50  ;;  %3584 = vmatpush3.bf16.msra.mxu1 %v3581_v44  ;;  %v1532_v50 = vld [vmem:[%s5154_s5 + $0x30] sm:$0xff] }
  0x2d   : > { %3228 = vmatmul.mubr.msk.f32.gmra.mrb[12].mxu0 %vm408_vm1, %v349_v38  ;;  %3586 = vmatprep.subr.bf16.mxu1 %v3585_v51 }
  0x2e   : > { %3230 = vmatprep.mubr.msk.f32.mxu0 %vm408_vm1, %v350_v41  ;;  %v1530_v41 = vld [vmem:[%s5154_s5 + $0x20] sm:$0xff]  ;;  %3594 = vmatprep.subr.bf16.mxu0 %v3593_v35 }
  0x2f   : > { %3276 = vmatmul.mubr.msk.f32.gmra.mrb[12].mxu1 %vm408_vm1, %v381_v56  ;;  %3596 = vmatpush3.bf16.msra.mxu0 %v3593_v35  ;;  %v3601_v46 = vpack.c.bf16 %v1531_v42, %v1530_v41 }
  0x30   : > { %3278 = vmatprep.mubr.msk.f32.mxu1 %vm408_vm1, %v382_v57  ;;  %3588 = vmatpush3.bf16.msra.mxu1 %v3585_v51  ;;  %v1533_v51 = vld [vmem:[%s5154_s5 + $0x38] sm:$0xff] }
  0x31   : > { %3231 = vmatmul.mubr.msk.f32.gmra.mrb[14].mxu0 %vm408_vm1, %v351_v45  ;;  %3590 = vmatprep.subr.bf16.mxu1 %v3589_v58 }
  0x32   : > { %3233 = vmatprep.mubr.msk.f32.mxu0 %vm408_vm1, %v352_v48  ;;  %3598 = vmatprep.subr.bf16.mxu0 %v3597_v40 }
  0x33   : > { %3279 = vmatmul.mubr.msk.f32.gmra.mrb[14].mxu1 %vm408_vm1, %v383_v61  ;;  %3600 = vmatpush3.bf16.msra.mxu0 %v3597_v40  ;;  %v1534_v61 = vld [vmem:[%s5154_s5 + $0x40] sm:$0xff] }
  0x34   : > { %3281 = vmatprep.mubr.msk.f32.mxu1 %vm408_vm1, %v384_v62  ;;  %3592 = vmatpush3.bf16.msra.mxu1 %v3589_v58  ;;  %v3605_v58 = vpack.c.bf16 %v1533_v51, %v1532_v50  ;;  %v1535_v62 = vld [vmem:[%s5154_s5 + $0x48] sm:$0xff] }
  0x35   : > { %3234 = vmatmul.mubr.msk.f32.gmra.mrb[16].mxu0 %vm408_vm1, %v353_v52  ;;  %3602 = vmatprep.subr.bf16.mxu0 %v3601_v46 }
  0x36   : > { %3236 = vmatprep.mubr.msk.f32.mxu0 %vm408_vm1, %v354_v55 }
  0x37   : > { %3282 = vmatmul.mubr.msk.f32.gmra.mrb[16].mxu1 %vm408_vm1, %v385_v1  ;;  %3604 = vmatpush3.bf16.msra.mxu0 %v3601_v46 }
  0x38   : > { %3284 = vmatprep.mubr.msk.f32.mxu1 %vm408_vm1, %v386_v2  ;;  %3606 = vmatprep.subr.bf16.mxu0 %v3605_v58 }
  0x39   : > { %3237 = vmatmul.mubr.msk.f32.gmra.mrb[18].mxu0 %vm408_vm1, %v355_v59 }
  0x3a   : > { %3239 = vmatprep.mubr.msk.f32.mxu0 %vm408_vm1, %v356_v60 }
  0x3b   : > { %3285 = vmatmul.mubr.msk.f32.gmra.mrb[18].mxu1 %vm408_vm1, %v387_v5  ;;  %v3609_v5 = vpack.c.bf16 %v1535_v62, %v1534_v61  ;;  %3608 = vmatpush3.bf16.msra.mxu0 %v3605_v58 }
  0x3c   : > { %3287 = vmatprep.mubr.msk.f32.mxu1 %vm408_vm1, %v388_v6 }
  0x3d   : > { %3240 = vmatmul.mubr.msk.f32.gmra.mrb[20].mxu0 %vm408_vm1, %v357_v63  ;;  %3610 = vmatprep.subr.bf16.mxu0 %v3609_v5 }
  0x3e   : > { %3242 = vmatprep.mubr.msk.f32.mxu0 %vm408_vm1, %v358_v0 }
  0x3f   : > { %3288 = vmatmul.mubr.msk.f32.gmra.mrb[20].mxu1 %vm408_vm1, %v389_v9  ;;  %v1537_v9 = vld [vmem:[%s5154_s5 + $0x58] sm:$0xff]  ;;  %3612 = vmatpush3.bf16.msra.mxu0 %v3609_v5 }
  0x40   : > { %3290 = vmatprep.mubr.msk.f32.mxu1 %vm408_vm1, %v390_v10 }
  0x41   : > { %3243 = vmatmul.mubr.msk.f32.gmra.mrb[22].mxu0 %vm408_vm1, %v359_v3 }
  0x42   : > { %3245 = vmatprep.mubr.msk.f32.mxu0 %vm408_vm1, %v360_v4 }
  0x43   : > { %3291 = vmatmul.mubr.msk.f32.gmra.mrb[22].mxu1 %vm408_vm1, %v391_v13 }
  0x44   : > { %3293 = vmatprep.mubr.msk.f32.mxu1 %vm408_vm1, %v392_v14 }
  0x45   : > { %3246 = vmatmul.mubr.msk.f32.gmra.mrb[24].mxu0 %vm408_vm1, %v361_v7 }
  0x46   : > { %3248 = vmatprep.mubr.msk.f32.mxu0 %vm408_vm1, %v362_v8  ;;  %v1536_v8 = vld [vmem:[%s5154_s5 + $0x50] sm:$0xff] }
  0x47   : > { %3294 = vmatmul.mubr.msk.f32.gmra.mrb[24].mxu1 %vm408_vm1, %v393_v17 }
  0x48   : > { %3296 = vmatprep.mubr.msk.f32.mxu1 %vm408_vm1, %v394_v18 }
  0x49   : > { %3249 = vmatmul.mubr.msk.f32.gmra.mrb[26].mxu0 %vm408_vm1, %v363_v11 }
  0x4a   : > { %3251 = vmatprep.mubr.msk.f32.mxu0 %vm408_vm1, %v364_v12 }
  0x4b   : > { %3297 = vmatmul.mubr.msk.f32.gmra.mrb[26].mxu1 %vm408_vm1, %v395_v20  ;;  %v1539_v20 = vld [vmem:[%s5154_s5 + $0x68] sm:$0xff] }
  0x4c   : > { %3299 = vmatprep.mubr.msk.f32.mxu1 %vm408_vm1, %v396_v21 }
  0x4d   : > { %3252 = vmatmul.mubr.msk.f32.gmra.mrb[28].mxu0 %vm408_vm1, %v365_v15 }
  0x4e   : > { %3254 = vmatprep.mubr.msk.f32.mxu0 %vm408_vm1, %v366_v16  ;;  %v3613_v16 = vpack.c.bf16 %v1537_v9, %v1536_v8 }
  0x4f   : > { %3300 = vmatmul.mubr.msk.f32.gmra.mrb[28].mxu1 %vm408_vm1, %v397_v22 }
  0x50   : > { %3302 = vmatprep.mubr.msk.f32.mxu1 %vm408_vm1, %v398_v23  ;;  %3614 = vmatprep.subr.bf16.mxu0 %v3613_v16 }
  0x51   : > { %3255 = vmatmul.mubr.msk.f32.gmra.mrb[30].mxu0 %vm408_vm1, %v367_v19  ;;  %v1538_v19 = vld [vmem:[%s5154_s5 + $0x60] sm:$0xff] }
  0x52   : > { %3616 = vmatpush3.bf16.msra.mxu0 %v3613_v16 }
  0x53   : > { %3303 = vmatmul.mubr.msk.f32.gmra.mrb[30].mxu1 %vm408_vm1, %v399_v24 }
  0xe8   : > { %v3211_v26 = vpop.f32.mrb[0].mxu0 }
  0xe9   : > { %v677_v27 = vadd.f32 %v3211_v26, %v4023_v25  ;;  %v671_v28 = vpop.f32.mrb[1].mxu0 }
  0xea   : > { %v672_v29 = vadd.f32 %v4023_v25, %v671_v28  ;;  %v4055_v53 = vpop.f32.mrb[0].mxu1  ;;  %v3617_v28 = vpack.c.bf16 %v1539_v20, %v1538_v19 }
  0xeb   : > { %v991_v37 = vmax.f32 %v677_v27, 0.0  ;;  %v4057_v55 = vpop.f32.mrb[1].mxu1 }
  0xec   : > { %v990_v33 = vmax.f32 %v672_v29, 0.0  ;;  %v3214_v34 = vpop.f32.mrb[2].mxu0  ;;  %3618 = vmatprep.subr.bf16.mxu0 %v3617_v28 }
  0xed   : > { %v687_v38 = vadd.f32 %v3214_v34, %v4023_v25  ;;  %v681_v39 = vpop.f32.mrb[3].mxu0  ;;  %3620 = vmatpush3.bf16.msra.mxu0 %v3617_v28 }
  0xee   : > { %v682_v43 = vadd.f32 %v4023_v25, %v681_v39  ;;  %3337 = vmatprep.mubr.f32.mxu1 %v990_v33  ;;  %v4067_v0 = vpop.f32.mrb[2].mxu1  ;;  %v3621_v39 = vpack.c.bf16 %v1541_v32, %v1540_v31 }
  0xef   : > { %3338 = vmatmul.mubr.f32.vlgmr.msra.gmra.mrb[32].mxu1 %v991_v37  ;;  %v993_v47 = vmax.f32 %v687_v38, 0.0  ;;  %v4069_v2 = vpop.f32.mrb[3].mxu1 }
  0xf0   : > { %v992_v44 = vmax.f32 %v682_v43, 0.0  ;;  %v3217_v45 = vpop.f32.mrb[4].mxu0  ;;  %3622 = vmatprep.subr.bf16.mxu0 %v3621_v39 }
  0xf1   : > { %v697_v48 = vadd.f32 %v3217_v45, %v4023_v25  ;;  %v691_v49 = vpop.f32.mrb[5].mxu0  ;;  %3624 = vmatpush3.bf16.msra.mxu0 %v3621_v39 }
  0xf2   : > { %v692_v52 = vadd.f32 %v4023_v25, %v691_v49  ;;  %3340 = vmatprep.mubr.f32.mxu1 %v992_v44  ;;  %v4079_v11 = vpop.f32.mrb[4].mxu1 }
  0xf3   : > { %v995_v54 = vmax.f32 %v697_v48, 0.0  ;;  %3341 = vmatmul.mubr.f32.gmra.mrb[34].mxu1 %v993_v47  ;;  %v4081_v13 = vpop.f32.mrb[5].mxu1 }
  0xf4   : > { %v994_v56 = vmax.f32 %v692_v52, 0.0  ;;  %v3220_v57 = vpop.f32.mrb[6].mxu0 }
  0xf5   : > { %v707_v59 = vadd.f32 %v3220_v57, %v4023_v25  ;;  %v701_v60 = vpop.f32.mrb[7].mxu0 }
  0xf6   : > { %v702_v63 = vadd.f32 %v4023_v25, %v701_v60  ;;  %3343 = vmatprep.mubr.f32.mxu1 %v994_v56  ;;  %v4091_v22 = vpop.f32.mrb[6].mxu1 }
  0xf7   : > { %v997_v1 = vmax.f32 %v707_v59, 0.0  ;;  %3344 = vmatmul.mubr.f32.gmra.mrb[36].mxu1 %v995_v54  ;;  %v4093_v24 = vpop.f32.mrb[7].mxu1 }
  0xf8   : > { %v996_v3 = vmax.f32 %v702_v63, 0.0  ;;  %v3223_v4 = vpop.f32.mrb[8].mxu0 }
  0xf9   : > { %v717_v6 = vadd.f32 %v3223_v4, %v4023_v25  ;;  %v711_v7 = vpop.f32.mrb[9].mxu0 }
  0xfa   : > { %v712_v10 = vadd.f32 %v4023_v25, %v711_v7  ;;  %3346 = vmatprep.mubr.f32.mxu1 %v996_v3  ;;  %v4103_v34 = vpop.f32.mrb[8].mxu1 }
  0xfb   : > { %v999_v12 = vmax.f32 %v717_v6, 0.0  ;;  %3347 = vmatmul.mubr.f32.gmra.mrb[38].mxu1 %v997_v1  ;;  %v4105_v36 = vpop.f32.mrb[9].mxu1 }
  0xfc   : > { %v998_v14 = vmax.f32 %v712_v10, 0.0  ;;  %v3226_v15 = vpop.f32.mrb[10].mxu0 }
  0xfd   : > { %v727_v17 = vadd.f32 %v3226_v15, %v4023_v25  ;;  %v721_v18 = vpop.f32.mrb[11].mxu0 }
  0xfe   : > { %v722_v21 = vadd.f32 %v4023_v25, %v721_v18  ;;  %3349 = vmatprep.mubr.f32.mxu1 %v998_v14  ;;  %v4109_v43 = vpop.f32.mrb[10].mxu1 }
  0xff   : > { %v1001_v23 = vmax.f32 %v727_v17, 0.0  ;;  %3350 = vmatmul.mubr.f32.gmra.mrb[40].mxu1 %v999_v12  ;;  %v4111_v45 = vpop.f32.mrb[11].mxu1 }
 0x100   : > { %v1000_v26 = vmax.f32 %v722_v21, 0.0  ;;  %v3229_v27 = vpop.f32.mrb[12].mxu0 }
 0x101   : > { %v737_v29 = vadd.f32 %v3229_v27, %v4023_v25  ;;  %v731_v30 = vpop.f32.mrb[13].mxu0 }
 0x102   : > { %v732_v33 = vadd.f32 %v4023_v25, %v731_v30  ;;  %3352 = vmatprep.mubr.f32.mxu1 %v1000_v26  ;;  %v4115_v51 = vpop.f32.mrb[12].mxu1 }
 0x103   : > { %v1003_v35 = vmax.f32 %v737_v29, 0.0  ;;  %3353 = vmatmul.mubr.f32.gmra.mrb[42].mxu1 %v1001_v23  ;;  %v4117_v54 = vpop.f32.mrb[13].mxu1 }
 0x104   : > { %v1002_v37 = vmax.f32 %v732_v33, 0.0  ;;  %v3232_v38 = vpop.f32.mrb[14].mxu0 }
 0x105   : > { %v747_v40 = vadd.f32 %v3232_v38, %v4023_v25  ;;  %v741_v41 = vpop.f32.mrb[15].mxu0 }
 0x106   : > { %v742_v42 = vadd.f32 %v4023_v25, %v741_v41  ;;  %3355 = vmatprep.mubr.f32.mxu1 %v1002_v37  ;;  %v4121_v61 = vpop.f32.mrb[14].mxu1 }
 0x107   : > { %v1005_v44 = vmax.f32 %v747_v40, 0.0  ;;  %3356 = vmatmul.mubr.f32.gmra.mrb[44].mxu1 %v1003_v35  ;;  %v4123_v63 = vpop.f32.mrb[15].mxu1 }
 0x108   : > { %v1004_v46 = vmax.f32 %v742_v42, 0.0  ;;  %v3235_v47 = vpop.f32.mrb[16].mxu0 }
 0x109   : > { %v757_v48 = vadd.f32 %v3235_v47, %v4023_v25  ;;  %v751_v49 = vpop.f32.mrb[17].mxu0 }
 0x10a   : > { %v752_v50 = vadd.f32 %v4023_v25, %v751_v49  ;;  %3358 = vmatprep.mubr.f32.mxu1 %v1004_v46  ;;  %v4127_v7 = vpop.f32.mrb[16].mxu1 }
 0x10b   : > { %v1007_v52 = vmax.f32 %v757_v48, 0.0  ;;  %3359 = vmatmul.mubr.f32.gmra.mrb[46].mxu1 %v1005_v44  ;;  %v4129_v9 = vpop.f32.mrb[17].mxu1 }
 0x10c   : > { %v1006_v56 = vmax.f32 %v752_v50, 0.0  ;;  %v3238_v57 = vpop.f32.mrb[18].mxu0 }
 0x10d   : > { %v767_v58 = vadd.f32 %v3238_v57, %v4023_v25  ;;  %v761_v59 = vpop.f32.mrb[19].mxu0  ;;  %v832_v57 = vadd.f32 %v4023_v25, %v4057_v55  ;;  %v842_v55 = vadd.f32 %v4023_v25, %v4069_v2  ;;  %v857_v2 = vadd.f32 %v4079_v11, %v4023_v25 }
 0x10e   : > { %v762_v60 = vadd.f32 %v4023_v25, %v761_v59  ;;  %3361 = vmatprep.mubr.f32.mxu1 %v1006_v56  ;;  %v4133_v17 = vpop.f32.mrb[18].mxu1  ;;  %v877_v11 = vadd.f32 %v4103_v34, %v4023_v25  ;;  %v897_v34 = vadd.f32 %v4115_v51, %v4023_v25  ;;  %v917_v51 = vadd.f32 %v4127_v7, %v4023_v25 }
 0x10f   : > { %v1009_v62 = vmax.f32 %v767_v58, 0.0  ;;  %3362 = vmatmul.mubr.f32.gmra.mrb[48].mxu1 %v1007_v52  ;;  %v4135_v19 = vpop.f32.mrb[19].mxu1 }
 0x110   : > { %v1008_v1 = vmax.f32 %v762_v60, 0.0  ;;  %v3241_v3 = vpop.f32.mrb[20].mxu0 }
 0x111   : > { %v777_v4 = vadd.f32 %v3241_v3, %v4023_v25  ;;  %v771_v5 = vpop.f32.mrb[21].mxu0  ;;  %v837_v3 = vadd.f32 %v4055_v53, %v4023_v25  ;;  %v852_v53 = vadd.f32 %v4023_v25, %v4081_v13 }
 0x112   : > { %v772_v6 = vadd.f32 %v4023_v25, %v771_v5  ;;  %3364 = vmatprep.mubr.f32.mxu1 %v1008_v1  ;;  %v4139_v28 = vpop.f32.mrb[20].mxu1 }
 0x113   : > { %v1011_v8 = vmax.f32 %v777_v4, 0.0  ;;  %3365 = vmatmul.mubr.f32.gmra.mrb[50].mxu1 %v1009_v62  ;;  %v4141_v30 = vpop.f32.mrb[21].mxu1  ;;  %v937_v7 = vadd.f32 %v4139_v28, %v4023_v25 }
 0x114   : > { %v1010_v10 = vmax.f32 %v772_v6, 0.0  ;;  %v3244_v12 = vpop.f32.mrb[22].mxu0  ;;  %v1022_v6 = vmax.f32 %v832_v57, 0.0 }
 0x115   : > { %v787_v14 = vadd.f32 %v3244_v12, %v4023_v25  ;;  %v781_v15 = vpop.f32.mrb[23].mxu0  ;;  %v847_v12 = vadd.f32 %v4067_v0, %v4023_v25  ;;  %v862_v0 = vadd.f32 %v4023_v25, %v4093_v24  ;;  %v882_v24 = vadd.f32 %v4023_v25, %v4111_v45 }
 0x116   : > { %v782_v16 = vadd.f32 %v4023_v25, %v781_v15  ;;  %3367 = vmatprep.mubr.f32.mxu1 %v1010_v10  ;;  %v4145_v38 = vpop.f32.mrb[22].mxu1  ;;  %v1023_v10 = vmax.f32 %v837_v3, 0.0  ;;  %v1024_v15 = vmax.f32 %v842_v55, 0.0  ;;  %v902_v45 = vadd.f32 %v4023_v25, %v4123_v63 }
 0x117   : > { %v1013_v18 = vmax.f32 %v787_v14, 0.0  ;;  %3368 = vmatmul.mubr.f32.gmra.mrb[52].mxu1 %v1011_v8  ;;  %v4147_v40 = vpop.f32.mrb[23].mxu1  ;;  %v1028_v13 = vmax.f32 %v862_v0, 0.0  ;;  %v922_v63 = vadd.f32 %v4023_v25, %v4135_v19 }
 0x118   : > { %v1012_v20 = vmax.f32 %v782_v16, 0.0  ;;  %v3247_v21 = vpop.f32.mrb[24].mxu0  ;;  %v942_v19 = vadd.f32 %v4023_v25, %v4147_v40 }
 0x119   : > { %v797_v23 = vadd.f32 %v3247_v21, %v4023_v25  ;;  %v791_v26 = vpop.f32.mrb[25].mxu0  ;;  %v1026_v21 = vmax.f32 %v852_v53, 0.0 }
 0x11a   : > { %v792_v27 = vadd.f32 %v4023_v25, %v791_v26  ;;  %3370 = vmatprep.mubr.f32.mxu1 %v1012_v20  ;;  %v4151_v48 = vpop.f32.mrb[24].mxu1  ;;  %v867_v26 = vadd.f32 %v4091_v22, %v4023_v25  ;;  %v887_v22 = vadd.f32 %v4109_v43, %v4023_v25  ;;  %v907_v43 = vadd.f32 %v4121_v61, %v4023_v25 }
 0x11b   : > { %v1015_v29 = vmax.f32 %v797_v23, 0.0  ;;  %3371 = vmatmul.mubr.f32.gmra.mrb[54].mxu1 %v1013_v18  ;;  %v4153_v50 = vpop.f32.mrb[25].mxu1  ;;  %v1025_v18 = vmax.f32 %v847_v12, 0.0  ;;  %v1027_v23 = vmax.f32 %v857_v2, 0.0  ;;  %v927_v61 = vadd.f32 %v4133_v17, %v4023_v25 }
 0x11c   : > { %v1014_v31 = vmax.f32 %v792_v27, 0.0  ;;  %v3250_v32 = vpop.f32.mrb[26].mxu0  ;;  %v872_v27 = vadd.f32 %v4023_v25, %v4105_v36  ;;  %v892_v36 = vadd.f32 %v4023_v25, %v4117_v54  ;;  %v912_v54 = vadd.f32 %v4023_v25, %v4129_v9 }
 0x11d   : > { %v807_v33 = vadd.f32 %v3250_v32, %v4023_v25  ;;  %v801_v35 = vpop.f32.mrb[27].mxu0  ;;  %v1031_v32 = vmax.f32 %v877_v11, 0.0  ;;  %v932_v9 = vadd.f32 %v4023_v25, %v4141_v30  ;;  %v947_v17 = vadd.f32 %v4145_v38, %v4023_v25 }
 0x11e   : > { %v802_v37 = vadd.f32 %v4023_v25, %v801_v35  ;;  %3373 = vmatprep.mubr.f32.mxu1 %v1014_v31  ;;  %v4159_v62 = vpop.f32.mrb[26].mxu1  ;;  %v1030_v31 = vmax.f32 %v872_v27, 0.0  ;;  %v1033_v35 = vmax.f32 %v887_v22, 0.0  ;;  %v1044_v57 = vmax.f32 %v942_v19, 0.0 }
 0x11f   : > { %v1017_v39 = vmax.f32 %v807_v33, 0.0  ;;  %3374 = vmatmul.mubr.f32.gmra.mrb[56].mxu1 %v1015_v29  ;;  %v4163_v4 = vpop.f32.mrb[27].mxu1  ;;  %v1029_v29 = vmax.f32 %v867_v26, 0.0  ;;  %v1032_v33 = vmax.f32 %v882_v24, 0.0  ;;  %v952_v30 = vadd.f32 %v4023_v25, %v4153_v50 }
 0x120   : > { %v1016_v41 = vmax.f32 %v802_v37, 0.0  ;;  %v3253_v42 = vpop.f32.mrb[28].mxu0  ;;  %v1034_v37 = vmax.f32 %v892_v36, 0.0  ;;  %v957_v28 = vadd.f32 %v4151_v48, %v4023_v25  ;;  %v962_v40 = vadd.f32 %v4023_v25, %v4163_v4 }
 0x121   : > { %v817_v44 = vadd.f32 %v3253_v42, %v4023_v25  ;;  %v811_v46 = vpop.f32.mrb[29].mxu0  ;;  %v1037_v42 = vmax.f32 %v907_v43, 0.0  ;;  %v967_v38 = vadd.f32 %v4159_v62, %v4023_v25 }
 0x122   : > { %v812_v47 = vadd.f32 %v4023_v25, %v811_v46  ;;  %3376 = vmatprep.mubr.f32.mxu1 %v1016_v41  ;;  %v4167_v8 = vpop.f32.mrb[28].mxu1  ;;  %v1036_v41 = vmax.f32 %v902_v45, 0.0  ;;  %v1039_v46 = vmax.f32 %v917_v51, 0.0 }
 0x123   : > { %v1019_v49 = vmax.f32 %v817_v44, 0.0  ;;  %3377 = vmatmul.mubr.f32.gmra.mrb[58].mxu1 %v1017_v39  ;;  %v4171_v14 = vpop.f32.mrb[29].mxu1  ;;  %v1035_v39 = vmax.f32 %v897_v34, 0.0  ;;  %v1038_v44 = vmax.f32 %v912_v54, 0.0  ;;  %v1049_v3 = vmax.f32 %v967_v38, 0.0 }
 0x124   : > { %v1018_v52 = vmax.f32 %v812_v47, 0.0  ;;  %v3256_v56 = vpop.f32.mrb[30].mxu0  ;;  %v1040_v47 = vmax.f32 %v922_v63, 0.0  ;;  %v972_v50 = vadd.f32 %v4023_v25, %v4171_v14  ;;  %v977_v48 = vadd.f32 %v4167_v8, %v4023_v25  ;;  %v4236_v8 = vld [vmem:[%s5153_s4] ss:$0 sm:$0xff] }
 0x125   : > { %v827_v58 = vadd.f32 %v3256_v56, %v4023_v25  ;;  %v821_v59 = vpop.f32.mrb[31].mxu0  ;;  %v1043_v56 = vmax.f32 %v937_v7, 0.0 }
 0x126   : > { %v822_v60 = vadd.f32 %v4023_v25, %v821_v59  ;;  %3379 = vmatprep.mubr.f32.mxu1 %v1018_v52  ;;  %v4175_v16 = vpop.f32.mrb[30].mxu1  ;;  %v1042_v52 = vmax.f32 %v932_v9, 0.0  ;;  %v1046_v59 = vmax.f32 %v952_v30, 0.0 }
 0x127   : > { %v1021_v1 = vmax.f32 %v827_v58, 0.0  ;;  %3380 = vmatmul.mubr.f32.gmra.mrb[60].mxu1 %v1019_v49  ;;  %v4179_v20 = vpop.f32.mrb[31].mxu1  ;;  %v1041_v49 = vmax.f32 %v927_v61, 0.0  ;;  %v1045_v58 = vmax.f32 %v947_v17, 0.0  ;;  %v987_v62 = vadd.f32 %v4175_v16, %v4023_v25 }
 0x128   : > { %v1020_v5 = vmax.f32 %v822_v60, 0.0  ;;  %v1047_v60 = vmax.f32 %v957_v28, 0.0  ;;  %v982_v4 = vadd.f32 %v4023_v25, %v4179_v20 }
 0x12a   : > { %3382 = vmatprep.mubr.f32.mxu1 %v1020_v5  ;;  %v1050_v5 = vmax.f32 %v972_v50, 0.0  ;;  %v1052_v55 = vmax.f32 %v982_v4, 0.0 }
 0x12b   : > { %3383 = vmatmul.mubr.f32.gmra.mrb[62].mxu1 %v1021_v1  ;;  %v1048_v1 = vmax.f32 %v962_v40, 0.0 }
 0x12c   : > { %3385 = vmatprep.mubr.f32.mxu1 %v1022_v6  ;;  %v1051_v6 = vmax.f32 %v977_v48, 0.0 }
 0x12f   : > { %3386 = vmatmul.mubr.f32.gmra.mrb[64].mxu1 %v1023_v10  ;;  %v1053_v10 = vmax.f32 %v987_v62, 0.0 }
 0x130   : > { %3388 = vmatprep.mubr.f32.mxu1 %v1024_v15 }
 0x133   : > { %3389 = vmatmul.mubr.f32.gmra.mrb[66].mxu1 %v1025_v18 }
 0x134   : > { %3391 = vmatprep.mubr.f32.mxu1 %v1026_v21 }
 0x137   : > { %3392 = vmatmul.mubr.f32.gmra.mrb[68].mxu1 %v1027_v23 }
 0x138   : > { %3394 = vmatprep.mubr.f32.mxu1 %v1028_v13 }
 0x13b   : > { %3395 = vmatmul.mubr.f32.gmra.mrb[70].mxu1 %v1029_v29 }
 0x13c   : > { %3397 = vmatprep.mubr.f32.mxu1 %v1030_v31 }
 0x13f   : > { %3398 = vmatmul.mubr.f32.gmra.mrb[72].mxu1 %v1031_v32 }
 0x140   : > { %3400 = vmatprep.mubr.f32.mxu1 %v1032_v33 }
 0x143   : > { %3401 = vmatmul.mubr.f32.gmra.mrb[74].mxu1 %v1033_v35 }
 0x144   : > { %3403 = vmatprep.mubr.f32.mxu1 %v1034_v37 }
 0x147   : > { %3404 = vmatmul.mubr.f32.gmra.mrb[76].mxu1 %v1035_v39 }
 0x148   : > { %3406 = vmatprep.mubr.f32.mxu1 %v1036_v41 }
 0x14b   : > { %3407 = vmatmul.mubr.f32.gmra.mrb[78].mxu1 %v1037_v42 }
 0x14c   : > { %3409 = vmatprep.mubr.f32.mxu1 %v1038_v44 }
 0x14f   : > { %3410 = vmatmul.mubr.f32.gmra.mrb[80].mxu1 %v1039_v46 }
 0x150   : > { %3412 = vmatprep.mubr.f32.mxu1 %v1040_v47 }
 0x153   : > { %3413 = vmatmul.mubr.f32.gmra.mrb[82].mxu1 %v1041_v49 }
 0x154   : > { %3415 = vmatprep.mubr.f32.mxu1 %v1042_v52 }
 0x157   : > { %3416 = vmatmul.mubr.f32.gmra.mrb[84].mxu1 %v1043_v56 }
 0x158   : > { %3418 = vmatprep.mubr.f32.mxu1 %v1044_v57 }
 0x15b   : > { %3419 = vmatmul.mubr.f32.gmra.mrb[86].mxu1 %v1045_v58 }
 0x15c   : > { %3421 = vmatprep.mubr.f32.mxu1 %v1046_v59 }
 0x15f   : > { %3422 = vmatmul.mubr.f32.gmra.mrb[88].mxu1 %v1047_v60 }
 0x160   : > { %3424 = vmatprep.mubr.f32.mxu1 %v1048_v1 }
 0x163   : > { %3425 = vmatmul.mubr.f32.gmra.mrb[90].mxu1 %v1049_v3 }
 0x164   : > { %3427 = vmatprep.mubr.f32.mxu1 %v1050_v5 }
 0x167   : > { %3428 = vmatmul.mubr.f32.gmra.mrb[92].mxu1 %v1051_v6 }
 0x168   : > { %3430 = vmatprep.mubr.f32.mxu1 %v1052_v55 }
 0x16b   : > { %3431 = vmatmul.mubr.f32.gmra.mrb[94].mxu1 %v1053_v10 }
 0x1c2   : > { %v3339_v12 = vpop.f32.mrb[32].mxu1 }
 0x1c3   : > { %v1149_v14 = vadd.f32 %v3339_v12, %v4236_v8  ;;  %v1143_v15 = vpop.f32.mrb[33].mxu1 }
 0x1c4   : > { %v1144_v53 = vadd.f32 %v4236_v8, %v1143_v15 }
 0x1c5   : > { %v1463_v25 = vmax.f32 %v1149_v14, 0.0 }
 0x1c6   : > { %v1462_v18 = vmax.f32 %v1144_v53, 0.0  ;;  %v3342_v2 = vpop.f32.mrb[34].mxu1 }
 0x1c7   : > { %v1159_v16 = vadd.f32 %v3342_v2, %v4236_v8  ;;  %v1153_v20 = vpop.f32.mrb[35].mxu1 }
 0x1c8   : > { %v1154_v21 = vadd.f32 %v4236_v8, %v1153_v20  ;;  %3465 = vmatprep.mubr.f32.mxu0 %v1462_v18 }
 0x1c9   : > { %3466 = vmatmul.mubr.f32.vlgmr.msra.gmra.mrb[32].mxu0 %v1463_v25  ;;  %v1465_v26 = vmax.f32 %v1159_v16, 0.0 }
 0x1ca   : > { %v1464_v0 = vmax.f32 %v1154_v21, 0.0  ;;  %v3345_v23 = vpop.f32.mrb[36].mxu1 }
 0x1cb   : > { %v1169_v13 = vadd.f32 %v3345_v23, %v4236_v8  ;;  %v1163_v27 = vpop.f32.mrb[37].mxu1 }
 0x1cc   : > { %v1164_v29 = vadd.f32 %v4236_v8, %v1163_v27  ;;  %3468 = vmatprep.mubr.f32.mxu0 %v1464_v0 }
 0x1cd   : > { %v1467_v11 = vmax.f32 %v1169_v13, 0.0  ;;  %3469 = vmatmul.mubr.f32.gmra.mrb[34].mxu0 %v1465_v26 }
 0x1ce   : > { %v1466_v31 = vmax.f32 %v1164_v29, 0.0  ;;  %v3348_v24 = vpop.f32.mrb[38].mxu1 }
 0x1cf   : > { %v1179_v32 = vadd.f32 %v3348_v24, %v4236_v8  ;;  %v1173_v22 = vpop.f32.mrb[39].mxu1 }
 0x1d0   : > { %v1174_v33 = vadd.f32 %v4236_v8, %v1173_v22  ;;  %3471 = vmatprep.mubr.f32.mxu0 %v1466_v31 }
 0x1d1   : > { %v1469_v36 = vmax.f32 %v1179_v32, 0.0  ;;  %3472 = vmatmul.mubr.f32.gmra.mrb[36].mxu0 %v1467_v11 }
 0x1d2   : > { %v1468_v35 = vmax.f32 %v1174_v33, 0.0  ;;  %v3351_v34 = vpop.f32.mrb[40].mxu1 }
 0x1d3   : > { %v1189_v37 = vadd.f32 %v3351_v34, %v4236_v8  ;;  %v1183_v45 = vpop.f32.mrb[41].mxu1 }
 0x1d4   : > { %v1184_v39 = vadd.f32 %v4236_v8, %v1183_v45  ;;  %3474 = vmatprep.mubr.f32.mxu0 %v1468_v35 }
 0x1d5   : > { %v1471_v43 = vmax.f32 %v1189_v37, 0.0  ;;  %3475 = vmatmul.mubr.f32.gmra.mrb[38].mxu0 %v1469_v36 }
 0x1d6   : > { %v1470_v41 = vmax.f32 %v1184_v39, 0.0  ;;  %v3354_v54 = vpop.f32.mrb[42].mxu1 }
 0x1d7   : > { %v1199_v42 = vadd.f32 %v3354_v54, %v4236_v8  ;;  %v1193_v51 = vpop.f32.mrb[43].mxu1 }
 0x1d8   : > { %v1194_v44 = vadd.f32 %v4236_v8, %v1193_v51  ;;  %3477 = vmatprep.mubr.f32.mxu0 %v1470_v41 }
 0x1d9   : > { %v1473_v63 = vmax.f32 %v1199_v42, 0.0  ;;  %3478 = vmatmul.mubr.f32.gmra.mrb[40].mxu0 %v1471_v43 }
 0x1da   : > { %v1472_v46 = vmax.f32 %v1194_v44, 0.0  ;;  %v3357_v61 = vpop.f32.mrb[44].mxu1 }
 0x1db   : > { %v1209_v47 = vadd.f32 %v3357_v61, %v4236_v8  ;;  %v1203_v9 = vpop.f32.mrb[45].mxu1 }
 0x1dc   : > { %v1204_v49 = vadd.f32 %v4236_v8, %v1203_v9  ;;  %3480 = vmatprep.mubr.f32.mxu0 %v1472_v46 }
 0x1dd   : > { %v1475_v7 = vmax.f32 %v1209_v47, 0.0  ;;  %3481 = vmatmul.mubr.f32.gmra.mrb[42].mxu0 %v1473_v63 }
 0x1de   : > { %v1474_v52 = vmax.f32 %v1204_v49, 0.0  ;;  %v3360_v19 = vpop.f32.mrb[46].mxu1 }
 0x1df   : > { %v1219_v56 = vadd.f32 %v3360_v19, %v4236_v8  ;;  %v1213_v17 = vpop.f32.mrb[47].mxu1 }
 0x1e0   : > { %v1214_v57 = vadd.f32 %v4236_v8, %v1213_v17  ;;  %3483 = vmatprep.mubr.f32.mxu0 %v1474_v52 }
 0x1e1   : > { %v1477_v30 = vmax.f32 %v1219_v56, 0.0  ;;  %3484 = vmatmul.mubr.f32.gmra.mrb[44].mxu0 %v1475_v7 }
 0x1e2   : > { %v1476_v58 = vmax.f32 %v1214_v57, 0.0  ;;  %v3363_v28 = vpop.f32.mrb[48].mxu1 }
 0x1e3   : > { %v1229_v59 = vadd.f32 %v3363_v28, %v4236_v8  ;;  %v1223_v40 = vpop.f32.mrb[49].mxu1 }
 0x1e4   : > { %v1224_v60 = vadd.f32 %v4236_v8, %v1223_v40  ;;  %3486 = vmatprep.mubr.f32.mxu0 %v1476_v58 }
 0x1e5   : > { %v1479_v38 = vmax.f32 %v1229_v59, 0.0  ;;  %3487 = vmatmul.mubr.f32.gmra.mrb[46].mxu0 %v1477_v30 }
 0x1e6   : > { %v1478_v1 = vmax.f32 %v1224_v60, 0.0  ;;  %v3366_v50 = vpop.f32.mrb[50].mxu1 }
 0x1e7   : > { %v1239_v3 = vadd.f32 %v3366_v50, %v4236_v8  ;;  %v1233_v48 = vpop.f32.mrb[51].mxu1 }
 0x1e8   : > { %v1234_v5 = vadd.f32 %v4236_v8, %v1233_v48  ;;  %3489 = vmatprep.mubr.f32.mxu0 %v1478_v1 }
 0x1e9   : > { %v1481_v4 = vmax.f32 %v1239_v3, 0.0  ;;  %3490 = vmatmul.mubr.f32.gmra.mrb[48].mxu0 %v1479_v38 }
 0x1ea   : > { %v1480_v6 = vmax.f32 %v1234_v5, 0.0  ;;  %v3369_v62 = vpop.f32.mrb[52].mxu1 }
 0x1eb   : > { %v1249_v55 = vadd.f32 %v3369_v62, %v4236_v8  ;;  %v1243_v10 = vpop.f32.mrb[53].mxu1 }
 0x1ec   : > { %v1244_v12 = vadd.f32 %v4236_v8, %v1243_v10  ;;  %3492 = vmatprep.mubr.f32.mxu0 %v1480_v6 }
 0x1ed   : > { %v1483_v14 = vmax.f32 %v1249_v55, 0.0  ;;  %3493 = vmatmul.mubr.f32.gmra.mrb[50].mxu0 %v1481_v4 }
 0x1ee   : > { %v1482_v15 = vmax.f32 %v1244_v12, 0.0  ;;  %v3372_v53 = vpop.f32.mrb[54].mxu1 }
 0x1ef   : > { %v1259_v18 = vadd.f32 %v3372_v53, %v4236_v8  ;;  %v1253_v2 = vpop.f32.mrb[55].mxu1 }
 0x1f0   : > { %v1254_v25 = vadd.f32 %v4236_v8, %v1253_v2  ;;  %3495 = vmatprep.mubr.f32.mxu0 %v1482_v15 }
 0x1f1   : > { %v1485_v16 = vmax.f32 %v1259_v18, 0.0  ;;  %3496 = vmatmul.mubr.f32.gmra.mrb[52].mxu0 %v1483_v14 }
 0x1f2   : > { %v1484_v20 = vmax.f32 %v1254_v25, 0.0  ;;  %v3375_v21 = vpop.f32.mrb[56].mxu1 }
 0x1f3   : > { %v1269_v0 = vadd.f32 %v3375_v21, %v4236_v8  ;;  %v1263_v23 = vpop.f32.mrb[57].mxu1 }
 0x1f4   : > { %v1264_v26 = vadd.f32 %v4236_v8, %v1263_v23  ;;  %3498 = vmatprep.mubr.f32.mxu0 %v1484_v20 }
 0x1f5   : > { %v1487_v13 = vmax.f32 %v1269_v0, 0.0  ;;  %3499 = vmatmul.mubr.f32.gmra.mrb[54].mxu0 %v1485_v16 }
 0x1f6   : > { %v1486_v27 = vmax.f32 %v1264_v26, 0.0  ;;  %v3378_v29 = vpop.f32.mrb[58].mxu1 }
 0x1f7   : > { %v1279_v11 = vadd.f32 %v3378_v29, %v4236_v8  ;;  %v1273_v31 = vpop.f32.mrb[59].mxu1 }
 0x1f8   : > { %v1274_v24 = vadd.f32 %v4236_v8, %v1273_v31  ;;  %3501 = vmatprep.mubr.f32.mxu0 %v1486_v27 }
 0x1f9   : > { %v1489_v32 = vmax.f32 %v1279_v11, 0.0  ;;  %3502 = vmatmul.mubr.f32.gmra.mrb[56].mxu0 %v1487_v13 }
 0x1fa   : > { %v1488_v22 = vmax.f32 %v1274_v24, 0.0  ;;  %v3381_v33 = vpop.f32.mrb[60].mxu1 }
 0x1fb   : > { %v1289_v36 = vadd.f32 %v3381_v33, %v4236_v8  ;;  %v1283_v35 = vpop.f32.mrb[61].mxu1 }
 0x1fc   : > { %v1284_v34 = vadd.f32 %v4236_v8, %v1283_v35  ;;  %3504 = vmatprep.mubr.f32.mxu0 %v1488_v22 }
 0x1fd   : > { %v1491_v37 = vmax.f32 %v1289_v36, 0.0  ;;  %3505 = vmatmul.mubr.f32.gmra.mrb[58].mxu0 %v1489_v32 }
 0x1fe   : > { %v1490_v45 = vmax.f32 %v1284_v34, 0.0  ;;  %v3384_v39 = vpop.f32.mrb[62].mxu1 }
 0x1ff   : > { %v1299_v43 = vadd.f32 %v3384_v39, %v4236_v8  ;;  %v1293_v41 = vpop.f32.mrb[63].mxu1 }
 0x200   : > { %v1294_v54 = vadd.f32 %v4236_v8, %v1293_v41  ;;  %3507 = vmatprep.mubr.f32.mxu0 %v1490_v45 }
 0x201   : > { %v1493_v42 = vmax.f32 %v1299_v43, 0.0  ;;  %3508 = vmatmul.mubr.f32.gmra.mrb[60].mxu0 %v1491_v37 }
 0x202   : > { %v1492_v51 = vmax.f32 %v1294_v54, 0.0  ;;  %v3387_v44 = vpop.f32.mrb[64].mxu1 }
 0x203   : > { %v1309_v63 = vadd.f32 %v3387_v44, %v4236_v8  ;;  %v1303_v46 = vpop.f32.mrb[65].mxu1 }
 0x204   : > { %v1304_v61 = vadd.f32 %v4236_v8, %v1303_v46  ;;  %3510 = vmatprep.mubr.f32.mxu0 %v1492_v51 }
 0x205   : > { %v1495_v47 = vmax.f32 %v1309_v63, 0.0  ;;  %3511 = vmatmul.mubr.f32.gmra.mrb[62].mxu0 %v1493_v42 }
 0x206   : > { %v1494_v9 = vmax.f32 %v1304_v61, 0.0  ;;  %v3390_v49 = vpop.f32.mrb[66].mxu1 }
 0x207   : > { %v1319_v7 = vadd.f32 %v3390_v49, %v4236_v8  ;;  %v1313_v52 = vpop.f32.mrb[67].mxu1 }
 0x208   : > { %v1314_v19 = vadd.f32 %v4236_v8, %v1313_v52  ;;  %3513 = vmatprep.mubr.f32.mxu0 %v1494_v9 }
 0x209   : > { %v1497_v56 = vmax.f32 %v1319_v7, 0.0  ;;  %3514 = vmatmul.mubr.f32.gmra.mrb[64].mxu0 %v1495_v47 }
 0x20a   : > { %v1496_v17 = vmax.f32 %v1314_v19, 0.0  ;;  %v3393_v57 = vpop.f32.mrb[68].mxu1 }
 0x20b   : > { %v1329_v30 = vadd.f32 %v3393_v57, %v4236_v8  ;;  %v1323_v58 = vpop.f32.mrb[69].mxu1 }
 0x20c   : > { %v1324_v28 = vadd.f32 %v4236_v8, %v1323_v58  ;;  %3516 = vmatprep.mubr.f32.mxu0 %v1496_v17 }
 0x20d   : > { %v1499_v59 = vmax.f32 %v1329_v30, 0.0  ;;  %3517 = vmatmul.mubr.f32.gmra.mrb[66].mxu0 %v1497_v56 }
 0x20e   : > { %v1498_v40 = vmax.f32 %v1324_v28, 0.0  ;;  %v3396_v60 = vpop.f32.mrb[70].mxu1 }
 0x20f   : > { %v1339_v38 = vadd.f32 %v3396_v60, %v4236_v8  ;;  %v1333_v1 = vpop.f32.mrb[71].mxu1 }
 0x210   : > { %v1334_v50 = vadd.f32 %v4236_v8, %v1333_v1  ;;  %3519 = vmatprep.mubr.f32.mxu0 %v1498_v40 }
 0x211   : > { %v1501_v3 = vmax.f32 %v1339_v38, 0.0  ;;  %3520 = vmatmul.mubr.f32.gmra.mrb[68].mxu0 %v1499_v59 }
 0x212   : > { %v1500_v48 = vmax.f32 %v1334_v50, 0.0  ;;  %v3399_v5 = vpop.f32.mrb[72].mxu1 }
 0x213   : > { %v1349_v4 = vadd.f32 %v3399_v5, %v4236_v8  ;;  %v1343_v6 = vpop.f32.mrb[73].mxu1 }
 0x214   : > { %v1344_v62 = vadd.f32 %v4236_v8, %v1343_v6  ;;  %3522 = vmatprep.mubr.f32.mxu0 %v1500_v48 }
 0x215   : > { %v1503_v55 = vmax.f32 %v1349_v4, 0.0  ;;  %3523 = vmatmul.mubr.f32.gmra.mrb[70].mxu0 %v1501_v3 }
 0x216   : > { %v1502_v10 = vmax.f32 %v1344_v62, 0.0  ;;  %v3402_v12 = vpop.f32.mrb[74].mxu1 }
 0x217   : > { %v1359_v14 = vadd.f32 %v3402_v12, %v4236_v8  ;;  %v1353_v15 = vpop.f32.mrb[75].mxu1 }
 0x218   : > { %v1354_v53 = vadd.f32 %v4236_v8, %v1353_v15  ;;  %3525 = vmatprep.mubr.f32.mxu0 %v1502_v10 }
 0x219   : > { %v1505_v18 = vmax.f32 %v1359_v14, 0.0  ;;  %3526 = vmatmul.mubr.f32.gmra.mrb[72].mxu0 %v1503_v55 }
 0x21a   : > { %v1504_v2 = vmax.f32 %v1354_v53, 0.0  ;;  %v3405_v25 = vpop.f32.mrb[76].mxu1  ;;  %v4305_v53 = vld [vmem:[%s5155_s6] ss:$0 sm:$0xff] }
 0x21b   : > { %v1369_v16 = vadd.f32 %v3405_v25, %v4236_v8  ;;  %v1363_v20 = vpop.f32.mrb[77].mxu1 }
 0x21c   : > { %v1364_v21 = vadd.f32 %v4236_v8, %v1363_v20  ;;  %3528 = vmatprep.mubr.f32.mxu0 %v1504_v2 }
 0x21d   : > { %v1507_v0 = vmax.f32 %v1369_v16, 0.0  ;;  %3529 = vmatmul.mubr.f32.gmra.mrb[74].mxu0 %v1505_v18 }
 0x21e   : > { %v1506_v23 = vmax.f32 %v1364_v21, 0.0  ;;  %v3408_v26 = vpop.f32.mrb[78].mxu1 }
 0x21f   : > { %v1379_v13 = vadd.f32 %v3408_v26, %v4236_v8  ;;  %v1373_v27 = vpop.f32.mrb[79].mxu1 }
 0x220   : > { %v1374_v29 = vadd.f32 %v4236_v8, %v1373_v27  ;;  %3531 = vmatprep.mubr.f32.mxu0 %v1506_v23 }
 0x221   : > { %v1509_v11 = vmax.f32 %v1379_v13, 0.0  ;;  %3532 = vmatmul.mubr.f32.gmra.mrb[76].mxu0 %v1507_v0 }
 0x222   : > { %v1508_v31 = vmax.f32 %v1374_v29, 0.0  ;;  %v3411_v24 = vpop.f32.mrb[80].mxu1 }
 0x223   : > { %v1389_v32 = vadd.f32 %v3411_v24, %v4236_v8  ;;  %v1383_v22 = vpop.f32.mrb[81].mxu1 }
 0x224   : > { %v1384_v33 = vadd.f32 %v4236_v8, %v1383_v22  ;;  %3534 = vmatprep.mubr.f32.mxu0 %v1508_v31 }
 0x225   : > { %v1511_v36 = vmax.f32 %v1389_v32, 0.0  ;;  %3535 = vmatmul.mubr.f32.gmra.mrb[78].mxu0 %v1509_v11 }
 0x226   : > { %v1510_v35 = vmax.f32 %v1384_v33, 0.0  ;;  %v3414_v34 = vpop.f32.mrb[82].mxu1 }
 0x227   : > { %v1399_v37 = vadd.f32 %v3414_v34, %v4236_v8  ;;  %v1393_v45 = vpop.f32.mrb[83].mxu1 }
 0x228   : > { %v1394_v39 = vadd.f32 %v4236_v8, %v1393_v45  ;;  %3537 = vmatprep.mubr.f32.mxu0 %v1510_v35 }
 0x229   : > { %v1513_v43 = vmax.f32 %v1399_v37, 0.0  ;;  %3538 = vmatmul.mubr.f32.gmra.mrb[80].mxu0 %v1511_v36 }
 0x22a   : > { %v1512_v41 = vmax.f32 %v1394_v39, 0.0  ;;  %v3417_v54 = vpop.f32.mrb[84].mxu1 }
 0x22b   : > { %v1409_v42 = vadd.f32 %v3417_v54, %v4236_v8  ;;  %v1403_v51 = vpop.f32.mrb[85].mxu1 }
 0x22c   : > { %v1404_v44 = vadd.f32 %v4236_v8, %v1403_v51  ;;  %3540 = vmatprep.mubr.f32.mxu0 %v1512_v41 }
 0x22d   : > { %v1515_v63 = vmax.f32 %v1409_v42, 0.0  ;;  %3541 = vmatmul.mubr.f32.gmra.mrb[82].mxu0 %v1513_v43 }
 0x22e   : > { %v1514_v46 = vmax.f32 %v1404_v44, 0.0  ;;  %v3420_v61 = vpop.f32.mrb[86].mxu1 }
 0x22f   : > { %v1419_v47 = vadd.f32 %v3420_v61, %v4236_v8  ;;  %v1413_v9 = vpop.f32.mrb[87].mxu1 }
 0x230   : > { %v1414_v49 = vadd.f32 %v4236_v8, %v1413_v9  ;;  %3543 = vmatprep.mubr.f32.mxu0 %v1514_v46 }
 0x231   : > { %v1517_v7 = vmax.f32 %v1419_v47, 0.0  ;;  %3544 = vmatmul.mubr.f32.gmra.mrb[84].mxu0 %v1515_v63 }
 0x232   : > { %v1516_v52 = vmax.f32 %v1414_v49, 0.0  ;;  %v3423_v19 = vpop.f32.mrb[88].mxu1 }
 0x233   : > { %v1429_v56 = vadd.f32 %v3423_v19, %v4236_v8  ;;  %v1423_v17 = vpop.f32.mrb[89].mxu1 }
 0x234   : > { %v1424_v57 = vadd.f32 %v4236_v8, %v1423_v17  ;;  %3546 = vmatprep.mubr.f32.mxu0 %v1516_v52 }
 0x235   : > { %v1519_v30 = vmax.f32 %v1429_v56, 0.0  ;;  %3547 = vmatmul.mubr.f32.gmra.mrb[86].mxu0 %v1517_v7 }
 0x236   : > { %v1518_v58 = vmax.f32 %v1424_v57, 0.0  ;;  %v3426_v28 = vpop.f32.mrb[90].mxu1 }
 0x237   : > { %v1439_v59 = vadd.f32 %v3426_v28, %v4236_v8  ;;  %v1433_v40 = vpop.f32.mrb[91].mxu1 }
 0x238   : > { %v1434_v60 = vadd.f32 %v4236_v8, %v1433_v40  ;;  %3549 = vmatprep.mubr.f32.mxu0 %v1518_v58 }
 0x239   : > { %v1521_v38 = vmax.f32 %v1439_v59, 0.0  ;;  %3550 = vmatmul.mubr.f32.gmra.mrb[88].mxu0 %v1519_v30 }
 0x23a   : > { %v1520_v1 = vmax.f32 %v1434_v60, 0.0  ;;  %v3429_v50 = vpop.f32.mrb[92].mxu1 }
 0x23b   : > { %v1449_v3 = vadd.f32 %v3429_v50, %v4236_v8  ;;  %v1443_v48 = vpop.f32.mrb[93].mxu1 }
 0x23c   : > { %v1444_v5 = vadd.f32 %v4236_v8, %v1443_v48  ;;  %3552 = vmatprep.mubr.f32.mxu0 %v1520_v1 }
 0x23d   : > { %v1523_v4 = vmax.f32 %v1449_v3, 0.0  ;;  %3553 = vmatmul.mubr.f32.gmra.mrb[90].mxu0 %v1521_v38 }
 0x23e   : > { %v1522_v6 = vmax.f32 %v1444_v5, 0.0  ;;  %v3432_v62 = vpop.f32.mrb[94].mxu1 }
 0x23f   : > { %v1459_v55 = vadd.f32 %v3432_v62, %v4236_v8  ;;  %v1453_v10 = vpop.f32.mrb[95].mxu1 }
 0x240   : > { %v1454_v12 = vadd.f32 %v4236_v8, %v1453_v10  ;;  %3555 = vmatprep.mubr.f32.mxu0 %v1522_v6 }
 0x241   : > { %v1525_v14 = vmax.f32 %v1459_v55, 0.0  ;;  %3556 = vmatmul.mubr.f32.gmra.mrb[92].mxu0 %v1523_v4 }
 0x242   : > { %v1524_v15 = vmax.f32 %v1454_v12, 0.0 }
 0x244   : > { %3558 = vmatprep.mubr.f32.mxu0 %v1524_v15 }
 0x245   : > { %3559 = vmatmul.mubr.f32.gmra.mrb[94].mxu0 %v1525_v14 }
 0x29c   : > { %v3467_v18 = vpop.f32.mrb[32].mxu0 }
 0x29d   : > { %v4308_v2 = vadd.f32 %v3467_v18, %v4305_v53  ;;  %v1615_v25 = vpop.f32.mrb[33].mxu0 }
 0x29e   : > { %v4312_v8 = vadd.f32 %v4305_v53, %v1615_v25 }
 0x29f   : > { %1936 = vadd.xlane.f32.xlu0 %v4308_v2 }
 0x2a0   : > { %v3470_v16 = vpop.f32.mrb[34].mxu0 }
 0x2a1   : > { %v4315_v20 = vadd.f32 %v3470_v16, %v4305_v53  ;;  %v1625_v21 = vpop.f32.mrb[35].mxu0 }
 0x2a2   : > { %v4320_v23 = vadd.f32 %v4305_v53, %v1625_v21 }
 0x2a3   : > { %1940 = vadd.xlane.f32.xlu1 %v4315_v20  ;;  %1934 = vadd.xlane.f32.xlu0 %v4312_v8 }
 0x2a4   : > { %v3473_v0 = vpop.f32.mrb[36].mxu0 }
 0x2a5   : > { %v1635_v26 = vpop.f32.mrb[37].mxu0  ;;  %v4328_v29 = vadd.f32 %v3473_v0, %v4305_v53 }
 0x2a6   : > { %v4323_v13 = vadd.f32 %v4305_v53, %v1635_v26 }
 0x2a7   : > { %1938 = vadd.xlane.f32.xlu1 %v4320_v23 }
 0x2a8   : > { %v3476_v27 = vpop.f32.mrb[38].mxu0  ;;  %1942 = vadd.xlane.f32.xlu0 %v4323_v13 }
 0x2a9   : > { %v1645_v11 = vpop.f32.mrb[39].mxu0  ;;  %v4336_v32 = vadd.f32 %v3476_v27, %v4305_v53 }
 0x2aa   : > { %v4331_v31 = vadd.f32 %v4305_v53, %v1645_v11 }
 0x2ab   : > { %1944 = vadd.xlane.f32.xlu1 %v4328_v29 }
 0x2ac   : > { %v3479_v24 = vpop.f32.mrb[40].mxu0  ;;  %1946 = vadd.xlane.f32.xlu0 %v4331_v31 }
 0x2ad   : > { %v1655_v22 = vpop.f32.mrb[41].mxu0  ;;  %v4344_v35 = vadd.f32 %v3479_v24, %v4305_v53 }
 0x2ae   : > { %v4339_v33 = vadd.f32 %v4305_v53, %v1655_v22 }
 0x2af   : > { %1948 = vadd.xlane.f32.xlu1 %v4336_v32 }
 0x2b0   : > { %v3482_v36 = vpop.f32.mrb[42].mxu0  ;;  %1950 = vadd.xlane.f32.xlu0 %v4339_v33 }
 0x2b1   : > { %v1665_v34 = vpop.f32.mrb[43].mxu0  ;;  %v4352_v39 = vadd.f32 %v3482_v36, %v4305_v53 }
 0x2b2   : > { %v4347_v37 = vadd.f32 %v4305_v53, %v1665_v34 }
 0x2b3   : > { %1952 = vadd.xlane.f32.xlu1 %v4344_v35 }
 0x2b4   : > { %v3485_v45 = vpop.f32.mrb[44].mxu0  ;;  %1954 = vadd.xlane.f32.xlu0 %v4347_v37 }
 0x2b5   : > { %v1675_v43 = vpop.f32.mrb[45].mxu0  ;;  %v4360_v42 = vadd.f32 %v3485_v45, %v4305_v53 }
 0x2b6   : > { %v4355_v41 = vadd.f32 %v4305_v53, %v1675_v43 }
 0x2b7   : > { %1956 = vadd.xlane.f32.xlu1 %v4352_v39 }
 0x2b8   : > { %v3488_v54 = vpop.f32.mrb[46].mxu0  ;;  %1958 = vadd.xlane.f32.xlu0 %v4355_v41 }
 0x2b9   : > { %v1685_v51 = vpop.f32.mrb[47].mxu0  ;;  %v4368_v46 = vadd.f32 %v3488_v54, %v4305_v53 }
 0x2ba   : > { %v4363_v44 = vadd.f32 %v4305_v53, %v1685_v51 }
 0x2bb   : > { %1960 = vadd.xlane.f32.xlu1 %v4360_v42 }
 0x2bc   : > { %v3491_v63 = vpop.f32.mrb[48].mxu0  ;;  %1962 = vadd.xlane.f32.xlu0 %v4363_v44 }
 0x2bd   : > { %v1695_v61 = vpop.f32.mrb[49].mxu0  ;;  %v4376_v49 = vadd.f32 %v3491_v63, %v4305_v53 }
 0x2be   : > { %v4371_v47 = vadd.f32 %v4305_v53, %v1695_v61 }
 0x2bf   : > { %1964 = vadd.xlane.f32.xlu1 %v4368_v46 }
 0x2c0   : > { %v3494_v9 = vpop.f32.mrb[50].mxu0  ;;  %1966 = vadd.xlane.f32.xlu0 %v4371_v47 }
 0x2c1   : > { %v1705_v7 = vpop.f32.mrb[51].mxu0  ;;  %v4384_v56 = vadd.f32 %v3494_v9, %v4305_v53 }
 0x2c2   : > { %v4379_v52 = vadd.f32 %v4305_v53, %v1705_v7 }
 0x2c3   : > { %1968 = vadd.xlane.f32.xlu1 %v4376_v49 }
 0x2c4   : > { %v3497_v19 = vpop.f32.mrb[52].mxu0  ;;  %1970 = vadd.xlane.f32.xlu0 %v4379_v52 }
 0x2c5   : > { %v1715_v17 = vpop.f32.mrb[53].mxu0  ;;  %v4392_v58 = vadd.f32 %v3497_v19, %v4305_v53 }
 0x2c6   : > { %v4387_v57 = vadd.f32 %v4305_v53, %v1715_v17 }
 0x2c7   : > { %1972 = vadd.xlane.f32.xlu1 %v4384_v56 }
 0x2c8   : > { %v3500_v30 = vpop.f32.mrb[54].mxu0  ;;  %1974 = vadd.xlane.f32.xlu0 %v4387_v57 }
 0x2c9   : > { %v1725_v28 = vpop.f32.mrb[55].mxu0  ;;  %v4400_v60 = vadd.f32 %v3500_v30, %v4305_v53 }
 0x2ca   : > { %v4395_v59 = vadd.f32 %v4305_v53, %v1725_v28 }
 0x2cb   : > { %1976 = vadd.xlane.f32.xlu1 %v4392_v58 }
 0x2cc   : > { %v3503_v40 = vpop.f32.mrb[56].mxu0  ;;  %1978 = vadd.xlane.f32.xlu0 %v4395_v59 }
 0x2cd   : > { %v1735_v38 = vpop.f32.mrb[57].mxu0  ;;  %v4408_v3 = vadd.f32 %v3503_v40, %v4305_v53 }
 0x2ce   : > { %v4403_v1 = vadd.f32 %v4305_v53, %v1735_v38 }
 0x2cf   : > { %1980 = vadd.xlane.f32.xlu1 %v4400_v60 }
 0x2d0   : > { %v3506_v50 = vpop.f32.mrb[58].mxu0  ;;  %1982 = vadd.xlane.f32.xlu0 %v4403_v1 }
 0x2d1   : > { %v1745_v48 = vpop.f32.mrb[59].mxu0  ;;  %v4416_v6 = vadd.f32 %v3506_v50, %v4305_v53 }
 0x2d2   : > { %v4411_v5 = vadd.f32 %v4305_v53, %v1745_v48 }
 0x2d3   : > { %1984 = vadd.xlane.f32.xlu1 %v4408_v3 }
 0x2d4   : > { %v3509_v4 = vpop.f32.mrb[60].mxu0  ;;  %1986 = vadd.xlane.f32.xlu0 %v4411_v5 }
 0x2d5   : > { %v1755_v62 = vpop.f32.mrb[61].mxu0  ;;  %v4424_v12 = vadd.f32 %v3509_v4, %v4305_v53 }
 0x2d6   : > { %v4419_v55 = vadd.f32 %v4305_v53, %v1755_v62 }
 0x2d7   : > { %1988 = vadd.xlane.f32.xlu1 %v4416_v6 }
 0x2d8   : > { %v3512_v10 = vpop.f32.mrb[62].mxu0  ;;  %1990 = vadd.xlane.f32.xlu0 %v4419_v55 }
 0x2d9   : > { %v1765_v14 = vpop.f32.mrb[63].mxu0  ;;  %v4432_v25 = vadd.f32 %v3512_v10, %v4305_v53 }
 0x2da   : > { %v4427_v15 = vadd.f32 %v4305_v53, %v1765_v14 }
 0x2db   : > { %1992 = vadd.xlane.f32.xlu1 %v4424_v12 }
 0x2dc   : > { %v3515_v18 = vpop.f32.mrb[64].mxu0  ;;  %1994 = vadd.xlane.f32.xlu0 %v4427_v15 }
 0x2dd   : > { %v1775_v16 = vpop.f32.mrb[65].mxu0  ;;  %v4440_v26 = vadd.f32 %v3515_v18, %v4305_v53 }
 0x2de   : > { %v4435_v21 = vadd.f32 %v4305_v53, %v1775_v16 }
 0x2df   : > { %1996 = vadd.xlane.f32.xlu1 %v4432_v25 }
 0x2e0   : > { %v3518_v0 = vpop.f32.mrb[66].mxu0  ;;  %1998 = vadd.xlane.f32.xlu0 %v4435_v21 }
 0x2e1   : > { %v1785_v27 = vpop.f32.mrb[67].mxu0  ;;  %v4448_v22 = vadd.f32 %v3518_v0, %v4305_v53 }
 0x2e2   : > { %v4443_v11 = vadd.f32 %v4305_v53, %v1785_v27 }
 0x2e3   : > { %2000 = vadd.xlane.f32.xlu1 %v4440_v26 }
 0x2e4   : > { %v3521_v24 = vpop.f32.mrb[68].mxu0  ;;  %2002 = vadd.xlane.f32.xlu0 %v4443_v11 }
 0x2e5   : > { %v1795_v36 = vpop.f32.mrb[69].mxu0  ;;  %v4456_v43 = vadd.f32 %v3521_v24, %v4305_v53 }
 0x2e6   : > { %v4451_v34 = vadd.f32 %v4305_v53, %v1795_v36 }
 0x2e7   : > { %2004 = vadd.xlane.f32.xlu1 %v4448_v22 }
 0x2e8   : > { %v3524_v45 = vpop.f32.mrb[70].mxu0  ;;  %2006 = vadd.xlane.f32.xlu0 %v4451_v34 }
 0x2e9   : > { %v1805_v54 = vpop.f32.mrb[71].mxu0  ;;  %v4464_v61 = vadd.f32 %v3524_v45, %v4305_v53 }
 0x2ea   : > { %v4459_v51 = vadd.f32 %v4305_v53, %v1805_v54 }
 0x2eb   : > { %2008 = vadd.xlane.f32.xlu1 %v4456_v43 }
 0x2ec   : > { %v3527_v63 = vpop.f32.mrb[72].mxu0  ;;  %2010 = vadd.xlane.f32.xlu0 %v4459_v51 }
 0x2ed   : > { %v1815_v9 = vpop.f32.mrb[73].mxu0  ;;  %v4472_v17 = vadd.f32 %v3527_v63, %v4305_v53 }
 0x2ee   : > { %v4467_v7 = vadd.f32 %v4305_v53, %v1815_v9 }
 0x2ef   : > { %2012 = vadd.xlane.f32.xlu1 %v4464_v61 }
 0x2f0   : > { %v3530_v19 = vpop.f32.mrb[74].mxu0  ;;  %2014 = vadd.xlane.f32.xlu0 %v4467_v7 }
 0x2f1   : > { %v1825_v30 = vpop.f32.mrb[75].mxu0  ;;  %v4480_v38 = vadd.f32 %v3530_v19, %v4305_v53 }
 0x2f2   : > { %v4475_v28 = vadd.f32 %v4305_v53, %v1825_v30 }
 0x2f3   : > { %2016 = vadd.xlane.f32.xlu1 %v4472_v17 }
 0x2f4   : > { %v3533_v40 = vpop.f32.mrb[76].mxu0  ;;  %2018 = vadd.xlane.f32.xlu0 %v4475_v28 }
 0x2f5   : > { %v1835_v50 = vpop.f32.mrb[77].mxu0  ;;  %v4488_v62 = vadd.f32 %v3533_v40, %v4305_v53 }
 0x2f6   : > { %v4483_v48 = vadd.f32 %v4305_v53, %v1835_v50 }
 0x2f7   : > { %2020 = vadd.xlane.f32.xlu1 %v4480_v38 }
 0x2f8   : > { %v3536_v4 = vpop.f32.mrb[78].mxu0  ;;  %2022 = vadd.xlane.f32.xlu0 %v4483_v48 }
 0x2f9   : > { %v1845_v10 = vpop.f32.mrb[79].mxu0  ;;  %v4496_v16 = vadd.f32 %v3536_v4, %v4305_v53 }
 0x2fa   : > { %v4491_v14 = vadd.f32 %v4305_v53, %v1845_v10 }
 0x2fb   : > { %2024 = vadd.xlane.f32.xlu1 %v4488_v62 }
 0x2fc   : > { %v3539_v18 = vpop.f32.mrb[80].mxu0  ;;  %2026 = vadd.xlane.f32.xlu0 %v4491_v14 }
 0x2fd   : > { %v1855_v0 = vpop.f32.mrb[81].mxu0  ;;  %v4504_v36 = vadd.f32 %v3539_v18, %v4305_v53 }
 0x2fe   : > { %v4499_v27 = vadd.f32 %v4305_v53, %v1855_v0 }
 0x2ff   : > { %2028 = vadd.xlane.f32.xlu1 %v4496_v16 }
 0x300   : > { %v3542_v24 = vpop.f32.mrb[82].mxu0  ;;  %2030 = vadd.xlane.f32.xlu0 %v4499_v27 }
 0x301   : > { %v1865_v45 = vpop.f32.mrb[83].mxu0  ;;  %v4512_v9 = vadd.f32 %v3542_v24, %v4305_v53 }
 0x302   : > { %v4507_v54 = vadd.f32 %v4305_v53, %v1865_v45 }
 0x303   : > { %2032 = vadd.xlane.f32.xlu1 %v4504_v36  ;;  %5191 = vst [vmem:[#allocation2_spill] sm:$0xff] %v4512_v9 }
 0x304   : > { %v3545_v63 = vpop.f32.mrb[84].mxu0  ;;  %2034 = vadd.xlane.f32.xlu0 %v4507_v54 }
 0x305   : > { %v1875_v19 = vpop.f32.mrb[85].mxu0  ;;  %v4520_v50 = vadd.f32 %v3545_v63, %v4305_v53 }
 0x306   : > { %v4515_v30 = vadd.f32 %v4305_v53, %v1875_v19 }
 0x307   : > { %2036 = vadd.xlane.f32.xlu1 %v4512_v9  ;;  %5193 = vst [vmem:[#allocation4_spill] sm:$0xff] %v4520_v50 }
 0x308   : > { %5192 = vst [vmem:[#allocation3_spill] sm:$0xff] %v4515_v30  ;;  %v3548_v40 = vpop.f32.mrb[86].mxu0  ;;  %2038 = vadd.xlane.f32.xlu0 %v4515_v30 }
 0x309   : > { %v1885_v4 = vpop.f32.mrb[87].mxu0  ;;  %v4528_v0 = vadd.f32 %v3548_v40, %v4305_v53 }
 0x30a   : > { %v4523_v10 = vadd.f32 %v4305_v53, %v1885_v4 }
 0x30b   : > { %2040 = vadd.xlane.f32.xlu1 %v4520_v50  ;;  %5195 = vst [vmem:[#allocation6_spill] sm:$0xff] %v4528_v0 }
 0x30c   : > { %5194 = vst [vmem:[#allocation5_spill] sm:$0xff] %v4523_v10  ;;  %v3551_v18 = vpop.f32.mrb[88].mxu0  ;;  %2042 = vadd.xlane.f32.xlu0 %v4523_v10 }
 0x30d   : > { %v1895_v24 = vpop.f32.mrb[89].mxu0  ;;  %v4536_v19 = vadd.f32 %v3551_v18, %v4305_v53 }
 0x30e   : > { %v4531_v45 = vadd.f32 %v4305_v53, %v1895_v24 }
 0x30f   : > { %2044 = vadd.xlane.f32.xlu1 %v4528_v0  ;;  %5197 = vst [vmem:[#allocation8_spill] sm:$0xff] %v4536_v19 }
 0x310   : > { %5196 = vst [vmem:[#allocation7_spill] sm:$0xff] %v4531_v45  ;;  %v3554_v63 = vpop.f32.mrb[90].mxu0  ;;  %2046 = vadd.xlane.f32.xlu0 %v4531_v45 }
 0x311   : > { %v1905_v4 = vpop.f32.mrb[91].mxu0  ;;  %v4544_v24 = vadd.f32 %v3554_v63, %v4305_v53 }
 0x312   : > { %v4539_v50 = vadd.f32 %v4305_v53, %v1905_v4 }
 0x313   : > { %2048 = vadd.xlane.f32.xlu1 %v4536_v19  ;;  %5199 = vst [vmem:[#allocation10_spill] sm:$0xff] %v4544_v24 }
 0x314   : > { %5198 = vst [vmem:[#allocation9_spill] sm:$0xff] %v4539_v50  ;;  %v3557_v40 = vpop.f32.mrb[92].mxu0  ;;  %2050 = vadd.xlane.f32.xlu0 %v4539_v50 }
 0x315   : > { %v1915_v10 = vpop.f32.mrb[93].mxu0  ;;  %v4552_v4 = vadd.f32 %v3557_v40, %v4305_v53 }
 0x316   : > { %v4547_v0 = vadd.f32 %v4305_v53, %v1915_v10 }
 0x317   : > { %2052 = vadd.xlane.f32.xlu1 %v4544_v24 }
 0x318   : > { %5200 = vst [vmem:[#allocation11_spill] sm:$0xff] %v4547_v0  ;;  %v3560_v18 = vpop.f32.mrb[94].mxu0  ;;  %2054 = vadd.xlane.f32.xlu0 %v4547_v0 }
 0x319   : > { %v1925_v45 = vpop.f32.mrb[95].mxu0  ;;  %v4560_v63 = vadd.f32 %v3560_v18, %v4305_v53 }
 0x31a   : > { %v4555_v19 = vadd.f32 %v4305_v53, %v1925_v45 }
 0x31b   : > { %2056 = vadd.xlane.f32.xlu1 %v4552_v4  ;;  %5202 = vst [vmem:[#allocation13_spill] sm:$0xff] %v4560_v63 }
 0x31c   : > { %5201 = vst [vmem:[#allocation12_spill] sm:$0xff] %v4555_v19  ;;  %2058 = vadd.xlane.f32.xlu0 %v4555_v19 }
 0x31f   : > { %2060 = vadd.xlane.f32.xlu1 %v4560_v63 }
 0x32c   : > { %v1937_v10 = vpop.xlane.xlu0 %1936 }
 0x32d   : > { %v2064_v24 = vmul.f32 0.0078125, %v1937_v10 }
 0x32f   : > { %v4564_v0 = vsub.f32 %v4308_v2, %v2064_v24 }
 0x330   : > { %v1941_v40 = vpop.xlane.xlu1 %1940  ;;  %v1935_v50 = vpop.xlane.xlu0 %1934 }
 0x331   : > { %v2066_v30 = vmul.f32 0.0078125, %v1941_v40  ;;  %v2063_v9 = vmul.f32 0.0078125, %v1935_v50  ;;  %v2192_v45 = vmul.f32 %v4564_v0, %v4564_v0 }
 0x333   : > { %2257 = vadd.xlane.f32.xlu1 %v2192_v45  ;;  %v4569_v19 = vsub.f32 %v4315_v20, %v2066_v30  ;;  %v4572_v53 = vsub.f32 %v4312_v8, %v2063_v9 }
 0x334   : > { %v1939_v18 = vpop.xlane.xlu1 %1938 }
 0x335   : > { %5203 = vst [vmem:[#allocation14_spill] sm:$0xff] %v4569_v19  ;;  %v2065_v63 = vmul.f32 0.0078125, %v1939_v18  ;;  %v1943_v10 = vpop.xlane.xlu0 %1942  ;;  %v2194_v2 = vmul.f32 %v4569_v19, %v4569_v19  ;;  %v2191_v24 = vmul.f32 %v4572_v53, %v4572_v53 }
 0x336   : > { %v2067_v50 = vmul.f32 0.0078125, %v1943_v10 }
 0x337   : > { %2261 = vadd.xlane.f32.xlu1 %v2194_v2  ;;  %2255 = vadd.xlane.f32.xlu0 %v2191_v24  ;;  %v4579_v40 = vsub.f32 %v4320_v23, %v2065_v63 }
 0x338   : > { %v1945_v20 = vpop.xlane.xlu1 %1944  ;;  %v4584_v9 = vsub.f32 %v4323_v13, %v2067_v50 }
 0x339   : > { %5204 = vst [vmem:[#allocation15_spill] sm:$0xff] %v4579_v40  ;;  %v2068_v30 = vmul.f32 0.0078125, %v1945_v20  ;;  %v1947_v45 = vpop.xlane.xlu0 %1946  ;;  %v2193_v8 = vmul.f32 %v4579_v40, %v4579_v40 }
 0x33a   : > { %v2069_v18 = vmul.f32 0.0078125, %v1947_v45  ;;  %v2195_v63 = vmul.f32 %v4584_v9, %v4584_v9 }
 0x33b   : > { %2259 = vadd.xlane.f32.xlu0 %v2193_v8  ;;  %v4587_v19 = vsub.f32 %v4328_v29, %v2068_v30 }
 0x33c   : > { %v1949_v10 = vpop.xlane.xlu1 %1948  ;;  %v4594_v20 = vsub.f32 %v4331_v31, %v2069_v18 }
 0x33d   : > { %v2070_v2 = vmul.f32 0.0078125, %v1949_v10  ;;  %v1951_v24 = vpop.xlane.xlu0 %1950  ;;  %v2196_v23 = vmul.f32 %v4587_v19, %v4587_v19 }
 0x33e   : > { %v2071_v40 = vmul.f32 0.0078125, %v1951_v24  ;;  %v2197_v8 = vmul.f32 %v4594_v20, %v4594_v20 }
 0x33f   : > { %2265 = vadd.xlane.f32.xlu1 %v2196_v23  ;;  %2263 = vadd.xlane.f32.xlu0 %v2195_v63  ;;  %v4597_v13 = vsub.f32 %v4336_v32, %v2070_v2 }
 0x340   : > { %v1953_v29 = vpop.xlane.xlu1 %1952  ;;  %v4604_v10 = vsub.f32 %v4339_v33, %v2071_v40 }
 0x341   : > { %v2072_v50 = vmul.f32 0.0078125, %v1953_v29  ;;  %v1955_v30 = vpop.xlane.xlu0 %1954  ;;  %v2198_v45 = vmul.f32 %v4597_v13, %v4597_v13 }
 0x342   : > { %v2073_v31 = vmul.f32 0.0078125, %v1955_v30  ;;  %v2199_v63 = vmul.f32 %v4604_v10, %v4604_v10 }
 0x343   : > { %2269 = vadd.xlane.f32.xlu1 %v2198_v45  ;;  %2267 = vadd.xlane.f32.xlu0 %v2197_v8  ;;  %v4607_v18 = vsub.f32 %v4344_v35, %v2072_v50 }
 0x344   : > { %v1957_v32 = vpop.xlane.xlu1 %1956  ;;  %v4614_v29 = vsub.f32 %v4347_v37, %v2073_v31 }
 0x345   : > { %v2074_v2 = vmul.f32 0.0078125, %v1957_v32  ;;  %v1959_v24 = vpop.xlane.xlu0 %1958  ;;  %v2200_v23 = vmul.f32 %v4607_v18, %v4607_v18 }
 0x346   : > { %v2075_v33 = vmul.f32 0.0078125, %v1959_v24  ;;  %v2201_v8 = vmul.f32 %v4614_v29, %v4614_v29 }
 0x347   : > { %2273 = vadd.xlane.f32.xlu1 %v2200_v23  ;;  %2271 = vadd.xlane.f32.xlu0 %v2199_v63  ;;  %v4617_v40 = vsub.f32 %v4352_v39, %v2074_v2 }
 0x348   : > { %v1961_v35 = vpop.xlane.xlu1 %1960  ;;  %v4624_v32 = vsub.f32 %v4355_v41, %v2075_v33 }
 0x349   : > { %v2076_v50 = vmul.f32 0.0078125, %v1961_v35  ;;  %v1963_v30 = vpop.xlane.xlu0 %1962  ;;  %v2202_v45 = vmul.f32 %v4617_v40, %v4617_v40 }
 0x34a   : > { %v2077_v37 = vmul.f32 0.0078125, %v1963_v30  ;;  %v2203_v63 = vmul.f32 %v4624_v32, %v4624_v32 }
 0x34b   : > { %2277 = vadd.xlane.f32.xlu1 %v2202_v45  ;;  %2275 = vadd.xlane.f32.xlu0 %v2201_v8  ;;  %v4627_v31 = vsub.f32 %v4360_v42, %v2076_v50 }
 0x34c   : > { %v1965_v39 = vpop.xlane.xlu1 %1964  ;;  %v4634_v35 = vsub.f32 %v4363_v44, %v2077_v37 }
 0x34d   : > { %v2078_v2 = vmul.f32 0.0078125, %v1965_v39  ;;  %v1967_v24 = vpop.xlane.xlu0 %1966  ;;  %v2204_v23 = vmul.f32 %v4627_v31, %v4627_v31 }
 0x34e   : > { %v2079_v41 = vmul.f32 0.0078125, %v1967_v24  ;;  %v2205_v8 = vmul.f32 %v4634_v35, %v4634_v35 }
 0x34f   : > { %2281 = vadd.xlane.f32.xlu1 %v2204_v23  ;;  %2279 = vadd.xlane.f32.xlu0 %v2203_v63  ;;  %v4637_v33 = vsub.f32 %v4368_v46, %v2078_v2 }
 0x350   : > { %v1969_v42 = vpop.xlane.xlu1 %1968  ;;  %v4644_v39 = vsub.f32 %v4371_v47, %v2079_v41 }
 0x351   : > { %v2080_v50 = vmul.f32 0.0078125, %v1969_v42  ;;  %v1971_v30 = vpop.xlane.xlu0 %1970  ;;  %v2206_v45 = vmul.f32 %v4637_v33, %v4637_v33 }
 0x352   : > { %v2081_v44 = vmul.f32 0.0078125, %v1971_v30  ;;  %v2207_v63 = vmul.f32 %v4644_v39, %v4644_v39 }
 0x353   : > { %2285 = vadd.xlane.f32.xlu1 %v2206_v45  ;;  %2283 = vadd.xlane.f32.xlu0 %v2205_v8  ;;  %v4647_v37 = vsub.f32 %v4376_v49, %v2080_v50 }
 0x354   : > { %v1973_v46 = vpop.xlane.xlu1 %1972  ;;  %v4654_v42 = vsub.f32 %v4379_v52, %v2081_v44 }
 0x355   : > { %v2082_v2 = vmul.f32 0.0078125, %v1973_v46  ;;  %v1975_v24 = vpop.xlane.xlu0 %1974  ;;  %v2208_v23 = vmul.f32 %v4647_v37, %v4647_v37 }
 0x356   : > { %v2083_v47 = vmul.f32 0.0078125, %v1975_v24  ;;  %v2209_v8 = vmul.f32 %v4654_v42, %v4654_v42 }
 0x357   : > { %2289 = vadd.xlane.f32.xlu1 %v2208_v23  ;;  %2287 = vadd.xlane.f32.xlu0 %v2207_v63  ;;  %v4657_v41 = vsub.f32 %v4384_v56, %v2082_v2 }
 0x358   : > { %v1977_v49 = vpop.xlane.xlu1 %1976  ;;  %v4664_v46 = vsub.f32 %v4387_v57, %v2083_v47 }
 0x359   : > { %v2084_v50 = vmul.f32 0.0078125, %v1977_v49  ;;  %v1979_v30 = vpop.xlane.xlu0 %1978  ;;  %v2210_v45 = vmul.f32 %v4657_v41, %v4657_v41 }
 0x35a   : > { %v2085_v52 = vmul.f32 0.0078125, %v1979_v30  ;;  %v2211_v63 = vmul.f32 %v4664_v46, %v4664_v46 }
 0x35b   : > { %2293 = vadd.xlane.f32.xlu1 %v2210_v45  ;;  %2291 = vadd.xlane.f32.xlu0 %v2209_v8  ;;  %v4667_v44 = vsub.f32 %v4392_v58, %v2084_v50 }
 0x35c   : > { %v1981_v56 = vpop.xlane.xlu1 %1980  ;;  %v4674_v49 = vsub.f32 %v4395_v59, %v2085_v52 }
 0x35d   : > { %v2086_v2 = vmul.f32 0.0078125, %v1981_v56  ;;  %v1983_v24 = vpop.xlane.xlu0 %1982  ;;  %v2212_v23 = vmul.f32 %v4667_v44, %v4667_v44 }
 0x35e   : > { %v2087_v57 = vmul.f32 0.0078125, %v1983_v24  ;;  %v2213_v8 = vmul.f32 %v4674_v49, %v4674_v49 }
 0x35f   : > { %2297 = vadd.xlane.f32.xlu1 %v2212_v23  ;;  %2295 = vadd.xlane.f32.xlu0 %v2211_v63  ;;  %v4677_v47 = vsub.f32 %v4400_v60, %v2086_v2 }
 0x360   : > { %v1985_v58 = vpop.xlane.xlu1 %1984  ;;  %v4684_v56 = vsub.f32 %v4403_v1, %v2087_v57 }
 0x361   : > { %v2088_v50 = vmul.f32 0.0078125, %v1985_v58  ;;  %v1987_v30 = vpop.xlane.xlu0 %1986  ;;  %v2214_v45 = vmul.f32 %v4677_v47, %v4677_v47 }
 0x362   : > { %v2089_v59 = vmul.f32 0.0078125, %v1987_v30  ;;  %v2215_v63 = vmul.f32 %v4684_v56, %v4684_v56 }
 0x363   : > { %2301 = vadd.xlane.f32.xlu1 %v2214_v45  ;;  %2299 = vadd.xlane.f32.xlu0 %v2213_v8  ;;  %v4687_v52 = vsub.f32 %v4408_v3, %v2088_v50 }
 0x364   : > { %v1989_v60 = vpop.xlane.xlu1 %1988  ;;  %v4694_v58 = vsub.f32 %v4411_v5, %v2089_v59 }
 0x365   : > { %v2090_v2 = vmul.f32 0.0078125, %v1989_v60  ;;  %v1991_v24 = vpop.xlane.xlu0 %1990  ;;  %v2216_v23 = vmul.f32 %v4687_v52, %v4687_v52 }
 0x366   : > { %v2091_v1 = vmul.f32 0.0078125, %v1991_v24  ;;  %v2217_v8 = vmul.f32 %v4694_v58, %v4694_v58 }
 0x367   : > { %2305 = vadd.xlane.f32.xlu1 %v2216_v23  ;;  %2303 = vadd.xlane.f32.xlu0 %v2215_v63  ;;  %v4697_v57 = vsub.f32 %v4416_v6, %v2090_v2 }
 0x368   : > { %v1993_v3 = vpop.xlane.xlu1 %1992  ;;  %v4704_v60 = vsub.f32 %v4419_v55, %v2091_v1 }
 0x369   : > { %v2092_v50 = vmul.f32 0.0078125, %v1993_v3  ;;  %v1995_v30 = vpop.xlane.xlu0 %1994  ;;  %v2218_v45 = vmul.f32 %v4697_v57, %v4697_v57 }
 0x36a   : > { %v2093_v5 = vmul.f32 0.0078125, %v1995_v30  ;;  %v2219_v3 = vmul.f32 %v4704_v60, %v4704_v60 }
 0x36b   : > { %2309 = vadd.xlane.f32.xlu1 %v2218_v45  ;;  %2307 = vadd.xlane.f32.xlu0 %v2217_v8  ;;  %v4707_v59 = vsub.f32 %v4424_v12, %v2092_v50 }
 0x36c   : > { %v1997_v6 = vpop.xlane.xlu1 %1996  ;;  %v4710_v2 = vsub.f32 %v4427_v15, %v2093_v5 }
 0x36d   : > { %v2094_v24 = vmul.f32 0.0078125, %v1997_v6  ;;  %v1999_v23 = vpop.xlane.xlu0 %1998  ;;  %v2220_v63 = vmul.f32 %v4707_v59, %v4707_v59 }
 0x36e   : > { %v2095_v55 = vmul.f32 0.0078125, %v1999_v23  ;;  %v2221_v8 = vmul.f32 %v4710_v2, %v4710_v2 }
 0x36f   : > { %v4717_v1 = vsub.f32 %v4432_v25, %v2094_v24  ;;  %2313 = vadd.xlane.f32.xlu1 %v2220_v63  ;;  %2311 = vadd.xlane.f32.xlu0 %v2219_v3 }
 0x370   : > { %v2001_v12 = vpop.xlane.xlu1 %2000  ;;  %v4720_v50 = vsub.f32 %v4435_v21, %v2095_v55 }
 0x371   : > { %v2096_v15 = vmul.f32 0.0078125, %v2001_v12  ;;  %v2003_v30 = vpop.xlane.xlu0 %2002  ;;  %v2222_v45 = vmul.f32 %v4717_v1, %v4717_v1 }
 0x372   : > { %v2097_v5 = vmul.f32 0.0078125, %v2003_v30  ;;  %v2223_v3 = vmul.f32 %v4720_v50, %v4720_v50 }
 0x373   : > { %v4727_v6 = vsub.f32 %v4440_v26, %v2096_v15  ;;  %2317 = vadd.xlane.f32.xlu1 %v2222_v45  ;;  %2315 = vadd.xlane.f32.xlu0 %v2221_v8 }
 0x374   : > { %v2005_v25 = vpop.xlane.xlu1 %2004  ;;  %v4730_v24 = vsub.f32 %v4443_v11, %v2097_v5 }
 0x375   : > { %v2098_v21 = vmul.f32 0.0078125, %v2005_v25  ;;  %v2007_v23 = vpop.xlane.xlu0 %2006  ;;  %v2224_v63 = vmul.f32 %v4727_v6, %v4727_v6 }
 0x376   : > { %v2099_v55 = vmul.f32 0.0078125, %v2007_v23  ;;  %v2225_v8 = vmul.f32 %v4730_v24, %v4730_v24 }
 0x377   : > { %v4737_v12 = vsub.f32 %v4448_v22, %v2098_v21  ;;  %2321 = vadd.xlane.f32.xlu1 %v2224_v63  ;;  %2319 = vadd.xlane.f32.xlu0 %v2223_v3 }
 0x378   : > { %v2009_v26 = vpop.xlane.xlu1 %2008  ;;  %v4740_v15 = vsub.f32 %v4451_v34, %v2099_v55 }
 0x379   : > { %v2100_v11 = vmul.f32 0.0078125, %v2009_v26  ;;  %v2011_v30 = vpop.xlane.xlu0 %2010  ;;  %v2226_v45 = vmul.f32 %v4737_v12, %v4737_v12 }
 0x37a   : > { %v2101_v5 = vmul.f32 0.0078125, %v2011_v30  ;;  %v2227_v3 = vmul.f32 %v4740_v15, %v4740_v15 }
 0x37b   : > { %v4747_v25 = vsub.f32 %v4456_v43, %v2100_v11  ;;  %2325 = vadd.xlane.f32.xlu1 %v2226_v45  ;;  %2323 = vadd.xlane.f32.xlu0 %v2225_v8 }
 0x37c   : > { %v2013_v22 = vpop.xlane.xlu1 %2012  ;;  %v4750_v21 = vsub.f32 %v4459_v51, %v2101_v5 }
 0x37d   : > { %v2102_v34 = vmul.f32 0.0078125, %v2013_v22  ;;  %v2015_v23 = vpop.xlane.xlu0 %2014  ;;  %v2228_v63 = vmul.f32 %v4747_v25, %v4747_v25 }
 0x37e   : > { %v2103_v55 = vmul.f32 0.0078125, %v2015_v23  ;;  %v2229_v8 = vmul.f32 %v4750_v21, %v4750_v21 }
 0x37f   : > { %v4757_v26 = vsub.f32 %v4464_v61, %v2102_v34  ;;  %2329 = vadd.xlane.f32.xlu1 %v2228_v63  ;;  %2327 = vadd.xlane.f32.xlu0 %v2227_v3 }
 0x380   : > { %v2017_v43 = vpop.xlane.xlu1 %2016  ;;  %v4760_v11 = vsub.f32 %v4467_v7, %v2103_v55 }
 0x381   : > { %v2104_v51 = vmul.f32 0.0078125, %v2017_v43  ;;  %v2019_v30 = vpop.xlane.xlu0 %2018  ;;  %v2230_v45 = vmul.f32 %v4757_v26, %v4757_v26 }
 0x382   : > { %v2105_v5 = vmul.f32 0.0078125, %v2019_v30  ;;  %v2231_v3 = vmul.f32 %v4760_v11, %v4760_v11 }
 0x383   : > { %v4767_v22 = vsub.f32 %v4472_v17, %v2104_v51  ;;  %2333 = vadd.xlane.f32.xlu1 %v2230_v45  ;;  %2331 = vadd.xlane.f32.xlu0 %v2229_v8 }
 0x384   : > { %v2021_v61 = vpop.xlane.xlu1 %2020  ;;  %v4770_v34 = vsub.f32 %v4475_v28, %v2105_v5 }
 0x385   : > { %v2106_v7 = vmul.f32 0.0078125, %v2021_v61  ;;  %v2023_v23 = vpop.xlane.xlu0 %2022  ;;  %v2232_v63 = vmul.f32 %v4767_v22, %v4767_v22 }
 0x386   : > { %v2107_v55 = vmul.f32 0.0078125, %v2023_v23  ;;  %v2233_v8 = vmul.f32 %v4770_v34, %v4770_v34 }
 0x387   : > { %v4777_v43 = vsub.f32 %v4480_v38, %v2106_v7  ;;  %2337 = vadd.xlane.f32.xlu1 %v2232_v63  ;;  %2335 = vadd.xlane.f32.xlu0 %v2231_v3 }
 0x388   : > { %v2025_v17 = vpop.xlane.xlu1 %2024  ;;  %v4780_v51 = vsub.f32 %v4483_v48, %v2107_v55 }
 0x389   : > { %v2108_v28 = vmul.f32 0.0078125, %v2025_v17  ;;  %v2027_v30 = vpop.xlane.xlu0 %2026  ;;  %v2234_v45 = vmul.f32 %v4777_v43, %v4777_v43 }
 0x38a   : > { %v2109_v5 = vmul.f32 0.0078125, %v2027_v30  ;;  %v2235_v3 = vmul.f32 %v4780_v51, %v4780_v51 }
 0x38b   : > { %v4787_v61 = vsub.f32 %v4488_v62, %v2108_v28  ;;  %2341 = vadd.xlane.f32.xlu1 %v2234_v45  ;;  %2339 = vadd.xlane.f32.xlu0 %v2233_v8 }
 0x38c   : > { %v2029_v38 = vpop.xlane.xlu1 %2028  ;;  %v4790_v7 = vsub.f32 %v4491_v14, %v2109_v5 }
 0x38d   : > { %v2110_v48 = vmul.f32 0.0078125, %v2029_v38  ;;  %v2031_v23 = vpop.xlane.xlu0 %2030  ;;  %v2236_v63 = vmul.f32 %v4787_v61, %v4787_v61 }
 0x38e   : > { %5205 = vst [vmem:[#allocation16_spill] sm:$0xff] %v4790_v7  ;;  %v2111_v55 = vmul.f32 0.0078125, %v2031_v23  ;;  %v2237_v8 = vmul.f32 %v4790_v7, %v4790_v7 }
 0x38f   : > { %v4797_v17 = vsub.f32 %v4496_v16, %v2110_v48  ;;  %2345 = vadd.xlane.f32.xlu1 %v2236_v63  ;;  %2343 = vadd.xlane.f32.xlu0 %v2235_v3 }
 0x390   : > { %v2033_v62 = vpop.xlane.xlu1 %2032  ;;  %v4800_v28 = vsub.f32 %v4499_v27, %v2111_v55 }
 0x391   : > { %5206 = vst [vmem:[#allocation17_spill] sm:$0xff] %v4797_v17  ;;  %v2112_v14 = vmul.f32 0.0078125, %v2033_v62  ;;  %v2035_v30 = vpop.xlane.xlu0 %2034  ;;  %v2238_v45 = vmul.f32 %v4797_v17, %v4797_v17  ;;  %v5210_v62 = vld [vmem:[#allocation2_spill] sm:$0xff] }
 0x392   : > { %5207 = vst [vmem:[#allocation18_spill] sm:$0xff] %v4800_v28  ;;  %v2113_v5 = vmul.f32 0.0078125, %v2035_v30  ;;  %v2239_v3 = vmul.f32 %v4800_v28, %v4800_v28  ;;  %v5214_v28 = vld [vmem:[#allocation4_spill] sm:$0xff] }
 0x393   : > { %v4807_v38 = vsub.f32 %v4504_v36, %v2112_v14  ;;  %2349 = vadd.xlane.f32.xlu1 %v2238_v45  ;;  %2347 = vadd.xlane.f32.xlu0 %v2237_v8  ;;  %v5212_v14 = vld [vmem:[#allocation3_spill] sm:$0xff] }
 0x394   : > { %v2037_v16 = vpop.xlane.xlu1 %2036  ;;  %v4810_v48 = vsub.f32 %v4507_v54, %v2113_v5 }
 0x395   : > { %5208 = vst [vmem:[#allocation19_spill] sm:$0xff] %v4807_v38  ;;  %v2114_v27 = vmul.f32 0.0078125, %v2037_v16  ;;  %v2039_v23 = vpop.xlane.xlu0 %2038  ;;  %v2240_v63 = vmul.f32 %v4807_v38, %v4807_v38 }
 0x396   : > { %5209 = vst [vmem:[#allocation20_spill] sm:$0xff] %v4810_v48  ;;  %v2115_v55 = vmul.f32 0.0078125, %v2039_v23  ;;  %v2241_v16 = vmul.f32 %v4810_v48, %v4810_v48  ;;  %v5218_v48 = vld [vmem:[#allocation6_spill] sm:$0xff] }
 0x397   : > { %v4817_v30 = vsub.f32 %v5210_v62, %v2114_v27  ;;  %2353 = vadd.xlane.f32.xlu1 %v2240_v63  ;;  %2351 = vadd.xlane.f32.xlu0 %v2239_v3  ;;  %v5216_v63 = vld [vmem:[#allocation5_spill] sm:$0xff] }
 0x398   : > { %v2041_v36 = vpop.xlane.xlu1 %2040  ;;  %v4820_v45 = vsub.f32 %v5212_v14, %v2115_v55 }
 0x399   : > { %5211 = vst [vmem:[#allocation2_spill] sm:$0xff] %v4817_v30  ;;  %v2116_v54 = vmul.f32 0.0078125, %v2041_v36  ;;  %v2043_v8 = vpop.xlane.xlu0 %2042  ;;  %v2242_v5 = vmul.f32 %v4817_v30, %v4817_v30 }
 0x39a   : > { %5213 = vst [vmem:[#allocation3_spill] sm:$0xff] %v4820_v45  ;;  %v2117_v38 = vmul.f32 0.0078125, %v2043_v8  ;;  %v2243_v14 = vmul.f32 %v4820_v45, %v4820_v45  ;;  %v5222_v45 = vld [vmem:[#allocation8_spill] sm:$0xff] }
 0x39b   : > { %v4827_v23 = vsub.f32 %v5214_v28, %v2116_v54  ;;  %2357 = vadd.xlane.f32.xlu1 %v2242_v5  ;;  %2355 = vadd.xlane.f32.xlu0 %v2241_v16  ;;  %v5220_v54 = vld [vmem:[#allocation7_spill] sm:$0xff] }
 0x39c   : > { %v2045_v27 = vpop.xlane.xlu1 %2044  ;;  %v4830_v3 = vsub.f32 %v5216_v63, %v2117_v38 }
 0x39d   : > { %5215 = vst [vmem:[#allocation4_spill] sm:$0xff] %v4827_v23  ;;  %v2118_v55 = vmul.f32 0.0078125, %v2045_v27  ;;  %v2047_v62 = vpop.xlane.xlu0 %2046  ;;  %v2244_v36 = vmul.f32 %v4827_v23, %v4827_v23 }
 0x39e   : > { %5217 = vst [vmem:[#allocation5_spill] sm:$0xff] %v4830_v3  ;;  %v2119_v30 = vmul.f32 0.0078125, %v2047_v62  ;;  %v2245_v63 = vmul.f32 %v4830_v3, %v4830_v3  ;;  %v5226_v3 = vld [vmem:[#allocation10_spill] sm:$0xff] }
 0x39f   : > { %v4837_v8 = vsub.f32 %v5218_v48, %v2118_v55  ;;  %2361 = vadd.xlane.f32.xlu1 %v2244_v36  ;;  %2359 = vadd.xlane.f32.xlu0 %v2243_v14  ;;  %v5224_v55 = vld [vmem:[#allocation9_spill] sm:$0xff] }
 0x3a0   : > { %v2049_v28 = vpop.xlane.xlu1 %2048  ;;  %v4840_v5 = vsub.f32 %v5220_v54, %v2119_v30 }
 0x3a1   : > { %5219 = vst [vmem:[#allocation6_spill] sm:$0xff] %v4837_v8  ;;  %v2120_v38 = vmul.f32 0.0078125, %v2049_v28  ;;  %v2051_v16 = vpop.xlane.xlu0 %2050  ;;  %v2246_v27 = vmul.f32 %v4837_v8, %v4837_v8 }
 0x3a2   : > { %5221 = vst [vmem:[#allocation7_spill] sm:$0xff] %v4840_v5  ;;  %v2121_v23 = vmul.f32 0.0078125, %v2051_v16  ;;  %v2247_v54 = vmul.f32 %v4840_v5, %v4840_v5 }
 0x3a3   : > { %v4847_v62 = vsub.f32 %v5222_v45, %v2120_v38  ;;  %2365 = vadd.xlane.f32.xlu1 %v2246_v27  ;;  %2363 = vadd.xlane.f32.xlu0 %v2245_v63  ;;  %v5228_v38 = vld [vmem:[#allocation11_spill] sm:$0xff] }
 0x3a4   : > { %v2053_v48 = vpop.xlane.xlu1 %2052  ;;  %v4850_v36 = vsub.f32 %v5224_v55, %v2121_v23 }
 0x3a5   : > { %5223 = vst [vmem:[#allocation8_spill] sm:$0xff] %v4847_v62  ;;  %v2122_v30 = vmul.f32 0.0078125, %v2053_v48  ;;  %v2055_v14 = vpop.xlane.xlu0 %2054  ;;  %v2248_v28 = vmul.f32 %v4847_v62, %v4847_v62 }
 0x3a6   : > { %5225 = vst [vmem:[#allocation9_spill] sm:$0xff] %v4850_v36  ;;  %v2123_v8 = vmul.f32 0.0078125, %v2055_v14  ;;  %v2249_v55 = vmul.f32 %v4850_v36, %v4850_v36 }
 0x3a7   : > { %v4857_v16 = vsub.f32 %v5226_v3, %v2122_v30  ;;  %2369 = vadd.xlane.f32.xlu1 %v2248_v28  ;;  %2367 = vadd.xlane.f32.xlu0 %v2247_v54  ;;  %v5231_v30 = vld [vmem:[#allocation12_spill] sm:$0xff] }
 0x3a8   : > { %v2057_v45 = vpop.xlane.xlu1 %2056  ;;  %v4860_v27 = vsub.f32 %v5228_v38, %v2123_v8  ;;  %v5233_v38 = vld [vmem:[#allocation13_spill] sm:$0xff] }
 0x3a9   : > { %5227 = vst [vmem:[#allocation10_spill] sm:$0xff] %v4857_v16  ;;  %v2124_v23 = vmul.f32 0.0078125, %v2057_v45  ;;  %v2059_v63 = vpop.xlane.xlu0 %2058  ;;  %v2250_v48 = vmul.f32 %v4857_v16, %v4857_v16 }
 0x3aa   : > { %5229 = vst [vmem:[#allocation11_spill] sm:$0xff] %v4860_v27  ;;  %v2125_v62 = vmul.f32 0.0078125, %v2059_v63  ;;  %v2251_v45 = vmul.f32 %v4860_v27, %v4860_v27 }
 0x3ab   : > { %v4867_v14 = vsub.f32 %v4552_v4, %v2124_v23  ;;  %2373 = vadd.xlane.f32.xlu1 %v2250_v48  ;;  %2371 = vadd.xlane.f32.xlu0 %v2249_v55 }
 0x3ac   : > { %v2061_v3 = vpop.xlane.xlu1 %2060  ;;  %v4870_v28 = vsub.f32 %v5231_v30, %v2125_v62 }
 0x3ad   : > { %5230 = vst [vmem:[#allocation21_spill] sm:$0xff] %v4867_v14  ;;  %v2126_v8 = vmul.f32 0.0078125, %v2061_v3  ;;  %v2252_v54 = vmul.f32 %v4867_v14, %v4867_v14 }
 0x3ae   : > { %5232 = vst [vmem:[#allocation12_spill] sm:$0xff] %v4870_v28  ;;  %v2253_v23 = vmul.f32 %v4870_v28, %v4870_v28 }
 0x3af   : > { %v4877_v16 = vsub.f32 %v5233_v38, %v2126_v8  ;;  %2377 = vadd.xlane.f32.xlu1 %v2252_v54  ;;  %2375 = vadd.xlane.f32.xlu0 %v2251_v45 }
 0x3b1   : > { %5234 = vst [vmem:[#allocation13_spill] sm:$0xff] %v4877_v16  ;;  %v2254_v4 = vmul.f32 %v4877_v16, %v4877_v16 }
 0x3b3   : > { %2381 = vadd.xlane.f32.xlu1 %v2254_v4  ;;  %2379 = vadd.xlane.f32.xlu0 %v2253_v23 }
 0x3c0   : > { %v2258_v62 = vpop.xlane.xlu1 %2257 }
 0x3c1   : > { %v2384_v63 = vmul.f32 0.0078125, %v2258_v62 }
 0x3c3   : > { %v2448_v48 = vadd.f32 1e-05, %v2384_v63  ;;  %v4886_v63 = vld [vmem:[%s5156_s7] ss:$0 sm:$0xff] }
 0x3c4   : > { %v2262_v55 = vpop.xlane.xlu1 %2261  ;;  %v2256_v3 = vpop.xlane.xlu0 %2255 }
 0x3c5   : > { %3635 = vrsqrt.f32 %v2448_v48  ;;  %v2386_v30 = vmul.f32 0.0078125, %v2262_v55  ;;  %v2383_v27 = vmul.f32 0.0078125, %v2256_v3 }
 0x3c7   : > { %v2450_v8 = vadd.f32 1e-05, %v2386_v30  ;;  %v2447_v38 = vadd.f32 1e-05, %v2383_v27 }
 0x3c8   : > { %v2260_v54 = vpop.xlane.xlu0 %2259 }
 0x3c9   : > { %3637 = vrsqrt.f32 %v2450_v8  ;;  %v2385_v45 = vmul.f32 0.0078125, %v2260_v54  ;;  %v4892_v8 = vld [vmem:[%s5157_s8] ss:$0 sm:$0xff] }
 0x3ca   : > { %3639 = vrsqrt.f32 %v2447_v38 }
 0x3cb   : > { %v2449_v16 = vadd.f32 1e-05, %v2385_v45 }
 0x3cc   : > { %v2266_v14 = vpop.xlane.xlu1 %2265  ;;  %v2264_v36 = vpop.xlane.xlu0 %2263 }
 0x3cd   : > { %3641 = vrsqrt.f32 %v2449_v16  ;;  %v2388_v4 = vmul.f32 0.0078125, %v2266_v14  ;;  %v2387_v23 = vmul.f32 0.0078125, %v2264_v36 }
 0x3cf   : > { %v3636_v62 = vpop.eup %3635  ;;  %v2452_v48 = vadd.f32 1e-05, %v2388_v4  ;;  %v2451_v55 = vadd.f32 1e-05, %v2387_v23  ;;  %v5235_v23 = vld [vmem:[#allocation14_spill] sm:$0xff] }
 0x3d0   : > { %v2576_v27 = vmul.f32 %v3636_v62, %v4564_v0  ;;  %v2270_v3 = vpop.xlane.xlu1 %2269  ;;  %v2268_v30 = vpop.xlane.xlu0 %2267 }
 0x3d1   : > { %3643 = vrsqrt.f32 %v2452_v48  ;;  %v2390_v16 = vmul.f32 0.0078125, %v2270_v3  ;;  %v2389_v36 = vmul.f32 0.0078125, %v2268_v30 }
 0x3d2   : > { %v2647_v14 = vmul.f32 %v4886_v63, %v2576_v27  ;;  %3645 = vrsqrt.f32 %v2451_v55 }
 0x3d3   : > { %v3638_v38 = vpop.eup %3637  ;;  %v2454_v0 = vadd.f32 1e-05, %v2390_v16  ;;  %v2453_v54 = vadd.f32 1e-05, %v2389_v36 }
 0x3d4   : > { %v3640_v45 = vpop.eup %3639  ;;  %v2718_v4 = vadd.f32 %v4892_v8, %v2647_v14  ;;  %v2578_v62 = vmul.f32 %v3638_v38, %v5235_v23  ;;  %v2274_v48 = vpop.xlane.xlu1 %2273  ;;  %v5236_v23 = vld [vmem:[#allocation15_spill] sm:$0xff] }
 0x3d5   : > { %v2272_v3 = vpop.xlane.xlu0 %2271  ;;  %v2575_v27 = vmul.f32 %v3640_v45, %v4572_v53  ;;  %3647 = vrsqrt.f32 %v2454_v0  ;;  %v2392_v55 = vmul.f32 0.0078125, %v2274_v48 }
 0x3d6   : > { %v2391_v30 = vmul.f32 0.0078125, %v2272_v3  ;;  %2782 = vst [vmem:[%s4900_s23 + $0x8] sm:$0xff] %v2718_v4  ;;  %v2649_v28 = vmul.f32 %v4886_v63, %v2578_v62  ;;  %3649 = vrsqrt.f32 %v2453_v54 }
 0x3d7   : > { %v3642_v5 = vpop.eup %3641  ;;  %v2646_v16 = vmul.f32 %v4886_v63, %v2575_v27  ;;  %v2456_v36 = vadd.f32 1e-05, %v2392_v55 }
 0x3d8   : > { %v2455_v14 = vadd.f32 1e-05, %v2391_v30  ;;  %v2720_v38 = vadd.f32 %v4892_v8, %v2649_v28  ;;  %v2577_v7 = vmul.f32 %v3642_v5, %v5236_v23  ;;  %v2278_v17 = vpop.xlane.xlu1 %2277 }
 0x3d9   : > { %v2276_v53 = vpop.xlane.xlu0 %2275  ;;  %v2717_v0 = vadd.f32 %v4892_v8, %v2646_v16  ;;  %3651 = vrsqrt.f32 %v2456_v36  ;;  %v2394_v45 = vmul.f32 0.0078125, %v2278_v17 }
 0x3da   : > { %v2393_v4 = vmul.f32 0.0078125, %v2276_v53  ;;  %2784 = vst [vmem:[%s4900_s23 + $0x18] sm:$0xff] %v2720_v38  ;;  %v2648_v54 = vmul.f32 %v4886_v63, %v2577_v7  ;;  %3653 = vrsqrt.f32 %v2455_v14 }
 0x3db   : > { %v3644_v62 = vpop.eup %3643  ;;  %2781 = vst [vmem:[%s4900_s23] sm:$0xff] %v2717_v0  ;;  %v2458_v48 = vadd.f32 1e-05, %v2394_v45 }
 0x3dc   : > { %v2457_v3 = vadd.f32 1e-05, %v2393_v4  ;;  %v3646_v27 = vpop.eup %3645  ;;  %v2719_v28 = vadd.f32 %v4892_v8, %v2648_v54  ;;  %v2580_v5 = vmul.f32 %v3644_v62, %v4587_v19  ;;  %v2282_v55 = vpop.xlane.xlu1 %2281 }
 0x3dd   : > { %v2280_v30 = vpop.xlane.xlu0 %2279  ;;  %v2579_v16 = vmul.f32 %v3646_v27, %v4584_v9  ;;  %3655 = vrsqrt.f32 %v2458_v48  ;;  %v2396_v17 = vmul.f32 0.0078125, %v2282_v55 }
 0x3de   : > { %v2395_v36 = vmul.f32 0.0078125, %v2280_v30  ;;  %2783 = vst [vmem:[%s4900_s23 + $0x10] sm:$0xff] %v2719_v28  ;;  %v2651_v7 = vmul.f32 %v4886_v63, %v2580_v5  ;;  %3657 = vrsqrt.f32 %v2457_v3 }
 0x3df   : > { %v3648_v14 = vpop.eup %3647  ;;  %v2650_v38 = vmul.f32 %v4886_v63, %v2579_v16  ;;  %v2460_v23 = vadd.f32 1e-05, %v2396_v17 }
 0x3e0   : > { %v2459_v53 = vadd.f32 1e-05, %v2395_v36  ;;  %v3650_v0 = vpop.eup %3649  ;;  %v2722_v19 = vadd.f32 %v4892_v8, %v2651_v7  ;;  %v2582_v45 = vmul.f32 %v3648_v14, %v4597_v13  ;;  %v2286_v9 = vpop.xlane.xlu1 %2285 }
 0x3e1   : > { %v2284_v4 = vpop.xlane.xlu0 %2283  ;;  %v2721_v54 = vadd.f32 %v4892_v8, %v2650_v38  ;;  %v2581_v62 = vmul.f32 %v3650_v0, %v4594_v20  ;;  %3659 = vrsqrt.f32 %v2460_v23  ;;  %v2398_v48 = vmul.f32 0.0078125, %v2286_v9 }
 0x3e2   : > { %2786 = vst [vmem:[%s4900_s23 + $0x28] sm:$0xff] %v2722_v19  ;;  %v2653_v3 = vmul.f32 %v4886_v63, %v2582_v45  ;;  %3661 = vrsqrt.f32 %v2459_v53  ;;  %v2397_v27 = vmul.f32 0.0078125, %v2284_v4 }
 0x3e3   : > { %v3652_v28 = vpop.eup %3651  ;;  %2785 = vst [vmem:[%s4900_s23 + $0x20] sm:$0xff] %v2721_v54  ;;  %v2652_v5 = vmul.f32 %v4886_v63, %v2581_v62  ;;  %v2462_v55 = vadd.f32 1e-05, %v2398_v48 }
 0x3e4   : > { %v3654_v13 = vpop.eup %3653  ;;  %v2724_v30 = vadd.f32 %v4892_v8, %v2653_v3  ;;  %v2584_v16 = vmul.f32 %v3652_v28, %v4607_v18  ;;  %v2461_v20 = vadd.f32 1e-05, %v2397_v27  ;;  %v2290_v17 = vpop.xlane.xlu1 %2289 }
 0x3e5   : > { %v2288_v36 = vpop.xlane.xlu0 %2287  ;;  %v2723_v7 = vadd.f32 %v4892_v8, %v2652_v5  ;;  %v2583_v14 = vmul.f32 %v3654_v13, %v4604_v10  ;;  %3663 = vrsqrt.f32 %v2462_v55  ;;  %v2400_v38 = vmul.f32 0.0078125, %v2290_v17 }
 0x3e6   : > { %2788 = vst [vmem:[%s4900_s23 + $0x38] sm:$0xff] %v2724_v30  ;;  %v2655_v23 = vmul.f32 %v4886_v63, %v2584_v16  ;;  %3665 = vrsqrt.f32 %v2461_v20  ;;  %v2399_v53 = vmul.f32 0.0078125, %v2288_v36 }
 0x3e7   : > { %v3656_v0 = vpop.eup %3655  ;;  %2787 = vst [vmem:[%s4900_s23 + $0x30] sm:$0xff] %v2723_v7  ;;  %v2654_v19 = vmul.f32 %v4886_v63, %v2583_v14  ;;  %v2464_v18 = vadd.f32 1e-05, %v2400_v38 }
 0x3e8   : > { %v3658_v45 = vpop.eup %3657  ;;  %v2726_v9 = vadd.f32 %v4892_v8, %v2655_v23  ;;  %v2586_v4 = vmul.f32 %v3656_v0, %v4617_v40  ;;  %v2463_v10 = vadd.f32 1e-05, %v2399_v53  ;;  %v2294_v54 = vpop.xlane.xlu1 %2293 }
 0x3e9   : > { %v2292_v62 = vpop.xlane.xlu0 %2291  ;;  %v2725_v48 = vadd.f32 %v4892_v8, %v2654_v19  ;;  %v2585_v3 = vmul.f32 %v3658_v45, %v4614_v29  ;;  %3667 = vrsqrt.f32 %v2464_v18  ;;  %v2402_v27 = vmul.f32 0.0078125, %v2294_v54 }
 0x3ea   : > { %2790 = vst [vmem:[%s4900_s23 + $0x48] sm:$0xff] %v2726_v9  ;;  %v2657_v28 = vmul.f32 %v4886_v63, %v2586_v4  ;;  %3669 = vrsqrt.f32 %v2463_v10  ;;  %v2401_v5 = vmul.f32 0.0078125, %v2292_v62 }
 0x3eb   : > { %v3660_v55 = vpop.eup %3659  ;;  %2789 = vst [vmem:[%s4900_s23 + $0x40] sm:$0xff] %v2725_v48  ;;  %v2656_v13 = vmul.f32 %v4886_v63, %v2585_v3  ;;  %v2466_v40 = vadd.f32 1e-05, %v2402_v27 }
 0x3ec   : > { %v3662_v30 = vpop.eup %3661  ;;  %v2728_v16 = vadd.f32 %v4892_v8, %v2657_v28  ;;  %v2588_v20 = vmul.f32 %v3660_v55, %v4627_v31  ;;  %v2465_v29 = vadd.f32 1e-05, %v2401_v5  ;;  %v2298_v17 = vpop.xlane.xlu1 %2297 }
 0x3ed   : > { %v2296_v36 = vpop.xlane.xlu0 %2295  ;;  %v2727_v7 = vadd.f32 %v4892_v8, %v2656_v13  ;;  %v2587_v14 = vmul.f32 %v3662_v30, %v4624_v32  ;;  %3671 = vrsqrt.f32 %v2466_v40  ;;  %v2404_v38 = vmul.f32 0.0078125, %v2298_v17 }
 0x3ee   : > { %2792 = vst [vmem:[%s4900_s23 + $0x58] sm:$0xff] %v2728_v16  ;;  %v2659_v23 = vmul.f32 %v4886_v63, %v2588_v20  ;;  %3673 = vrsqrt.f32 %v2465_v29  ;;  %v2403_v53 = vmul.f32 0.0078125, %v2296_v36 }
 0x3ef   : > { %v3664_v0 = vpop.eup %3663  ;;  %2791 = vst [vmem:[%s4900_s23 + $0x50] sm:$0xff] %v2727_v7  ;;  %v2658_v19 = vmul.f32 %v4886_v63, %v2587_v14  ;;  %v2468_v31 = vadd.f32 1e-05, %v2404_v38 }
 0x3f0   : > { %v3666_v18 = vpop.eup %3665  ;;  %v2730_v45 = vadd.f32 %v4892_v8, %v2659_v23  ;;  %v2590_v9 = vmul.f32 %v3664_v0, %v4637_v33  ;;  %v2467_v32 = vadd.f32 1e-05, %v2403_v53  ;;  %v2302_v4 = vpop.xlane.xlu1 %2301 }
 0x3f1   : > { %v2300_v10 = vpop.xlane.xlu0 %2299  ;;  %v2729_v54 = vadd.f32 %v4892_v8, %v2658_v19  ;;  %v2589_v62 = vmul.f32 %v3666_v18, %v4634_v35  ;;  %3675 = vrsqrt.f32 %v2468_v31  ;;  %v2406_v48 = vmul.f32 0.0078125, %v2302_v4 }
 0x3f2   : > { %2794 = vst [vmem:[%s4900_s23 + $0x68] sm:$0xff] %v2730_v45  ;;  %v2661_v3 = vmul.f32 %v4886_v63, %v2590_v9  ;;  %3677 = vrsqrt.f32 %v2467_v32  ;;  %v2405_v27 = vmul.f32 0.0078125, %v2300_v10 }
 0x3f3   : > { %v3668_v28 = vpop.eup %3667  ;;  %2793 = vst [vmem:[%s4900_s23 + $0x60] sm:$0xff] %v2729_v54  ;;  %v2660_v5 = vmul.f32 %v4886_v63, %v2589_v62  ;;  %v2470_v33 = vadd.f32 1e-05, %v2406_v48 }
 0x3f4   : > { %v3670_v55 = vpop.eup %3669  ;;  %v2732_v13 = vadd.f32 %v4892_v8, %v2661_v3  ;;  %v2592_v40 = vmul.f32 %v3668_v28, %v4647_v37  ;;  %v2469_v35 = vadd.f32 1e-05, %v2405_v27  ;;  %v2306_v30 = vpop.xlane.xlu1 %2305 }
 0x3f5   : > { %v2304_v16 = vpop.xlane.xlu0 %2303  ;;  %v2731_v20 = vadd.f32 %v4892_v8, %v2660_v5  ;;  %v2591_v29 = vmul.f32 %v3670_v55, %v4644_v39  ;;  %3679 = vrsqrt.f32 %v2470_v33  ;;  %v2408_v17 = vmul.f32 0.0078125, %v2306_v30 }
 0x3f6   : > { %2796 = vst [vmem:[%s4900_s23 + $0x78] sm:$0xff] %v2732_v13  ;;  %v2663_v36 = vmul.f32 %v4886_v63, %v2592_v40  ;;  %3681 = vrsqrt.f32 %v2469_v35  ;;  %v2407_v7 = vmul.f32 0.0078125, %v2304_v16 }
 0x3f7   : > { %v3672_v14 = vpop.eup %3671  ;;  %2795 = vst [vmem:[%s4900_s23 + $0x70] sm:$0xff] %v2731_v20  ;;  %v2662_v38 = vmul.f32 %v4886_v63, %v2591_v29  ;;  %v2472_v37 = vadd.f32 1e-05, %v2408_v17 }
 0x3f8   : > { %v3674_v23 = vpop.eup %3673  ;;  %v2734_v53 = vadd.f32 %v4892_v8, %v2663_v36  ;;  %v2594_v0 = vmul.f32 %v3672_v14, %v4657_v41  ;;  %v2471_v39 = vadd.f32 1e-05, %v2407_v7  ;;  %v2310_v19 = vpop.xlane.xlu1 %2309 }
 0x3f9   : > { %v2308_v31 = vpop.xlane.xlu0 %2307  ;;  %v2733_v18 = vadd.f32 %v4892_v8, %v2662_v38  ;;  %v2593_v45 = vmul.f32 %v3674_v23, %v4654_v42  ;;  %3683 = vrsqrt.f32 %v2472_v37  ;;  %v2410_v9 = vmul.f32 0.0078125, %v2310_v19 }
 0x3fa   : > { %2798 = vst [vmem:[%s4900_s23 + $0x88] sm:$0xff] %v2734_v53  ;;  %v2665_v32 = vmul.f32 %v4886_v63, %v2594_v0  ;;  %3685 = vrsqrt.f32 %v2471_v39  ;;  %v2409_v4 = vmul.f32 0.0078125, %v2308_v31 }
 0x3fb   : > { %v3676_v10 = vpop.eup %3675  ;;  %2797 = vst [vmem:[%s4900_s23 + $0x80] sm:$0xff] %v2733_v18  ;;  %v2664_v54 = vmul.f32 %v4886_v63, %v2593_v45  ;;  %v2474_v41 = vadd.f32 1e-05, %v2410_v9 }
 0x3fc   : > { %v3678_v62 = vpop.eup %3677  ;;  %v2736_v48 = vadd.f32 %v4892_v8, %v2665_v32  ;;  %v2596_v3 = vmul.f32 %v3676_v10, %v4667_v44  ;;  %v2473_v42 = vadd.f32 1e-05, %v2409_v4  ;;  %v2314_v27 = vpop.xlane.xlu1 %2313 }
 0x3fd   : > { %v2312_v28 = vpop.xlane.xlu0 %2311  ;;  %v2735_v5 = vadd.f32 %v4892_v8, %v2664_v54  ;;  %v2595_v33 = vmul.f32 %v3678_v62, %v4664_v46  ;;  %3687 = vrsqrt.f32 %v2474_v41  ;;  %v2412_v55 = vmul.f32 0.0078125, %v2314_v27 }
 0x3fe   : > { %2800 = vst [vmem:[%s4900_s23 + $0x98] sm:$0xff] %v2736_v48  ;;  %v2667_v13 = vmul.f32 %v4886_v63, %v2596_v3  ;;  %3689 = vrsqrt.f32 %v2473_v42  ;;  %v2411_v40 = vmul.f32 0.0078125, %v2312_v28 }
 0x3ff   : > { %v3680_v35 = vpop.eup %3679  ;;  %2799 = vst [vmem:[%s4900_s23 + $0x90] sm:$0xff] %v2735_v5  ;;  %v2666_v30 = vmul.f32 %v4886_v63, %v2595_v33  ;;  %v2476_v44 = vadd.f32 1e-05, %v2412_v55 }
 0x400   : > { %v3682_v16 = vpop.eup %3681  ;;  %v2738_v20 = vadd.f32 %v4892_v8, %v2667_v13  ;;  %v2598_v29 = vmul.f32 %v3680_v35, %v4677_v47  ;;  %v2475_v46 = vadd.f32 1e-05, %v2411_v40  ;;  %v2318_v17 = vpop.xlane.xlu1 %2317 }
 0x401   : > { %v2316_v36 = vpop.xlane.xlu0 %2315  ;;  %v2737_v7 = vadd.f32 %v4892_v8, %v2666_v30  ;;  %v2597_v14 = vmul.f32 %v3682_v16, %v4674_v49  ;;  %3691 = vrsqrt.f32 %v2476_v44  ;;  %v2414_v38 = vmul.f32 0.0078125, %v2318_v17 }
 0x402   : > { %2802 = vst [vmem:[%s4900_s23 + $0xa8] sm:$0xff] %v2738_v20  ;;  %v2669_v37 = vmul.f32 %v4886_v63, %v2598_v29  ;;  %3693 = vrsqrt.f32 %v2475_v46  ;;  %v2413_v23 = vmul.f32 0.0078125, %v2316_v36 }
 0x403   : > { %v3684_v53 = vpop.eup %3683  ;;  %2801 = vst [vmem:[%s4900_s23 + $0xa0] sm:$0xff] %v2737_v7  ;;  %v2668_v0 = vmul.f32 %v4886_v63, %v2597_v14  ;;  %v2478_v47 = vadd.f32 1e-05, %v2414_v38 }
 0x404   : > { %v3686_v39 = vpop.eup %3685  ;;  %v2740_v19 = vadd.f32 %v4892_v8, %v2669_v37  ;;  %v2600_v31 = vmul.f32 %v3684_v53, %v4687_v52  ;;  %v2477_v49 = vadd.f32 1e-05, %v2413_v23  ;;  %v2322_v18 = vpop.xlane.xlu1 %2321 }
 0x405   : > { %v2320_v45 = vpop.xlane.xlu0 %2319  ;;  %v2739_v9 = vadd.f32 %v4892_v8, %v2668_v0  ;;  %v2599_v32 = vmul.f32 %v3686_v39, %v4684_v56  ;;  %3695 = vrsqrt.f32 %v2478_v47  ;;  %v2416_v4 = vmul.f32 0.0078125, %v2322_v18 }
 0x406   : > { %2804 = vst [vmem:[%s4900_s23 + $0xb8] sm:$0xff] %v2740_v19  ;;  %v2671_v10 = vmul.f32 %v4886_v63, %v2600_v31  ;;  %3697 = vrsqrt.f32 %v2477_v49  ;;  %v2415_v54 = vmul.f32 0.0078125, %v2320_v45 }
 0x407   : > { %v3688_v41 = vpop.eup %3687  ;;  %2803 = vst [vmem:[%s4900_s23 + $0xb0] sm:$0xff] %v2739_v9  ;;  %v2670_v62 = vmul.f32 %v4886_v63, %v2599_v32  ;;  %v2480_v52 = vadd.f32 1e-05, %v2416_v4 }
 0x408   : > { %v3690_v48 = vpop.eup %3689  ;;  %v2742_v3 = vadd.f32 %v4892_v8, %v2671_v10  ;;  %v2602_v42 = vmul.f32 %v3688_v41, %v4697_v57  ;;  %v2479_v56 = vadd.f32 1e-05, %v2415_v54  ;;  %v2326_v27 = vpop.xlane.xlu1 %2325 }
 0x409   : > { %v2324_v28 = vpop.xlane.xlu0 %2323  ;;  %v2741_v5 = vadd.f32 %v4892_v8, %v2670_v62  ;;  %v2601_v33 = vmul.f32 %v3690_v48, %v4694_v58  ;;  %3699 = vrsqrt.f32 %v2480_v52  ;;  %v2418_v55 = vmul.f32 0.0078125, %v2326_v27 }
 0x40a   : > { %2806 = vst [vmem:[%s4900_s23 + $0xc8] sm:$0xff] %v2742_v3  ;;  %v2673_v13 = vmul.f32 %v4886_v63, %v2602_v42  ;;  %3701 = vrsqrt.f32 %v2479_v56  ;;  %v2417_v40 = vmul.f32 0.0078125, %v2324_v28 }
 0x40b   : > { %v3692_v35 = vpop.eup %3691  ;;  %2805 = vst [vmem:[%s4900_s23 + $0xc0] sm:$0xff] %v2741_v5  ;;  %v2672_v30 = vmul.f32 %v4886_v63, %v2601_v33  ;;  %v2482_v57 = vadd.f32 1e-05, %v2418_v55 }
 0x40c   : > { %v3694_v44 = vpop.eup %3693  ;;  %v2744_v16 = vadd.f32 %v4892_v8, %v2673_v13  ;;  %v2604_v20 = vmul.f32 %v3692_v35, %v4707_v59  ;;  %v2481_v58 = vadd.f32 1e-05, %v2417_v40  ;;  %v2330_v29 = vpop.xlane.xlu1 %2329 }
 0x40d   : > { %v2328_v46 = vpop.xlane.xlu0 %2327  ;;  %v2743_v17 = vadd.f32 %v4892_v8, %v2672_v30  ;;  %v2603_v36 = vmul.f32 %v3694_v44, %v4704_v60  ;;  %3703 = vrsqrt.f32 %v2482_v57  ;;  %v2420_v7 = vmul.f32 0.0078125, %v2330_v29 }
 0x40e   : > { %2808 = vst [vmem:[%s4900_s23 + $0xd8] sm:$0xff] %v2744_v16  ;;  %v2675_v14 = vmul.f32 %v4886_v63, %v2604_v20  ;;  %3705 = vrsqrt.f32 %v2481_v58  ;;  %v2419_v38 = vmul.f32 0.0078125, %v2328_v46 }
 0x40f   : > { %v3696_v37 = vpop.eup %3695  ;;  %2807 = vst [vmem:[%s4900_s23 + $0xd0] sm:$0xff] %v2743_v17  ;;  %v2674_v23 = vmul.f32 %v4886_v63, %v2603_v36  ;;  %v2484_v59 = vadd.f32 1e-05, %v2420_v7 }
 0x410   : > { %v3698_v53 = vpop.eup %3697  ;;  %v2746_v0 = vadd.f32 %v4892_v8, %v2675_v14  ;;  %v2606_v47 = vmul.f32 %v3696_v37, %v4717_v1  ;;  %v2483_v60 = vadd.f32 1e-05, %v2419_v38  ;;  %v2334_v39 = vpop.xlane.xlu1 %2333 }
 0x411   : > { %v2332_v19 = vpop.xlane.xlu0 %2331  ;;  %v2745_v31 = vadd.f32 %v4892_v8, %v2674_v23  ;;  %v2605_v49 = vmul.f32 %v3698_v53, %v4710_v2  ;;  %3707 = vrsqrt.f32 %v2484_v59  ;;  %v2422_v18 = vmul.f32 0.0078125, %v2334_v39 }
 0x412   : > { %2810 = vst [vmem:[%s4900_s23 + $0xe8] sm:$0xff] %v2746_v0  ;;  %v2677_v45 = vmul.f32 %v4886_v63, %v2606_v47  ;;  %3709 = vrsqrt.f32 %v2483_v60  ;;  %v2421_v9 = vmul.f32 0.0078125, %v2332_v19 }
 0x413   : > { %v3700_v32 = vpop.eup %3699  ;;  %2809 = vst [vmem:[%s4900_s23 + $0xe0] sm:$0xff] %v2745_v31  ;;  %v2676_v4 = vmul.f32 %v4886_v63, %v2605_v49  ;;  %v2486_v1 = vadd.f32 1e-05, %v2422_v18 }
 0x414   : > { %v3702_v10 = vpop.eup %3701  ;;  %v2748_v54 = vadd.f32 %v4892_v8, %v2677_v45  ;;  %v2608_v41 = vmul.f32 %v3700_v32, %v4727_v6  ;;  %v2485_v2 = vadd.f32 1e-05, %v2421_v9  ;;  %v2338_v62 = vpop.xlane.xlu1 %2337 }
 0x415   : > { %v2336_v52 = vpop.xlane.xlu0 %2335  ;;  %v2747_v48 = vadd.f32 %v4892_v8, %v2676_v4  ;;  %v2607_v3 = vmul.f32 %v3702_v10, %v4720_v50  ;;  %3711 = vrsqrt.f32 %v2486_v1  ;;  %v2424_v42 = vmul.f32 0.0078125, %v2338_v62 }
 0x416   : > { %2812 = vst [vmem:[%s4900_s23 + $0xf8] sm:$0xff] %v2748_v54  ;;  %v2679_v56 = vmul.f32 %v4886_v63, %v2608_v41  ;;  %3713 = vrsqrt.f32 %v2485_v2  ;;  %v2423_v27 = vmul.f32 0.0078125, %v2336_v52 }
 0x417   : > { %v3704_v28 = vpop.eup %3703  ;;  %2811 = vst [vmem:[%s4900_s23 + $0xf0] sm:$0xff] %v2747_v48  ;;  %v2678_v5 = vmul.f32 %v4886_v63, %v2607_v3  ;;  %v2488_v6 = vadd.f32 1e-05, %v2424_v42 }
 0x418   : > { %v3706_v33 = vpop.eup %3705  ;;  %v2750_v55 = vadd.f32 %v4892_v8, %v2679_v56  ;;  %v2610_v13 = vmul.f32 %v3704_v28, %v4737_v12  ;;  %v2487_v50 = vadd.f32 1e-05, %v2423_v27  ;;  %v2342_v40 = vpop.xlane.xlu1 %2341 }
 0x419   : > { %v2340_v35 = vpop.xlane.xlu0 %2339  ;;  %v2749_v30 = vadd.f32 %v4892_v8, %v2678_v5  ;;  %v2609_v57 = vmul.f32 %v3706_v33, %v4730_v24  ;;  %3715 = vrsqrt.f32 %v2488_v6  ;;  %v2426_v44 = vmul.f32 0.0078125, %v2342_v40 }
 0x41a   : > { %2814 = vst [vmem:[%s4900_s23 + $0x108] sm:$0xff] %v2750_v55  ;;  %v2681_v16 = vmul.f32 %v4886_v63, %v2610_v13  ;;  %3717 = vrsqrt.f32 %v2487_v50  ;;  %v2425_v20 = vmul.f32 0.0078125, %v2340_v35 }
 0x41b   : > { %v3708_v58 = vpop.eup %3707  ;;  %2813 = vst [vmem:[%s4900_s23 + $0x100] sm:$0xff] %v2749_v30  ;;  %v2680_v29 = vmul.f32 %v4886_v63, %v2609_v57  ;;  %v2490_v12 = vadd.f32 1e-05, %v2426_v44 }
 0x41c   : > { %v3710_v46 = vpop.eup %3709  ;;  %v2752_v17 = vadd.f32 %v4892_v8, %v2681_v16  ;;  %v2612_v36 = vmul.f32 %v3708_v58, %v4747_v25  ;;  %v2489_v24 = vadd.f32 1e-05, %v2425_v20  ;;  %v2346_v7 = vpop.xlane.xlu1 %2345 }
 0x41d   : > { %v2344_v14 = vpop.xlane.xlu0 %2343  ;;  %v2751_v38 = vadd.f32 %v4892_v8, %v2680_v29  ;;  %v2611_v37 = vmul.f32 %v3710_v46, %v4740_v15  ;;  %3719 = vrsqrt.f32 %v2490_v12  ;;  %v2428_v23 = vmul.f32 0.0078125, %v2346_v7 }
 0x41e   : > { %2816 = vst [vmem:[%s4900_s23 + $0x118] sm:$0xff] %v2752_v17  ;;  %v2683_v59 = vmul.f32 %v4886_v63, %v2612_v36  ;;  %3721 = vrsqrt.f32 %v2489_v24  ;;  %v2427_v53 = vmul.f32 0.0078125, %v2344_v14 }
 0x41f   : > { %v3712_v0 = vpop.eup %3711  ;;  %2815 = vst [vmem:[%s4900_s23 + $0x110] sm:$0xff] %v2751_v38  ;;  %v2682_v47 = vmul.f32 %v4886_v63, %v2611_v37  ;;  %v2492_v25 = vadd.f32 1e-05, %v2428_v23 }
 0x420   : > { %v3714_v60 = vpop.eup %3713  ;;  %v2754_v39 = vadd.f32 %v4892_v8, %v2683_v59  ;;  %v2614_v19 = vmul.f32 %v3712_v0, %v4757_v26  ;;  %v2491_v15 = vadd.f32 1e-05, %v2427_v53  ;;  %v2350_v31 = vpop.xlane.xlu1 %2349  ;;  %v5237_v0 = vld [vmem:[#allocation17_spill] sm:$0xff] }
 0x421   : > { %v2348_v49 = vpop.xlane.xlu0 %2347  ;;  %v2753_v18 = vadd.f32 %v4892_v8, %v2682_v47  ;;  %v2613_v45 = vmul.f32 %v3714_v60, %v4750_v21  ;;  %3723 = vrsqrt.f32 %v2492_v25  ;;  %v2430_v9 = vmul.f32 0.0078125, %v2350_v31 }
 0x422   : > { %2818 = vst [vmem:[%s4900_s23 + $0x128] sm:$0xff] %v2754_v39  ;;  %v2685_v32 = vmul.f32 %v4886_v63, %v2614_v19  ;;  %3725 = vrsqrt.f32 %v2491_v15  ;;  %v2429_v4 = vmul.f32 0.0078125, %v2348_v49  ;;  %v5238_v19 = vld [vmem:[#allocation16_spill] sm:$0xff] }
 0x423   : > { %v3716_v1 = vpop.eup %3715  ;;  %2817 = vst [vmem:[%s4900_s23 + $0x120] sm:$0xff] %v2753_v18  ;;  %v2684_v10 = vmul.f32 %v4886_v63, %v2613_v45  ;;  %v2494_v26 = vadd.f32 1e-05, %v2430_v9 }
 0x424   : > { %v3718_v54 = vpop.eup %3717  ;;  %v2756_v41 = vadd.f32 %v4892_v8, %v2685_v32  ;;  %v2616_v2 = vmul.f32 %v3716_v1, %v4767_v22  ;;  %v2493_v21 = vadd.f32 1e-05, %v2429_v4  ;;  %v2354_v62 = vpop.xlane.xlu1 %2353 }
 0x425   : > { %v2352_v52 = vpop.xlane.xlu0 %2351  ;;  %v2755_v48 = vadd.f32 %v4892_v8, %v2684_v10  ;;  %v2615_v3 = vmul.f32 %v3718_v54, %v4760_v11  ;;  %3727 = vrsqrt.f32 %v2494_v26  ;;  %v2432_v42 = vmul.f32 0.0078125, %v2354_v62  ;;  %v5239_v10 = vld [vmem:[#allocation19_spill] sm:$0xff]  ;;  %v5240_v62 = vld [vmem:[#allocation18_spill] sm:$0xff] }
 0x426   : > { %2820 = vst [vmem:[%s4900_s23 + $0x138] sm:$0xff] %v2756_v41  ;;  %v2687_v56 = vmul.f32 %v4886_v63, %v2616_v2  ;;  %3729 = vrsqrt.f32 %v2493_v21  ;;  %v2431_v27 = vmul.f32 0.0078125, %v2352_v52 }
 0x427   : > { %v3720_v28 = vpop.eup %3719  ;;  %2819 = vst [vmem:[%s4900_s23 + $0x130] sm:$0xff] %v2755_v48  ;;  %v2686_v5 = vmul.f32 %v4886_v63, %v2615_v3  ;;  %v2496_v22 = vadd.f32 1e-05, %v2432_v42 }
 0x428   : > { %v3722_v6 = vpop.eup %3721  ;;  %v2758_v33 = vadd.f32 %v4892_v8, %v2687_v56  ;;  %v2618_v55 = vmul.f32 %v3720_v28, %v4777_v43  ;;  %v2495_v11 = vadd.f32 1e-05, %v2431_v27  ;;  %v2358_v13 = vpop.xlane.xlu1 %2357 }
 0x429   : > { %v2356_v50 = vpop.xlane.xlu0 %2355  ;;  %v2757_v40 = vadd.f32 %v4892_v8, %v2686_v5  ;;  %v2617_v35 = vmul.f32 %v3722_v6, %v4770_v34  ;;  %3731 = vrsqrt.f32 %v2496_v22  ;;  %v2434_v30 = vmul.f32 0.0078125, %v2358_v13  ;;  %v5241_v6 = vld [vmem:[#allocation2_spill] sm:$0xff] }
 0x42a   : > { %2822 = vst [vmem:[%s4900_s23 + $0x148] sm:$0xff] %v2758_v33  ;;  %v2689_v57 = vmul.f32 %v4886_v63, %v2618_v55  ;;  %3733 = vrsqrt.f32 %v2495_v11  ;;  %v2433_v44 = vmul.f32 0.0078125, %v2356_v50 }
 0x42b   : > { %v3724_v16 = vpop.eup %3723  ;;  %2821 = vst [vmem:[%s4900_s23 + $0x140] sm:$0xff] %v2757_v40  ;;  %v2688_v20 = vmul.f32 %v4886_v63, %v2617_v35  ;;  %v2498_v43 = vadd.f32 1e-05, %v2434_v30  ;;  %v5242_v40 = vld [vmem:[#allocation20_spill] sm:$0xff] }
 0x42c   : > { %v3726_v58 = vpop.eup %3725  ;;  %v2760_v29 = vadd.f32 %v4892_v8, %v2689_v57  ;;  %v2620_v12 = vmul.f32 %v3724_v16, %v4787_v61  ;;  %v2497_v34 = vadd.f32 1e-05, %v2433_v44  ;;  %v2362_v46 = vpop.xlane.xlu1 %2361 }
 0x42d   : > { %v2360_v17 = vpop.xlane.xlu0 %2359  ;;  %v2759_v36 = vadd.f32 %v4892_v8, %v2688_v20  ;;  %v2619_v24 = vmul.f32 %v3726_v58, %v4780_v51  ;;  %3735 = vrsqrt.f32 %v2498_v43  ;;  %v2436_v7 = vmul.f32 0.0078125, %v2362_v46 }
 0x42e   : > { %2824 = vst [vmem:[%s4900_s23 + $0x158] sm:$0xff] %v2760_v29  ;;  %v2691_v14 = vmul.f32 %v4886_v63, %v2620_v12  ;;  %3737 = vrsqrt.f32 %v2497_v34  ;;  %v2435_v38 = vmul.f32 0.0078125, %v2360_v17  ;;  %v5243_v12 = vld [vmem:[#allocation4_spill] sm:$0xff] }
 0x42f   : > { %v3728_v37 = vpop.eup %3727  ;;  %2823 = vst [vmem:[%s4900_s23 + $0x150] sm:$0xff] %v2759_v36  ;;  %v2690_v23 = vmul.f32 %v4886_v63, %v2619_v24  ;;  %v2500_v61 = vadd.f32 1e-05, %v2436_v7  ;;  %v5244_v7 = vld [vmem:[#allocation3_spill] sm:$0xff] }
 0x430   : > { %v3730_v59 = vpop.eup %3729  ;;  %v2762_v53 = vadd.f32 %v4892_v8, %v2691_v14  ;;  %v2622_v47 = vmul.f32 %v3728_v37, %v5237_v0  ;;  %v2499_v51 = vadd.f32 1e-05, %v2435_v38  ;;  %v2366_v25 = vpop.xlane.xlu1 %2365 }
 0x431   : > { %v2364_v60 = vpop.xlane.xlu0 %2363  ;;  %v2761_v39 = vadd.f32 %v4892_v8, %v2690_v23  ;;  %v2621_v15 = vmul.f32 %v3730_v59, %v5238_v19  ;;  %3739 = vrsqrt.f32 %v2500_v61  ;;  %v2438_v31 = vmul.f32 0.0078125, %v2366_v25 }
 0x432   : > { %2826 = vst [vmem:[%s4900_s23 + $0x168] sm:$0xff] %v2762_v53  ;;  %v2693_v49 = vmul.f32 %v4886_v63, %v2622_v47  ;;  %3741 = vrsqrt.f32 %v2499_v51  ;;  %v2437_v18 = vmul.f32 0.0078125, %v2364_v60  ;;  %v5245_v51 = vld [vmem:[#allocation6_spill] sm:$0xff] }
 0x433   : > { %v3732_v45 = vpop.eup %3731  ;;  %2825 = vst [vmem:[%s4900_s23 + $0x160] sm:$0xff] %v2761_v39  ;;  %v2692_v9 = vmul.f32 %v4886_v63, %v2621_v15  ;;  %v2502_v32 = vadd.f32 1e-05, %v2438_v31  ;;  %v5246_v31 = vld [vmem:[#allocation5_spill] sm:$0xff] }
 0x434   : > { %v3734_v4 = vpop.eup %3733  ;;  %v2764_v1 = vadd.f32 %v4892_v8, %v2693_v49  ;;  %v2624_v26 = vmul.f32 %v3732_v45, %v5239_v10  ;;  %v2501_v54 = vadd.f32 1e-05, %v2437_v18  ;;  %v2370_v41 = vpop.xlane.xlu1 %2369 }
 0x435   : > { %v2368_v2 = vpop.xlane.xlu0 %2367  ;;  %v2763_v21 = vadd.f32 %v4892_v8, %v2692_v9  ;;  %v2623_v52 = vmul.f32 %v3734_v4, %v5240_v62  ;;  %3743 = vrsqrt.f32 %v2502_v32  ;;  %v2440_v48 = vmul.f32 0.0078125, %v2370_v41  ;;  %v5248_v62 = vld [vmem:[#allocation7_spill] sm:$0xff] }
 0x436   : > { %2828 = vst [vmem:[%s4900_s23 + $0x178] sm:$0xff] %v2764_v1  ;;  %v2695_v3 = vmul.f32 %v4886_v63, %v2624_v26  ;;  %3745 = vrsqrt.f32 %v2501_v54  ;;  %v2439_v42 = vmul.f32 0.0078125, %v2368_v2  ;;  %v5247_v54 = vld [vmem:[#allocation8_spill] sm:$0xff] }
 0x437   : > { %v3736_v56 = vpop.eup %3735  ;;  %2827 = vst [vmem:[%s4900_s23 + $0x170] sm:$0xff] %v2763_v21  ;;  %v2694_v27 = vmul.f32 %v4886_v63, %v2623_v52  ;;  %v2504_v28 = vadd.f32 1e-05, %v2440_v48  ;;  %v3763_v48 = vld [vmem:[%s5156_s7] ss:$0 sm:$0xff] }
 0x438   : > { %v3738_v5 = vpop.eup %3737  ;;  %v2766_v22 = vadd.f32 %v4892_v8, %v2695_v3  ;;  %v2626_v33 = vmul.f32 %v3736_v56, %v5241_v6  ;;  %v2503_v55 = vadd.f32 1e-05, %v2439_v42  ;;  %v2374_v11 = vpop.xlane.xlu1 %2373  ;;  %v5250_v6 = vld [vmem:[#allocation9_spill] sm:$0xff] }
 0x439   : > { %v2372_v13 = vpop.xlane.xlu0 %2371  ;;  %v2765_v50 = vadd.f32 %v4892_v8, %v2694_v27  ;;  %v2625_v35 = vmul.f32 %v3738_v5, %v5242_v40  ;;  %3747 = vrsqrt.f32 %v2504_v28  ;;  %v2442_v30 = vmul.f32 0.0078125, %v2374_v11  ;;  %v5249_v28 = vld [vmem:[#allocation10_spill] sm:$0xff] }
 0x43a   : > { %2830 = vst [vmem:[%s4900_s23 + $0x188] sm:$0xff] %v2766_v22  ;;  %v2697_v57 = vmul.f32 %v4886_v63, %v2626_v33  ;;  %3749 = vrsqrt.f32 %v2503_v55  ;;  %v2441_v44 = vmul.f32 0.0078125, %v2372_v13 }
 0x43b   : > { %v3740_v16 = vpop.eup %3739  ;;  %2829 = vst [vmem:[%s4900_s23 + $0x180] sm:$0xff] %v2765_v50  ;;  %v2696_v20 = vmul.f32 %v4886_v63, %v2625_v35  ;;  %v2506_v43 = vadd.f32 1e-05, %v2442_v30  ;;  %v5251_v35 = vld [vmem:[#allocation21_spill] sm:$0xff] }
 0x43c   : > { %v3742_v58 = vpop.eup %3741  ;;  %v2768_v29 = vadd.f32 %v4892_v8, %v2697_v57  ;;  %v2628_v34 = vmul.f32 %v3740_v16, %v5243_v12  ;;  %v2505_v46 = vadd.f32 1e-05, %v2441_v44  ;;  %v2378_v17 = vpop.xlane.xlu1 %2377  ;;  %v5252_v44 = vld [vmem:[#allocation11_spill] sm:$0xff] }
 0x43d   : > { %v2376_v36 = vpop.xlane.xlu0 %2375  ;;  %v2767_v24 = vadd.f32 %v4892_v8, %v2696_v20  ;;  %v2627_v14 = vmul.f32 %v3742_v58, %v5244_v7  ;;  %3751 = vrsqrt.f32 %v2506_v43  ;;  %v2444_v38 = vmul.f32 0.0078125, %v2378_v17 }
 0x43e   : > { %2832 = vst [vmem:[%s4900_s23 + $0x198] sm:$0xff] %v2768_v29  ;;  %v2699_v37 = vmul.f32 %v4886_v63, %v2628_v34  ;;  %3753 = vrsqrt.f32 %v2505_v46  ;;  %v2443_v23 = vmul.f32 0.0078125, %v2376_v36  ;;  %v5253_v34 = vld [vmem:[#allocation13_spill] sm:$0xff]  ;;  %v5254_v36 = vld [vmem:[#allocation12_spill] sm:$0xff] }
 0x43f   : > { %v3744_v61 = vpop.eup %3743  ;;  %2831 = vst [vmem:[%s4900_s23 + $0x190] sm:$0xff] %v2767_v24  ;;  %v2698_v59 = vmul.f32 %v4886_v63, %v2627_v14  ;;  %v2508_v53 = vadd.f32 1e-05, %v2444_v38 }
 0x440   : > { %v3746_v0 = vpop.eup %3745  ;;  %v2770_v47 = vadd.f32 %v4892_v8, %v2699_v37  ;;  %v2630_v25 = vmul.f32 %v3744_v61, %v5245_v51  ;;  %v2507_v60 = vadd.f32 1e-05, %v2443_v23  ;;  %v2382_v39 = vpop.xlane.xlu1 %2381 }
 0x441   : > { %v2380_v19 = vpop.xlane.xlu0 %2379  ;;  %v2769_v15 = vadd.f32 %v4892_v8, %v2698_v59  ;;  %v2629_v49 = vmul.f32 %v3746_v0, %v5246_v31  ;;  %3755 = vrsqrt.f32 %v2508_v53  ;;  %v2446_v18 = vmul.f32 0.0078125, %v2382_v39 }
 0x442   : > { %2834 = vst [vmem:[%s4900_s23 + $0x1a8] sm:$0xff] %v2770_v47  ;;  %v2701_v45 = vmul.f32 %v4886_v63, %v2630_v25  ;;  %3757 = vrsqrt.f32 %v2507_v60  ;;  %v2445_v9 = vmul.f32 0.0078125, %v2380_v19 }
 0x443   : > { %v3748_v32 = vpop.eup %3747  ;;  %2833 = vst [vmem:[%s4900_s23 + $0x1a0] sm:$0xff] %v2769_v15  ;;  %v2700_v4 = vmul.f32 %v4886_v63, %v2629_v49  ;;  %v2510_v1 = vadd.f32 1e-05, %v2446_v18 }
 0x444   : > { %v3750_v10 = vpop.eup %3749  ;;  %v2772_v26 = vadd.f32 %v4892_v8, %v2701_v45  ;;  %v2632_v41 = vmul.f32 %v3748_v32, %v5247_v54  ;;  %v2509_v2 = vadd.f32 1e-05, %v2445_v9 }
 0x445   : > { %v2771_v21 = vadd.f32 %v4892_v8, %v2700_v4  ;;  %v2631_v52 = vmul.f32 %v3750_v10, %v5248_v62  ;;  %3759 = vrsqrt.f32 %v2510_v1  ;;  %v3764_v8 = vld [vmem:[%s5157_s8] ss:$0 sm:$0xff] }
 0x446   : > { %2836 = vst [vmem:[%s4900_s23 + $0x1b8] sm:$0xff] %v2772_v26  ;;  %v2703_v63 = vmul.f32 %v3763_v48, %v2632_v41  ;;  %3761 = vrsqrt.f32 %v2509_v2 }
 0x447   : > { %v3752_v3 = vpop.eup %3751  ;;  %2835 = vst [vmem:[%s4900_s23 + $0x1b0] sm:$0xff] %v2771_v21  ;;  %v2702_v42 = vmul.f32 %v3763_v48, %v2631_v52 }
 0x448   : > { %v3754_v56 = vpop.eup %3753  ;;  %v2774_v27 = vadd.f32 %v3764_v8, %v2703_v63  ;;  %v2634_v5 = vmul.f32 %v3752_v3, %v5249_v28 }
 0x449   : > { %v2773_v22 = vadd.f32 %v3764_v8, %v2702_v42  ;;  %v2633_v33 = vmul.f32 %v3754_v56, %v5250_v6 }
 0x44a   : > { %2838 = vst [vmem:[%s4900_s23 + $0x1c8] sm:$0xff] %v2774_v27  ;;  %v2705_v55 = vmul.f32 %v3763_v48, %v2634_v5 }
 0x44b   : > { %v3756_v11 = vpop.eup %3755  ;;  %2837 = vst [vmem:[%s4900_s23 + $0x1c0] sm:$0xff] %v2773_v22  ;;  %v2704_v13 = vmul.f32 %v3763_v48, %v2633_v33 }
 0x44c   : > { %v3758_v50 = vpop.eup %3757  ;;  %v2776_v40 = vadd.f32 %v3764_v8, %v2705_v55  ;;  %v2636_v30 = vmul.f32 %v3756_v11, %v5251_v35 }
 0x44d   : > { %v2775_v57 = vadd.f32 %v3764_v8, %v2704_v13  ;;  %v2635_v16 = vmul.f32 %v3758_v50, %v5252_v44 }
 0x44e   : > { %2840 = vst [vmem:[%s4900_s23 + $0x1d8] sm:$0xff] %v2776_v40  ;;  %v2707_v20 = vmul.f32 %v3763_v48, %v2636_v30 }
 0x44f   : > { %v3760_v43 = vpop.eup %3759  ;;  %2839 = vst [vmem:[%s4900_s23 + $0x1d0] sm:$0xff] %v2775_v57  ;;  %v2706_v58 = vmul.f32 %v3763_v48, %v2635_v16 }
 0x450   : > { %v3762_v29 = vpop.eup %3761  ;;  %v2778_v12 = vadd.f32 %v3764_v8, %v2707_v20  ;;  %v2638_v46 = vmul.f32 %v3760_v43, %v5253_v34 }
 0x451   : > { %v2777_v17 = vadd.f32 %v3764_v8, %v2706_v58  ;;  %v2637_v24 = vmul.f32 %v3762_v29, %v5254_v36 }
 0x452   : > { %2842 = vst [vmem:[%s4900_s23 + $0x1e8] sm:$0xff] %v2778_v12  ;;  %v2709_v7 = vmul.f32 %v3763_v48, %v2638_v46 }
 0x453   : > { %2841 = vst [vmem:[%s4900_s23 + $0x1e0] sm:$0xff] %v2777_v17  ;;  %v2708_v14 = vmul.f32 %v3763_v48, %v2637_v24 }
 0x454   : > { %v2780_v38 = vadd.f32 %v3764_v8, %v2709_v7 }
 0x455   : > { %v2779_v37 = vadd.f32 %v3764_v8, %v2708_v14 }
 0x456   : > { %2844 = vst [vmem:[%s4900_s23 + $0x1f8] sm:$0xff] %v2780_v38 }
 0x457   : > { %2843 = vst [vmem:[%s4900_s23 + $0x1f0] sm:$0xff] %v2779_v37 }
 0x458 PF: > { %s19_s30 = sadd.s32 1, %s3771_s30  }
 0x459   : > { %p16_p4 = scmp.ge.s32.totalorder %s19_s30, 4  }
 0x45b   :  { %18 = sbr.rel (!%p16_p4) target bundleno = 1 (0x1), region = 86 }

</bundles_post_ra>
